<compile_context>
chip_gen: v6e
topology: v6e:2x2x1
jax: 0.10.0
libtpu: 0.0.40
codegen_flags: <defaults>
</compile_context>

<pallas_src>
import jax
import jax.numpy as jnp
from jax.experimental import pallas as pl
from jax.experimental.pallas import tpu as pltpu


def se_gate_conv1x1_kernel(gate_ref, x_ref, w_ref, o_ref):
    # gate_ref: (1, Cin)   x_ref: (Cin, tHW)   w_ref: (Cout, Cin)   o_ref: (Cout, tHW)
    g = jax.nn.sigmoid(gate_ref[...])                  # (1, Cin)      EUP (free slot)
    w_scaled = w_ref[...] * g                          # (Cout, Cin)   fold gate into weight
    o_ref[...] = jnp.dot(                              # (Cout, tHW)   MXU, lane-dense output
        w_scaled, x_ref[...], preferred_element_type=jnp.float32
    ).astype(o_ref.dtype)


def sigmoid_mul_conv1x1(x_nchw, gate_nc11, w_oi11, *, hw_block=512):
    """x_nchw: (1, Cin, H, W), gate_nc11: (1, Cin, 1, 1), w_oi11: (Cout, Cin, 1, 1)."""
    N, Cin, H, W = x_nchw.shape
    Cout = w_oi11.shape[0]
    # TODO(synk): N > 1 would need a batch grid axis; the source module is N == 1.
    assert N == 1, "module uses a single SE gate (N == 1)"
    assert gate_nc11.shape == (1, Cin, 1, 1)
    HW = H * W

    # Free reshapes (no transposes, no padding): NCHW with N==1 -> (Cin, HW)
    x = x_nchw.reshape(Cin, HW)
    gate = gate_nc11.reshape(1, Cin)
    w = w_oi11.reshape(Cout, Cin)

    # HW tile: multiple of 128 (lane constraint) unless the whole HW fits in one block.
    if HW <= hw_block:
        hw_block = HW                       # single full block (block == full dim is legal)
    else:
        hw_block = (hw_block // 128) * 128  # keep lane-aligned; ragged tail is masked by Pallas
    grid = (pl.cdiv(HW, hw_block),)

    out = pl.pallas_call(
        se_gate_conv1x1_kernel,
        out_shape=jax.ShapeDtypeStruct((Cout, HW), x.dtype),
        grid=grid,
        in_specs=[
            pl.BlockSpec((1, Cin), lambda i: (0, 0)),        # gate   (resident, no re-DMA)
            pl.BlockSpec((Cin, hw_block), lambda i: (0, i)),  # activation tile (pipelined)
            pl.BlockSpec((Cout, Cin), lambda i: (0, 0)),     # weight (resident, no re-DMA)
        ],
        out_specs=pl.BlockSpec((Cout, hw_block), lambda i: (0, i)),
        compiler_params=pltpu.CompilerParams(
            # parallel: pipelined on 1-TC chips, sharded across both TCs on v7x
            dimension_semantics=("parallel",),
        ),
        cost_estimate=pl.CostEstimate(
            flops=2 * Cout * Cin * HW,
            transcendentals=Cin * grid[0],
            bytes_accessed=4 * (Cin * HW + Cout * HW + grid[0] * (Cin + Cout * Cin)),
        ),
    )(gate, x, w)

    return out.reshape(N, Cout, H, W)  # free reshape back to NCHW


if __name__ == "__main__":
    key = jax.random.PRNGKey(0)
    k1, k2, k3 = jax.random.split(key, 3)

    N, Cin, H, W, Cout = 1, 480, 28, 28, 80

    x263 = jax.random.normal(k1, (N, Cin, H, W), dtype=jnp.float32)
    x267 = jax.random.normal(k2, (1, Cin, 1, 1), dtype=jnp.float32)
    # Deterministic 1x1-conv weight (kaiming-ish scale, fan_in = Cin)
    w = jax.random.normal(k3, (Cout, Cin, 1, 1), dtype=jnp.float32) / jnp.sqrt(Cin)

    out = jax.block_until_ready(sigmoid_mul_conv1x1(x263, x267, w))

    # Pure-JAX reference (sigmoid-mul + 1x1 conv as einsum)
    gated = jax.nn.sigmoid(x267) * x263
    ref = jnp.einsum("nchw,oc->nohw", gated, w.reshape(Cout, Cin))
    assert out.shape == (N, Cout, H, W)
    assert jnp.allclose(out, ref, atol=1e-4, rtol=1e-4)

    print("KERNEL_OK")
</pallas_src>

<mosaic_0001>
module attributes {stable_mosaic.version = 11 : i64} {
  func.func @se_gate_conv1x1_kernel(%arg0: i32, %arg1: memref<1x480xf32, #tpu.memory_space<vmem>>, %arg2: memref<480x512xf32, #tpu.memory_space<vmem>>, %arg3: memref<80x480xf32, #tpu.memory_space<vmem>>, %arg4: memref<80x512xf32, #tpu.memory_space<vmem>>) attributes {dimension_semantics = [#tpu.dimension_semantics<parallel>], iteration_bounds = array<i64: 2>, scalar_prefetch = 0 : i64, scratch_operands = 0 : i64, tpu.core_type = #tpu.core_type<tc>, window_params = [{pipeline_mode = #tpu.pipeline_mode<synchronous>, transform_indices = @transform_0, window_bounds = array<i64: 1, 480>}, {transform_indices = @transform_1, window_bounds = array<i64: 480, 512>}, {pipeline_mode = #tpu.pipeline_mode<synchronous>, transform_indices = @transform_2, window_bounds = array<i64: 80, 480>}, {transform_indices = @transform_3, window_bounds = array<i64: 80, 512>}]} {
    %c0 = arith.constant 0 : index
    %c0_0 = arith.constant 0 : index
    %0 = vector.load %arg1[%c0, %c0_0] : memref<1x480xf32, #tpu.memory_space<vmem>>, vector<1x480xf32>
    %1 = arith.negf %0 : vector<1x480xf32>
    %2 = math.exp %1 : vector<1x480xf32>
    %cst = arith.constant 1.000000e+00 : f32
    %3 = vector.broadcast %cst : f32 to vector<1x480xf32>
    %4 = arith.addf %3, %2 : vector<1x480xf32>
    %5 = arith.divf %3, %4 : vector<1x480xf32>
    %c0_1 = arith.constant 0 : index
    %c0_2 = arith.constant 0 : index
    %6 = vector.load %arg3[%c0_1, %c0_2] : memref<80x480xf32, #tpu.memory_space<vmem>>, vector<80x480xf32>
    %7 = vector.broadcast %5 : vector<1x480xf32> to vector<80x480xf32>
    %8 = arith.mulf %6, %7 : vector<80x480xf32>
    %c0_3 = arith.constant 0 : index
    %c0_4 = arith.constant 0 : index
    %9 = vector.load %arg2[%c0_3, %c0_4] : memref<480x512xf32, #tpu.memory_space<vmem>>, vector<480x512xf32>
    %cst_5 = arith.constant dense<0.000000e+00> : vector<80x512xf32>
    %10 = tpu.matmul %8, %9, %cst_5 {dimension_numbers = #tpu.dot_dimension_numbers<[1], [0], [0], [1], [0, 0, 1, 1], [], []>} : vector<80x480xf32>, vector<480x512xf32>, vector<80x512xf32> -> vector<80x512xf32>
    %c0_6 = arith.constant 0 : index
    %c0_7 = arith.constant 0 : index
    %11 = vector.load %arg4[%c0_6, %c0_7] : memref<80x512xf32, #tpu.memory_space<vmem>>, vector<80x512xf32>
    tpu.vector_store %arg4[%c0_6, %c0_7], %10 {strides = array<i32>} : memref<80x512xf32, #tpu.memory_space<vmem>>, vector<80x512xf32>,
    return
  }
  func.func @transform_0(%arg0: i32) -> (i32, i32) {
    %c0_i32 = arith.constant 0 : i32
    %c0_i32_0 = arith.constant 0 : i32
    %c0_i32_1 = arith.constant 0 : i32
    return %c0_i32, %c0_i32_0 : i32, i32
  }
  func.func @transform_1(%arg0: i32) -> (i32, i32) {
    %c0_i32 = arith.constant 0 : i32
    %c0_i32_0 = arith.constant 0 : i32
    return %c0_i32, %arg0 : i32, i32
  }
  func.func @transform_2(%arg0: i32) -> (i32, i32) {
    %c0_i32 = arith.constant 0 : i32
    %c0_i32_0 = arith.constant 0 : i32
    %c0_i32_1 = arith.constant 0 : i32
    return %c0_i32, %c0_i32_0 : i32, i32
  }
  func.func @transform_3(%arg0: i32) -> (i32, i32) {
    %c0_i32 = arith.constant 0 : i32
    %c0_i32_0 = arith.constant 0 : i32
    return %c0_i32, %arg0 : i32, i32
  }
}

</mosaic_0001>

<bundles_post_ra>
// kernel: tpu_custom_call.1
= control target key start
LH: loop header
LB: loop body
LE: loop exit
PB: predicated region body
PF: predicated region fallthrough
CT: control target
= control target key end

     0   :  { %s5049_s0 = inlined_call_operand.vmem [shape: f32[1,480], index: 0, kind: input, shape index: {}]   ;;  %s5050_s1 = inlined_call_operand.vmem [shape: f32[480,784], index: 1, kind: input, shape index: {}]   ;;  %s5051_s2 = inlined_call_operand.vmem [shape: f32[80,480], index: 2, kind: input, shape index: {}]   ;;  %s5052_s3 = inlined_call_operand.hbm [shape: f32[80,784], index: 3, kind: output, shape index: {}]  }
   0x1   :  { %5053 = sst [smem:[#allocation6_spill]] %s5050_s1 }
   0x2   :  { %8 = vsyncpa [#allocation4], 0 }
   0x3   :  { %10 = vsyncpa [#allocation4 + $0x1], 0  ;;  %s2834_s12 = smov 0   ;;  %s2836_s13 = smov 0  }
   0x4   :  { %s2838_s14 = smov 0   ;;  %s2840_s15 = smov 0  }
   0x5 LB: > { %s2855_s16 = sadd.s32 4294967295, %s2743_s15   ;;  %s2376_s17 = sadd.s32 4294967294, %s2743_s15   ;;  %s2743_s15 = sphi %s2840_s15, %s5080_s15   ;;  %s2739_s14 = sphi %s2838_s14, %s5079_s14   ;;  %s2735_s13 = sphi %s2836_s13, %s5078_s13   ;;  %s2731_s12 = sphi %s2834_s12, %s5077_s12  }
   0x6   : > { %s2859_s18 = sadd.s32 1, %s2743_s15   ;;  %s44_s19 = sadd.s32 1, %s2739_s14 }
   0x7   : > { %s41_s20 = ssub.s32 %s2743_s15, %s2859_s18  ;;  %p51_p0 = scmp.ne.s32.totalorder %s2739_s14, %s2735_s13 }
   0x8   : > { %p42_p1 = scmp.eq.s32.totalorder %s41_s20, 0  ;;  %p52_p2 = scmp.eq.s32.totalorder %s2743_s15, 0 }
   0x9   : > { %p102_p3 = scmp.eq.s32.totalorder %s2855_s16, 1  ;;  %p107_p4 = scmp.ne.s32.totalorder %s2735_s13, %s2731_s12 }
   0xa   : > { %s2871_s21 = scalar_select %p42_p1, %s2739_s14, %s44_s19  }
   0xb   : > { %p53_p5 = por %p52_p2, %p51_p0  ;;  %p2873_p6 = por %p102_p3, %p51_p0 }
   0xc   : > { %p108_p7 = scmp.eq.s32.totalorder %s2376_s17, 1  ;;  %p2378_p9 = scmp.ge.s32.totalorder %s2743_s15, 2 }
   0xe   : > { %p2877_p8 = por %p108_p7, %p107_p4  ;;  %130 = sbr.rel (%p2378_p9) target bundleno = 389 (0x185), region = 24 }
  0x13   : > { %133 = sbr.rel (!%p53_p5) target bundleno = 389 (0x185), region = 28  ;;  %s135_s24 = sand.u32 (%p53_p5), 1, %s2739_s14  }
  0x14   : > { %s2379_s25 = sshll.u32 (%p53_p5), %s2743_s15, 2  ;;  %s2442_s26 = smul.u32 (%p53_p5), 1920, %s135_s24 }
  0x15   : > { %s139_s27 = ssub.s32 (%p53_p5), 7, %s2379_s25  ;;  %s2436_s28 = sshll.u32 (%p53_p5), %s2743_s15, 5 }
  0x16   : > { %p140_p10 = scmp.lt.s32.totalorder (%p53_p5), %s139_s27, 4  ;;  %s5056_s1 = sld [smem:[#allocation6_spill]] (%p53_p5) }
  0x17   : > { %s2894_s7 = scalar_lea.vmem (%p53_p5), [#allocation2], %s2442_s26  }
  0x18   : > { %s5082_s27 = smov (!%p140_p10, %s139_s27), 4 }
  0x19   : > { %s142_s5 = smul.u32 7680, %s5082_s27  ;;  %s2892_s6 = sshll.u32 %s5082_s27, 3 }
  0x1b   : > { %p2383_p11 = scmp.eq.s32.totalorder %s142_s5, 0 }
  0x1c   : > { %s2890_s4 = scalar_lea.vmem %s5056_s1, %s2436_s28   ;;  %p150_p12 = scmp.lt.u32.totalorder (!%p2383_p11), %s2892_s6, 8 }
  0x1d   : > { %149 = sbr.rel (%p2383_p11) target bundleno = 389 (0x185), region = 32 }
  0x22   : > { %153 = sbr.rel (%p150_p12) target bundleno = 322 (0x142), region = 36  ;;  %s2898_s8 = sand.u32 (!%p150_p12), 7, %s2892_s6  }
  0x23   : > { %p288_p13 = scmp.eq.s32.totalorder (!%p150_p12), %s2898_s8, 0  ;;  %p2384_p0 = scmp.ne.s32.totalorder (!%p150_p12), %s2898_s8, 0 }
  0x27   : > { %291 = sbr.rel (%p2384_p0) target bundleno = 149 (0x95), region = 51  ;;  %s292_s9 = sshrl.u32 (!%p2384_p0), %s2892_s6, 3 }
  0x28   : > { %s2905_s10 = sshrl.u32 (!%p2384_p0), %s292_s9, 1 }
  0x29   : > { %p2385_p1 = scmp.le.s32.totalorder (!%p2384_p0), %s2905_s10, 0 }
  0x2c   : > { %2304 = sbr.rel (%p2385_p1) target bundleno = 110 (0x6e), region = 150  ;;  %s5057_s11 = smov (!%p2385_p1), %s2894_s7 }
  0x2d   : > { %s5058_s17 = smov (!%p2385_p1), %s2890_s4  ;;  %s2914_s19 = smov (!%p2385_p1), 0  }
  0x2e   : > { %s2916_s20 = smov (!%p2385_p1), 0  }
  0x31 LB: >> { %v305_v0 = vld [vmem:[%s2751_s17] sm:$0xff]  ;;  %v307_v1 = vld [vmem:[%s2751_s17 + $0x8] sm:$0xff]  ;;  %v309_v2 = vld [vmem:[%s2751_s17 + $0x38] sm:$0xff]  ;;  %s545_s24 = sadd.s32 1, %s2755_s19  ;;  %s299_s20 = sadd.s32 1, %s2759_s20   ;;  %s2759_s20 = sphi %s2916_s20, %s299_s20   ;;  %s2755_s19 = sphi %s2914_s19, %s5061_s19   ;;  %s2751_s17 = sphi %s5058_s17, %s5060_s17   ;;  %s2747_s11 = sphi %s5057_s11, %s5059_s11  }
  0x32   : >> { %306 = vst [vmem:[%s2747_s11] sm:$0xff] %v305_v0  ;;  %308 = vst [vmem:[%s2747_s11 + $0x8] sm:$0xff] %v307_v1  ;;  %v311_v3 = vld [vmem:[%s2751_s17 + $0x40] sm:$0xff]  ;;  %v313_v4 = vld [vmem:[%s2751_s17 + $0x70] sm:$0xff]  ;;  %p546_p2 = scmp.ge.s32.totalorder %s545_s24, %s2905_s10  ;;  %p298_p3 = scmp.ge.s32.totalorder %s299_s20, %s2905_s10 }
  0x33   : >> { %310 = vst [vmem:[%s2747_s11 + $0x20] sm:$0xff] %v309_v2  ;;  %v315_v5 = vld [vmem:[%s2751_s17 + $0x78] sm:$0xff]  ;;  %312 = vst [vmem:[%s2747_s11 + $0x28] sm:$0xff] %v311_v3  ;;  %v317_v6 = vld [vmem:[%s2751_s17 + $0xa8] sm:$0xff] }
  0x34   : >> { %314 = vst [vmem:[%s2747_s11 + $0x40] sm:$0xff] %v313_v4  ;;  %316 = vst [vmem:[%s2747_s11 + $0x48] sm:$0xff] %v315_v5  ;;  %v319_v7 = vld [vmem:[%s2751_s17 + $0xb0] sm:$0xff]  ;;  %v321_v8 = vld [vmem:[%s2751_s17 + $0xe0] sm:$0xff]  ;;  %s5084_s24 = smov (%p546_p2, %s545_s24), 0 }
  0x35   : >> { %318 = vst [vmem:[%s2747_s11 + $0x60] sm:$0xff] %v317_v6  ;;  %320 = vst [vmem:[%s2747_s11 + $0x68] sm:$0xff] %v319_v7  ;;  %v323_v9 = vld [vmem:[%s2751_s17 + $0xe8] sm:$0xff]  ;;  %v325_v10 = vld [vmem:[%s2751_s17 + $0x118] sm:$0xff]  ;;  %s2386_s25 = sshll.u32 %s5084_s24, 4  ;;  %s5061_s19 = smov %s5084_s24 }
  0x36   : >> { %322 = vst [vmem:[%s2747_s11 + $0x80] sm:$0xff] %v321_v8  ;;  %v327_v11 = vld [vmem:[%s2751_s17 + $0x120] sm:$0xff]  ;;  %324 = vst [vmem:[%s2747_s11 + $0x88] sm:$0xff] %v323_v9  ;;  %v329_v12 = vld [vmem:[%s2751_s17 + $0x150] sm:$0xff]  ;;  %s2972_s26 = scalar_lea.vmem %s2890_s4, %s2386_s25   ;;  %s2975_s27 = scalar_lea.vmem %s2894_s7, %s2386_s25 [#allocation2]  }
  0x37   : >> { %326 = vst [vmem:[%s2747_s11 + $0xa0] sm:$0xff] %v325_v10  ;;  %328 = vst [vmem:[%s2747_s11 + $0xa8] sm:$0xff] %v327_v11  ;;  %v331_v13 = vld [vmem:[%s2751_s17 + $0x158] sm:$0xff]  ;;  %v333_v14 = vld [vmem:[%s2751_s17 + $0x188] sm:$0xff] }
  0x38   : >> { %330 = vst [vmem:[%s2747_s11 + $0xc0] sm:$0xff] %v329_v12  ;;  %332 = vst [vmem:[%s2747_s11 + $0xc8] sm:$0xff] %v331_v13  ;;  %v335_v15 = vld [vmem:[%s2751_s17 + $0x190] sm:$0xff]  ;;  %v337_v16 = vld [vmem:[%s2751_s17 + $0x1c0] sm:$0xff] }
  0x39   : >> { %334 = vst [vmem:[%s2747_s11 + $0xe0] sm:$0xff] %v333_v14  ;;  %v339_v17 = vld [vmem:[%s2751_s17 + $0x1c8] sm:$0xff]  ;;  %336 = vst [vmem:[%s2747_s11 + $0xe8] sm:$0xff] %v335_v15  ;;  %v341_v18 = vld [vmem:[%s2751_s17 + $0x1f8] sm:$0xff] }
  0x3a   : >> { %338 = vst [vmem:[%s2747_s11 + $0x100] sm:$0xff] %v337_v16  ;;  %340 = vst [vmem:[%s2747_s11 + $0x108] sm:$0xff] %v339_v17  ;;  %v343_v19 = vld [vmem:[%s2751_s17 + $0x200] sm:$0xff]  ;;  %v345_v20 = vld [vmem:[%s2751_s17 + $0x230] sm:$0xff] }
  0x3b   : >> { %342 = vst [vmem:[%s2747_s11 + $0x120] sm:$0xff] %v341_v18  ;;  %344 = vst [vmem:[%s2747_s11 + $0x128] sm:$0xff] %v343_v19  ;;  %v347_v21 = vld [vmem:[%s2751_s17 + $0x238] sm:$0xff]  ;;  %v349_v22 = vld [vmem:[%s2751_s17 + $0x268] sm:$0xff] }
  0x3c   : >> { %346 = vst [vmem:[%s2747_s11 + $0x140] sm:$0xff] %v345_v20  ;;  %v351_v23 = vld [vmem:[%s2751_s17 + $0x270] sm:$0xff]  ;;  %348 = vst [vmem:[%s2747_s11 + $0x148] sm:$0xff] %v347_v21  ;;  %v353_v24 = vld [vmem:[%s2751_s17 + $0x2a0] sm:$0xff] }
  0x3d   : >> { %350 = vst [vmem:[%s2747_s11 + $0x160] sm:$0xff] %v349_v22  ;;  %352 = vst [vmem:[%s2747_s11 + $0x168] sm:$0xff] %v351_v23  ;;  %v355_v25 = vld [vmem:[%s2751_s17 + $0x2a8] sm:$0xff]  ;;  %v357_v26 = vld [vmem:[%s2751_s17 + $0x2d8] sm:$0xff] }
  0x3e   : >> { %354 = vst [vmem:[%s2747_s11 + $0x180] sm:$0xff] %v353_v24  ;;  %356 = vst [vmem:[%s2747_s11 + $0x188] sm:$0xff] %v355_v25  ;;  %v359_v27 = vld [vmem:[%s2751_s17 + $0x2e0] sm:$0xff]  ;;  %v361_v28 = vld [vmem:[%s2751_s17 + $0x310] sm:$0xff] }
  0x3f   : >> { %358 = vst [vmem:[%s2747_s11 + $0x1a0] sm:$0xff] %v357_v26  ;;  %v363_v29 = vld [vmem:[%s2751_s17 + $0x318] sm:$0xff]  ;;  %360 = vst [vmem:[%s2747_s11 + $0x1a8] sm:$0xff] %v359_v27  ;;  %v365_v30 = vld [vmem:[%s2751_s17 + $0x348] sm:$0xff] }
  0x40   : >> { %362 = vst [vmem:[%s2747_s11 + $0x1c0] sm:$0xff] %v361_v28  ;;  %364 = vst [vmem:[%s2747_s11 + $0x1c8] sm:$0xff] %v363_v29  ;;  %v367_v31 = vld [vmem:[%s2751_s17 + $0x350] sm:$0xff]  ;;  %v369_v32 = vld [vmem:[%s2751_s17 + $0x380] sm:$0xff] }
  0x41   : >> { %366 = vst [vmem:[%s2747_s11 + $0x1e0] sm:$0xff] %v365_v30  ;;  %368 = vst [vmem:[%s2747_s11 + $0x1e8] sm:$0xff] %v367_v31  ;;  %v371_v33 = vld [vmem:[%s2751_s17 + $0x388] sm:$0xff]  ;;  %v373_v34 = vld [vmem:[%s2751_s17 + $0x3b8] sm:$0xff] }
  0x42   : >> { %370 = vst [vmem:[%s2747_s11 + $0x200] sm:$0xff] %v369_v32  ;;  %v375_v35 = vld [vmem:[%s2751_s17 + $0x3c0] sm:$0xff]  ;;  %372 = vst [vmem:[%s2747_s11 + $0x208] sm:$0xff] %v371_v33  ;;  %v377_v36 = vld [vmem:[%s2751_s17 + $0x3f0] sm:$0xff] }
  0x43   : >> { %374 = vst [vmem:[%s2747_s11 + $0x220] sm:$0xff] %v373_v34  ;;  %376 = vst [vmem:[%s2747_s11 + $0x228] sm:$0xff] %v375_v35  ;;  %v379_v37 = vld [vmem:[%s2751_s17 + $0x3f8] sm:$0xff]  ;;  %v381_v38 = vld [vmem:[%s2751_s17 + $0x428] sm:$0xff] }
  0x44   : >> { %378 = vst [vmem:[%s2747_s11 + $0x240] sm:$0xff] %v377_v36  ;;  %380 = vst [vmem:[%s2747_s11 + $0x248] sm:$0xff] %v379_v37  ;;  %v383_v39 = vld [vmem:[%s2751_s17 + $0x430] sm:$0xff]  ;;  %v385_v40 = vld [vmem:[%s2751_s17 + $0x460] sm:$0xff] }
  0x45   : >> { %382 = vst [vmem:[%s2747_s11 + $0x260] sm:$0xff] %v381_v38  ;;  %v387_v41 = vld [vmem:[%s2751_s17 + $0x468] sm:$0xff]  ;;  %384 = vst [vmem:[%s2747_s11 + $0x268] sm:$0xff] %v383_v39  ;;  %v389_v42 = vld [vmem:[%s2751_s17 + $0x498] sm:$0xff] }
  0x46   : >> { %386 = vst [vmem:[%s2747_s11 + $0x280] sm:$0xff] %v385_v40  ;;  %388 = vst [vmem:[%s2747_s11 + $0x288] sm:$0xff] %v387_v41  ;;  %v391_v43 = vld [vmem:[%s2751_s17 + $0x4a0] sm:$0xff]  ;;  %v393_v44 = vld [vmem:[%s2751_s17 + $0x4d0] sm:$0xff] }
  0x47   : >> { %390 = vst [vmem:[%s2747_s11 + $0x2a0] sm:$0xff] %v389_v42  ;;  %392 = vst [vmem:[%s2747_s11 + $0x2a8] sm:$0xff] %v391_v43  ;;  %v395_v45 = vld [vmem:[%s2751_s17 + $0x4d8] sm:$0xff]  ;;  %v397_v46 = vld [vmem:[%s2751_s17 + $0x508] sm:$0xff] }
  0x48   : >> { %394 = vst [vmem:[%s2747_s11 + $0x2c0] sm:$0xff] %v393_v44  ;;  %v399_v47 = vld [vmem:[%s2751_s17 + $0x510] sm:$0xff]  ;;  %396 = vst [vmem:[%s2747_s11 + $0x2c8] sm:$0xff] %v395_v45  ;;  %v401_v48 = vld [vmem:[%s2751_s17 + $0x540] sm:$0xff] }
  0x49   : >> { %398 = vst [vmem:[%s2747_s11 + $0x2e0] sm:$0xff] %v397_v46  ;;  %400 = vst [vmem:[%s2747_s11 + $0x2e8] sm:$0xff] %v399_v47  ;;  %v403_v49 = vld [vmem:[%s2751_s17 + $0x548] sm:$0xff]  ;;  %v405_v50 = vld [vmem:[%s2751_s17 + $0x578] sm:$0xff] }
  0x4a   : >> { %402 = vst [vmem:[%s2747_s11 + $0x300] sm:$0xff] %v401_v48  ;;  %404 = vst [vmem:[%s2747_s11 + $0x308] sm:$0xff] %v403_v49  ;;  %v407_v51 = vld [vmem:[%s2751_s17 + $0x580] sm:$0xff]  ;;  %v409_v52 = vld [vmem:[%s2751_s17 + $0x5b0] sm:$0xff] }
  0x4b   : >> { %406 = vst [vmem:[%s2747_s11 + $0x320] sm:$0xff] %v405_v50  ;;  %v411_v53 = vld [vmem:[%s2751_s17 + $0x5b8] sm:$0xff]  ;;  %408 = vst [vmem:[%s2747_s11 + $0x328] sm:$0xff] %v407_v51  ;;  %v413_v54 = vld [vmem:[%s2751_s17 + $0x5e8] sm:$0xff] }
  0x4c   : >> { %410 = vst [vmem:[%s2747_s11 + $0x340] sm:$0xff] %v409_v52  ;;  %412 = vst [vmem:[%s2747_s11 + $0x348] sm:$0xff] %v411_v53  ;;  %v415_v55 = vld [vmem:[%s2751_s17 + $0x5f0] sm:$0xff]  ;;  %v417_v56 = vld [vmem:[%s2751_s17 + $0x620] sm:$0xff] }
  0x4d   : >> { %414 = vst [vmem:[%s2747_s11 + $0x360] sm:$0xff] %v413_v54  ;;  %416 = vst [vmem:[%s2747_s11 + $0x368] sm:$0xff] %v415_v55  ;;  %v419_v57 = vld [vmem:[%s2751_s17 + $0x628] sm:$0xff]  ;;  %v421_v58 = vld [vmem:[%s2751_s17 + $0x658] sm:$0xff] }
  0x4e   : >> { %418 = vst [vmem:[%s2747_s11 + $0x380] sm:$0xff] %v417_v56  ;;  %v423_v59 = vld [vmem:[%s2751_s17 + $0x660] sm:$0xff]  ;;  %420 = vst [vmem:[%s2747_s11 + $0x388] sm:$0xff] %v419_v57  ;;  %v425_v60 = vld [vmem:[%s2751_s17 + $0x690] sm:$0xff] }
  0x4f   : >> { %422 = vst [vmem:[%s2747_s11 + $0x3a0] sm:$0xff] %v421_v58  ;;  %424 = vst [vmem:[%s2747_s11 + $0x3a8] sm:$0xff] %v423_v59  ;;  %v427_v61 = vld [vmem:[%s2751_s17 + $0x698] sm:$0xff]  ;;  %v429_v62 = vld [vmem:[%s2751_s17 + $0x6c8] sm:$0xff] }
  0x50   : >> { %426 = vst [vmem:[%s2747_s11 + $0x3c0] sm:$0xff] %v425_v60  ;;  %428 = vst [vmem:[%s2747_s11 + $0x3c8] sm:$0xff] %v427_v61  ;;  %v431_v63 = vld [vmem:[%s2751_s17 + $0x6d0] sm:$0xff]  ;;  %v433_v0 = vld [vmem:[%s2751_s17 + $0x700] sm:$0xff] }
  0x51   : >> { %430 = vst [vmem:[%s2747_s11 + $0x3e0] sm:$0xff] %v429_v62  ;;  %v435_v1 = vld [vmem:[%s2751_s17 + $0x708] sm:$0xff]  ;;  %432 = vst [vmem:[%s2747_s11 + $0x3e8] sm:$0xff] %v431_v63  ;;  %v437_v2 = vld [vmem:[%s2751_s17 + $0x738] sm:$0xff] }
  0x52   : >> { %434 = vst [vmem:[%s2747_s11 + $0x400] sm:$0xff] %v433_v0  ;;  %436 = vst [vmem:[%s2747_s11 + $0x408] sm:$0xff] %v435_v1  ;;  %v439_v3 = vld [vmem:[%s2751_s17 + $0x740] sm:$0xff]  ;;  %v441_v4 = vld [vmem:[%s2751_s17 + $0x770] sm:$0xff] }
  0x53   : >> { %438 = vst [vmem:[%s2747_s11 + $0x420] sm:$0xff] %v437_v2  ;;  %440 = vst [vmem:[%s2747_s11 + $0x428] sm:$0xff] %v439_v3  ;;  %v443_v5 = vld [vmem:[%s2751_s17 + $0x778] sm:$0xff]  ;;  %v445_v6 = vld [vmem:[%s2751_s17 + $0x7a8] sm:$0xff] }
  0x54   : >> { %442 = vst [vmem:[%s2747_s11 + $0x440] sm:$0xff] %v441_v4  ;;  %v447_v7 = vld [vmem:[%s2751_s17 + $0x7b0] sm:$0xff]  ;;  %444 = vst [vmem:[%s2747_s11 + $0x448] sm:$0xff] %v443_v5  ;;  %v449_v8 = vld [vmem:[%s2751_s17 + $0x7e0] sm:$0xff] }
  0x55   : >> { %446 = vst [vmem:[%s2747_s11 + $0x460] sm:$0xff] %v445_v6  ;;  %448 = vst [vmem:[%s2747_s11 + $0x468] sm:$0xff] %v447_v7  ;;  %v451_v9 = vld [vmem:[%s2751_s17 + $0x7e8] sm:$0xff]  ;;  %v453_v10 = vld [vmem:[%s2751_s17 + $0x818] sm:$0xff] }
  0x56   : >> { %450 = vst [vmem:[%s2747_s11 + $0x480] sm:$0xff] %v449_v8  ;;  %452 = vst [vmem:[%s2747_s11 + $0x488] sm:$0xff] %v451_v9  ;;  %v455_v11 = vld [vmem:[%s2751_s17 + $0x820] sm:$0xff]  ;;  %v457_v12 = vld [vmem:[%s2751_s17 + $0x850] sm:$0xff] }
  0x57   : >> { %454 = vst [vmem:[%s2747_s11 + $0x4a0] sm:$0xff] %v453_v10  ;;  %v459_v13 = vld [vmem:[%s2751_s17 + $0x858] sm:$0xff]  ;;  %456 = vst [vmem:[%s2747_s11 + $0x4a8] sm:$0xff] %v455_v11  ;;  %v461_v14 = vld [vmem:[%s2751_s17 + $0x888] sm:$0xff] }
  0x58   : >> { %458 = vst [vmem:[%s2747_s11 + $0x4c0] sm:$0xff] %v457_v12  ;;  %460 = vst [vmem:[%s2747_s11 + $0x4c8] sm:$0xff] %v459_v13  ;;  %v463_v15 = vld [vmem:[%s2751_s17 + $0x890] sm:$0xff]  ;;  %v465_v16 = vld [vmem:[%s2751_s17 + $0x8c0] sm:$0xff] }
  0x59   : >> { %462 = vst [vmem:[%s2747_s11 + $0x4e0] sm:$0xff] %v461_v14  ;;  %464 = vst [vmem:[%s2747_s11 + $0x4e8] sm:$0xff] %v463_v15  ;;  %v467_v17 = vld [vmem:[%s2751_s17 + $0x8c8] sm:$0xff]  ;;  %v469_v18 = vld [vmem:[%s2751_s17 + $0x8f8] sm:$0xff] }
  0x5a   : >> { %466 = vst [vmem:[%s2747_s11 + $0x500] sm:$0xff] %v465_v16  ;;  %v471_v19 = vld [vmem:[%s2751_s17 + $0x900] sm:$0xff]  ;;  %468 = vst [vmem:[%s2747_s11 + $0x508] sm:$0xff] %v467_v17  ;;  %v473_v20 = vld [vmem:[%s2751_s17 + $0x930] sm:$0xff] }
  0x5b   : >> { %470 = vst [vmem:[%s2747_s11 + $0x520] sm:$0xff] %v469_v18  ;;  %472 = vst [vmem:[%s2747_s11 + $0x528] sm:$0xff] %v471_v19  ;;  %v475_v21 = vld [vmem:[%s2751_s17 + $0x938] sm:$0xff]  ;;  %v477_v22 = vld [vmem:[%s2751_s17 + $0x968] sm:$0xff] }
  0x5c   : >> { %474 = vst [vmem:[%s2747_s11 + $0x540] sm:$0xff] %v473_v20  ;;  %476 = vst [vmem:[%s2747_s11 + $0x548] sm:$0xff] %v475_v21  ;;  %v479_v23 = vld [vmem:[%s2751_s17 + $0x970] sm:$0xff]  ;;  %v481_v24 = vld [vmem:[%s2751_s17 + $0x9a0] sm:$0xff] }
  0x5d   : >> { %478 = vst [vmem:[%s2747_s11 + $0x560] sm:$0xff] %v477_v22  ;;  %v483_v25 = vld [vmem:[%s2751_s17 + $0x9a8] sm:$0xff]  ;;  %480 = vst [vmem:[%s2747_s11 + $0x568] sm:$0xff] %v479_v23  ;;  %v485_v26 = vld [vmem:[%s2751_s17 + $0x9d8] sm:$0xff] }
  0x5e   : >> { %482 = vst [vmem:[%s2747_s11 + $0x580] sm:$0xff] %v481_v24  ;;  %484 = vst [vmem:[%s2747_s11 + $0x588] sm:$0xff] %v483_v25  ;;  %v487_v27 = vld [vmem:[%s2751_s17 + $0x9e0] sm:$0xff]  ;;  %v489_v28 = vld [vmem:[%s2751_s17 + $0xa10] sm:$0xff] }
  0x5f   : >> { %486 = vst [vmem:[%s2747_s11 + $0x5a0] sm:$0xff] %v485_v26  ;;  %488 = vst [vmem:[%s2747_s11 + $0x5a8] sm:$0xff] %v487_v27  ;;  %v491_v29 = vld [vmem:[%s2751_s17 + $0xa18] sm:$0xff]  ;;  %v493_v30 = vld [vmem:[%s2751_s17 + $0xa48] sm:$0xff] }
  0x60   : >> { %490 = vst [vmem:[%s2747_s11 + $0x5c0] sm:$0xff] %v489_v28  ;;  %v495_v31 = vld [vmem:[%s2751_s17 + $0xa50] sm:$0xff]  ;;  %492 = vst [vmem:[%s2747_s11 + $0x5c8] sm:$0xff] %v491_v29  ;;  %v497_v32 = vld [vmem:[%s2751_s17 + $0xa80] sm:$0xff] }
  0x61   : >> { %494 = vst [vmem:[%s2747_s11 + $0x5e0] sm:$0xff] %v493_v30  ;;  %496 = vst [vmem:[%s2747_s11 + $0x5e8] sm:$0xff] %v495_v31  ;;  %v499_v33 = vld [vmem:[%s2751_s17 + $0xa88] sm:$0xff]  ;;  %v501_v34 = vld [vmem:[%s2751_s17 + $0xab8] sm:$0xff] }
  0x62   : >> { %498 = vst [vmem:[%s2747_s11 + $0x600] sm:$0xff] %v497_v32  ;;  %500 = vst [vmem:[%s2747_s11 + $0x608] sm:$0xff] %v499_v33  ;;  %v503_v35 = vld [vmem:[%s2751_s17 + $0xac0] sm:$0xff]  ;;  %v505_v36 = vld [vmem:[%s2751_s17 + $0xaf0] sm:$0xff] }
  0x63   : >> { %502 = vst [vmem:[%s2747_s11 + $0x620] sm:$0xff] %v501_v34  ;;  %v507_v37 = vld [vmem:[%s2751_s17 + $0xaf8] sm:$0xff]  ;;  %504 = vst [vmem:[%s2747_s11 + $0x628] sm:$0xff] %v503_v35  ;;  %v509_v38 = vld [vmem:[%s2751_s17 + $0xb28] sm:$0xff] }
  0x64   : >> { %506 = vst [vmem:[%s2747_s11 + $0x640] sm:$0xff] %v505_v36  ;;  %508 = vst [vmem:[%s2747_s11 + $0x648] sm:$0xff] %v507_v37  ;;  %v511_v39 = vld [vmem:[%s2751_s17 + $0xb30] sm:$0xff]  ;;  %v513_v40 = vld [vmem:[%s2751_s17 + $0xb60] sm:$0xff] }
  0x65   : >> { %510 = vst [vmem:[%s2747_s11 + $0x660] sm:$0xff] %v509_v38  ;;  %512 = vst [vmem:[%s2747_s11 + $0x668] sm:$0xff] %v511_v39  ;;  %v515_v41 = vld [vmem:[%s2751_s17 + $0xb68] sm:$0xff]  ;;  %v517_v42 = vld [vmem:[%s2751_s17 + $0xb98] sm:$0xff] }
  0x66   : >> { %514 = vst [vmem:[%s2747_s11 + $0x680] sm:$0xff] %v513_v40  ;;  %v519_v43 = vld [vmem:[%s2751_s17 + $0xba0] sm:$0xff]  ;;  %516 = vst [vmem:[%s2747_s11 + $0x688] sm:$0xff] %v515_v41  ;;  %v521_v44 = vld [vmem:[%s2751_s17 + $0xbd0] sm:$0xff] }
  0x67   : >> { %518 = vst [vmem:[%s2747_s11 + $0x6a0] sm:$0xff] %v517_v42  ;;  %520 = vst [vmem:[%s2747_s11 + $0x6a8] sm:$0xff] %v519_v43  ;;  %v523_v45 = vld [vmem:[%s2751_s17 + $0xbd8] sm:$0xff]  ;;  %v525_v46 = vld [vmem:[%s2751_s17 + $0xc08] sm:$0xff] }
  0x68   : >> { %522 = vst [vmem:[%s2747_s11 + $0x6c0] sm:$0xff] %v521_v44  ;;  %524 = vst [vmem:[%s2747_s11 + $0x6c8] sm:$0xff] %v523_v45  ;;  %v527_v47 = vld [vmem:[%s2751_s17 + $0xc10] sm:$0xff]  ;;  %v529_v48 = vld [vmem:[%s2751_s17 + $0xc40] sm:$0xff] }
  0x69   : >> { %526 = vst [vmem:[%s2747_s11 + $0x6e0] sm:$0xff] %v525_v46  ;;  %v531_v49 = vld [vmem:[%s2751_s17 + $0xc48] sm:$0xff]  ;;  %528 = vst [vmem:[%s2747_s11 + $0x6e8] sm:$0xff] %v527_v47  ;;  %v533_v50 = vld [vmem:[%s2751_s17 + $0xc78] sm:$0xff]  ;;  %301 = sbr.rel (!%p298_p3) target bundleno = 49 (0x31), region = 156 }
  0x6a   : >> { %530 = vst [vmem:[%s2747_s11 + $0x700] sm:$0xff] %v529_v48  ;;  %532 = vst [vmem:[%s2747_s11 + $0x708] sm:$0xff] %v531_v49  ;;  %v535_v51 = vld [vmem:[%s2751_s17 + $0xc80] sm:$0xff]  ;;  %v537_v52 = vld [vmem:[%s2751_s17 + $0xcb0] sm:$0xff] }
  0x6b   : >> { %534 = vst [vmem:[%s2747_s11 + $0x720] sm:$0xff] %v533_v50  ;;  %536 = vst [vmem:[%s2747_s11 + $0x728] sm:$0xff] %v535_v51  ;;  %v539_v53 = vld [vmem:[%s2751_s17 + $0xcb8] sm:$0xff]  ;;  %v541_v54 = vld [vmem:[%s2751_s17 + $0xce8] sm:$0xff] }
  0x6c   : >> { %538 = vst [vmem:[%s2747_s11 + $0x740] sm:$0xff] %v537_v52  ;;  %v543_v55 = vld [vmem:[%s2751_s17 + $0xcf0] sm:$0xff]  ;;  %540 = vst [vmem:[%s2747_s11 + $0x748] sm:$0xff] %v539_v53  ;;  %s5060_s17 = smov %s2972_s26 }
  0x6d   : >> { %542 = vst [vmem:[%s2747_s11 + $0x760] sm:$0xff] %v541_v54  ;;  %544 = vst [vmem:[%s2747_s11 + $0x768] sm:$0xff] %v543_v55  ;;  %s5059_s11 = smov %s2975_s27 }
  0x6e PF: > { %s3193_s28 = sand.u32 1, %s292_s9   ;;  %s2437_s29 = sshll.u32 %s2905_s10, 8 }
  0x6f   : > { %s556_s30 = sshra.s32 %s2437_s29, 4  ;;  %p2391_p4 = scmp.le.s32.totalorder %s3193_s28, 0 }
  0x70   : > { %s3197_s5 = scalar_lea.vmem %s2890_s4, %s556_s30   ;;  %s3200_s25 = scalar_lea.vmem %s2894_s7, %s556_s30 [#allocation2]  }
  0x71   : > { %2318 = sbr.rel (%p2391_p4) target bundleno = 149 (0x95), region = 161  ;;  %s5062_s11 = smov (!%p2391_p4), %s3200_s25 }
  0x72   : > { %s5063_s17 = smov (!%p2391_p4), %s3197_s5  ;;  %s3209_s19 = smov (!%p2391_p4), 0  }
  0x73   : > { %s3211_s20 = smov (!%p2391_p4), 0  }
  0x76 LB: >> { %v572_v56 = vld [vmem:[%s2767_s17] sm:$0xff]  ;;  %v574_v57 = vld [vmem:[%s2767_s17 + $0x38] sm:$0xff]  ;;  %v576_v58 = vld [vmem:[%s2767_s17 + $0x70] sm:$0xff]  ;;  %s692_s9 = sadd.s32 1, %s2771_s19  ;;  %s566_s20 = sadd.s32 1, %s2775_s20   ;;  %s2775_s20 = sphi %s3211_s20, %s566_s20   ;;  %s2771_s19 = sphi %s3209_s19, %s5066_s19   ;;  %s2767_s17 = sphi %s5063_s17, %s5065_s17   ;;  %s2763_s11 = sphi %s5062_s11, %s5064_s11  }
  0x77   : >> { %573 = vst [vmem:[%s2763_s11] sm:$0xff] %v572_v56  ;;  %575 = vst [vmem:[%s2763_s11 + $0x20] sm:$0xff] %v574_v57  ;;  %v578_v59 = vld [vmem:[%s2767_s17 + $0xa8] sm:$0xff]  ;;  %v580_v60 = vld [vmem:[%s2767_s17 + $0xe0] sm:$0xff]  ;;  %p693_p5 = scmp.ge.s32.totalorder %s692_s9, %s3193_s28  ;;  %p565_p7 = scmp.ge.s32.totalorder %s566_s20, %s3193_s28 }
  0x78   : >> { %577 = vst [vmem:[%s2763_s11 + $0x40] sm:$0xff] %v576_v58  ;;  %v582_v61 = vld [vmem:[%s2767_s17 + $0x118] sm:$0xff]  ;;  %579 = vst [vmem:[%s2763_s11 + $0x60] sm:$0xff] %v578_v59  ;;  %v584_v62 = vld [vmem:[%s2767_s17 + $0x150] sm:$0xff] }
  0x79   : >> { %581 = vst [vmem:[%s2763_s11 + $0x80] sm:$0xff] %v580_v60  ;;  %583 = vst [vmem:[%s2763_s11 + $0xa0] sm:$0xff] %v582_v61  ;;  %v586_v63 = vld [vmem:[%s2767_s17 + $0x188] sm:$0xff]  ;;  %v588_v0 = vld [vmem:[%s2767_s17 + $0x1c0] sm:$0xff]  ;;  %s5086_s9 = smov (%p693_p5, %s692_s9), 0 }
  0x7a   : >> { %585 = vst [vmem:[%s2763_s11 + $0xc0] sm:$0xff] %v584_v62  ;;  %587 = vst [vmem:[%s2763_s11 + $0xe0] sm:$0xff] %v586_v63  ;;  %v590_v1 = vld [vmem:[%s2767_s17 + $0x1f8] sm:$0xff]  ;;  %v592_v2 = vld [vmem:[%s2767_s17 + $0x230] sm:$0xff]  ;;  %s2392_s10 = sshll.u32 %s5086_s9, 3  ;;  %s5066_s19 = smov %s5086_s9 }
  0x7b   : >> { %589 = vst [vmem:[%s2763_s11 + $0x100] sm:$0xff] %v588_v0  ;;  %v594_v3 = vld [vmem:[%s2767_s17 + $0x268] sm:$0xff]  ;;  %591 = vst [vmem:[%s2763_s11 + $0x120] sm:$0xff] %v590_v1  ;;  %v596_v4 = vld [vmem:[%s2767_s17 + $0x2a0] sm:$0xff]  ;;  %s3267_s24 = scalar_lea.vmem %s3197_s5, %s2392_s10   ;;  %s3270_s26 = scalar_lea.vmem %s3200_s25, %s2392_s10 [#allocation2]  }
  0x7c   : >> { %593 = vst [vmem:[%s2763_s11 + $0x140] sm:$0xff] %v592_v2  ;;  %595 = vst [vmem:[%s2763_s11 + $0x160] sm:$0xff] %v594_v3  ;;  %v598_v5 = vld [vmem:[%s2767_s17 + $0x2d8] sm:$0xff]  ;;  %v600_v6 = vld [vmem:[%s2767_s17 + $0x310] sm:$0xff] }
  0x7d   : >> { %597 = vst [vmem:[%s2763_s11 + $0x180] sm:$0xff] %v596_v4  ;;  %599 = vst [vmem:[%s2763_s11 + $0x1a0] sm:$0xff] %v598_v5  ;;  %v602_v7 = vld [vmem:[%s2767_s17 + $0x348] sm:$0xff]  ;;  %v604_v8 = vld [vmem:[%s2767_s17 + $0x380] sm:$0xff] }
  0x7e   : >> { %601 = vst [vmem:[%s2763_s11 + $0x1c0] sm:$0xff] %v600_v6  ;;  %v606_v9 = vld [vmem:[%s2767_s17 + $0x3b8] sm:$0xff]  ;;  %603 = vst [vmem:[%s2763_s11 + $0x1e0] sm:$0xff] %v602_v7  ;;  %v608_v10 = vld [vmem:[%s2767_s17 + $0x3f0] sm:$0xff] }
  0x7f   : >> { %605 = vst [vmem:[%s2763_s11 + $0x200] sm:$0xff] %v604_v8  ;;  %607 = vst [vmem:[%s2763_s11 + $0x220] sm:$0xff] %v606_v9  ;;  %v610_v11 = vld [vmem:[%s2767_s17 + $0x428] sm:$0xff]  ;;  %v612_v12 = vld [vmem:[%s2767_s17 + $0x460] sm:$0xff] }
  0x80   : >> { %609 = vst [vmem:[%s2763_s11 + $0x240] sm:$0xff] %v608_v10  ;;  %611 = vst [vmem:[%s2763_s11 + $0x260] sm:$0xff] %v610_v11  ;;  %v614_v13 = vld [vmem:[%s2767_s17 + $0x498] sm:$0xff]  ;;  %v616_v14 = vld [vmem:[%s2767_s17 + $0x4d0] sm:$0xff] }
  0x81   : >> { %613 = vst [vmem:[%s2763_s11 + $0x280] sm:$0xff] %v612_v12  ;;  %v618_v15 = vld [vmem:[%s2767_s17 + $0x508] sm:$0xff]  ;;  %615 = vst [vmem:[%s2763_s11 + $0x2a0] sm:$0xff] %v614_v13  ;;  %v620_v16 = vld [vmem:[%s2767_s17 + $0x540] sm:$0xff] }
  0x82   : >> { %617 = vst [vmem:[%s2763_s11 + $0x2c0] sm:$0xff] %v616_v14  ;;  %619 = vst [vmem:[%s2763_s11 + $0x2e0] sm:$0xff] %v618_v15  ;;  %v622_v17 = vld [vmem:[%s2767_s17 + $0x578] sm:$0xff]  ;;  %v624_v18 = vld [vmem:[%s2767_s17 + $0x5b0] sm:$0xff] }
  0x83   : >> { %621 = vst [vmem:[%s2763_s11 + $0x300] sm:$0xff] %v620_v16  ;;  %623 = vst [vmem:[%s2763_s11 + $0x320] sm:$0xff] %v622_v17  ;;  %v626_v19 = vld [vmem:[%s2767_s17 + $0x5e8] sm:$0xff]  ;;  %v628_v20 = vld [vmem:[%s2767_s17 + $0x620] sm:$0xff] }
  0x84   : >> { %625 = vst [vmem:[%s2763_s11 + $0x340] sm:$0xff] %v624_v18  ;;  %v630_v21 = vld [vmem:[%s2767_s17 + $0x658] sm:$0xff]  ;;  %627 = vst [vmem:[%s2763_s11 + $0x360] sm:$0xff] %v626_v19  ;;  %v632_v22 = vld [vmem:[%s2767_s17 + $0x690] sm:$0xff] }
  0x85   : >> { %629 = vst [vmem:[%s2763_s11 + $0x380] sm:$0xff] %v628_v20  ;;  %631 = vst [vmem:[%s2763_s11 + $0x3a0] sm:$0xff] %v630_v21  ;;  %v634_v23 = vld [vmem:[%s2767_s17 + $0x6c8] sm:$0xff]  ;;  %v636_v24 = vld [vmem:[%s2767_s17 + $0x700] sm:$0xff] }
  0x86   : >> { %633 = vst [vmem:[%s2763_s11 + $0x3c0] sm:$0xff] %v632_v22  ;;  %635 = vst [vmem:[%s2763_s11 + $0x3e0] sm:$0xff] %v634_v23  ;;  %v638_v25 = vld [vmem:[%s2767_s17 + $0x738] sm:$0xff]  ;;  %v640_v26 = vld [vmem:[%s2767_s17 + $0x770] sm:$0xff] }
  0x87   : >> { %637 = vst [vmem:[%s2763_s11 + $0x400] sm:$0xff] %v636_v24  ;;  %v642_v27 = vld [vmem:[%s2767_s17 + $0x7a8] sm:$0xff]  ;;  %639 = vst [vmem:[%s2763_s11 + $0x420] sm:$0xff] %v638_v25  ;;  %v644_v28 = vld [vmem:[%s2767_s17 + $0x7e0] sm:$0xff] }
  0x88   : >> { %641 = vst [vmem:[%s2763_s11 + $0x440] sm:$0xff] %v640_v26  ;;  %643 = vst [vmem:[%s2763_s11 + $0x460] sm:$0xff] %v642_v27  ;;  %v646_v29 = vld [vmem:[%s2767_s17 + $0x818] sm:$0xff]  ;;  %v648_v30 = vld [vmem:[%s2767_s17 + $0x850] sm:$0xff] }
  0x89   : >> { %645 = vst [vmem:[%s2763_s11 + $0x480] sm:$0xff] %v644_v28  ;;  %647 = vst [vmem:[%s2763_s11 + $0x4a0] sm:$0xff] %v646_v29  ;;  %v650_v31 = vld [vmem:[%s2767_s17 + $0x888] sm:$0xff]  ;;  %v652_v32 = vld [vmem:[%s2767_s17 + $0x8c0] sm:$0xff] }
  0x8a   : >> { %649 = vst [vmem:[%s2763_s11 + $0x4c0] sm:$0xff] %v648_v30  ;;  %v654_v33 = vld [vmem:[%s2767_s17 + $0x8f8] sm:$0xff]  ;;  %651 = vst [vmem:[%s2763_s11 + $0x4e0] sm:$0xff] %v650_v31  ;;  %v656_v34 = vld [vmem:[%s2767_s17 + $0x930] sm:$0xff] }
  0x8b   : >> { %653 = vst [vmem:[%s2763_s11 + $0x500] sm:$0xff] %v652_v32  ;;  %655 = vst [vmem:[%s2763_s11 + $0x520] sm:$0xff] %v654_v33  ;;  %v658_v35 = vld [vmem:[%s2767_s17 + $0x968] sm:$0xff]  ;;  %v660_v36 = vld [vmem:[%s2767_s17 + $0x9a0] sm:$0xff] }
  0x8c   : >> { %657 = vst [vmem:[%s2763_s11 + $0x540] sm:$0xff] %v656_v34  ;;  %659 = vst [vmem:[%s2763_s11 + $0x560] sm:$0xff] %v658_v35  ;;  %v662_v37 = vld [vmem:[%s2767_s17 + $0x9d8] sm:$0xff]  ;;  %v664_v38 = vld [vmem:[%s2767_s17 + $0xa10] sm:$0xff] }
  0x8d   : >> { %661 = vst [vmem:[%s2763_s11 + $0x580] sm:$0xff] %v660_v36  ;;  %v666_v39 = vld [vmem:[%s2767_s17 + $0xa48] sm:$0xff]  ;;  %663 = vst [vmem:[%s2763_s11 + $0x5a0] sm:$0xff] %v662_v37  ;;  %v668_v40 = vld [vmem:[%s2767_s17 + $0xa80] sm:$0xff] }
  0x8e   : >> { %665 = vst [vmem:[%s2763_s11 + $0x5c0] sm:$0xff] %v664_v38  ;;  %667 = vst [vmem:[%s2763_s11 + $0x5e0] sm:$0xff] %v666_v39  ;;  %v670_v41 = vld [vmem:[%s2767_s17 + $0xab8] sm:$0xff]  ;;  %v672_v42 = vld [vmem:[%s2767_s17 + $0xaf0] sm:$0xff] }
  0x8f   : >> { %669 = vst [vmem:[%s2763_s11 + $0x600] sm:$0xff] %v668_v40  ;;  %671 = vst [vmem:[%s2763_s11 + $0x620] sm:$0xff] %v670_v41  ;;  %v674_v43 = vld [vmem:[%s2767_s17 + $0xb28] sm:$0xff]  ;;  %v676_v44 = vld [vmem:[%s2767_s17 + $0xb60] sm:$0xff] }
  0x90   : >> { %673 = vst [vmem:[%s2763_s11 + $0x640] sm:$0xff] %v672_v42  ;;  %v678_v45 = vld [vmem:[%s2767_s17 + $0xb98] sm:$0xff]  ;;  %675 = vst [vmem:[%s2763_s11 + $0x660] sm:$0xff] %v674_v43  ;;  %v680_v46 = vld [vmem:[%s2767_s17 + $0xbd0] sm:$0xff]  ;;  %568 = sbr.rel (!%p565_p7) target bundleno = 118 (0x76), region = 167 }
  0x91   : >> { %677 = vst [vmem:[%s2763_s11 + $0x680] sm:$0xff] %v676_v44  ;;  %679 = vst [vmem:[%s2763_s11 + $0x6a0] sm:$0xff] %v678_v45  ;;  %v682_v47 = vld [vmem:[%s2767_s17 + $0xc08] sm:$0xff]  ;;  %v684_v48 = vld [vmem:[%s2767_s17 + $0xc40] sm:$0xff] }
  0x92   : >> { %681 = vst [vmem:[%s2763_s11 + $0x6c0] sm:$0xff] %v680_v46  ;;  %683 = vst [vmem:[%s2763_s11 + $0x6e0] sm:$0xff] %v682_v47  ;;  %v686_v49 = vld [vmem:[%s2767_s17 + $0xc78] sm:$0xff]  ;;  %v688_v50 = vld [vmem:[%s2767_s17 + $0xcb0] sm:$0xff] }
  0x93   : >> { %685 = vst [vmem:[%s2763_s11 + $0x700] sm:$0xff] %v684_v48  ;;  %v690_v51 = vld [vmem:[%s2767_s17 + $0xce8] sm:$0xff]  ;;  %687 = vst [vmem:[%s2763_s11 + $0x720] sm:$0xff] %v686_v49  ;;  %s5065_s17 = smov %s3267_s24 }
  0x94   : >> { %689 = vst [vmem:[%s2763_s11 + $0x740] sm:$0xff] %v688_v50  ;;  %691 = vst [vmem:[%s2763_s11 + $0x760] sm:$0xff] %v690_v51  ;;  %s5064_s11 = smov %s3270_s26 }
  0x95 PF: > { %701 = sbr.rel (%p288_p13) target bundleno = 322 (0x142), region = 69  ;;  %s703_s27 = ssub.s32 (!%p288_p13), %s2892_s6, %s2898_s8 }
  0x96   : > { %s707_s29 = sshrl.u32 (!%p288_p13), %s2892_s6, 3  ;;  %s3372_s30 = scalar_lea.vmem (!%p288_p13), %s2890_s4, %s703_s27 }
  0x97   : > { %s3375_s10 = scalar_lea.vmem (!%p288_p13), %s2894_s7, %s703_s27 [#allocation2]  ;;  %s3379_s20 = sshrl.u32 (!%p288_p13), %s707_s29, 1 }
  0x98   : > { %p2394_p10 = scmp.le.s32.totalorder (!%p288_p13), %s3379_s20, 0 }
  0x9a   : > { %2332 = sbr.rel (%p2394_p10) target bundleno = 220 (0xdc), region = 172  ;;  %s5067_s28 = smov (!%p2394_p10), %s2894_s7 }
  0x9b   : > { %s5068_s5 = smov (!%p2394_p10), %s2890_s4  ;;  %s3388_s25 = smov (!%p2394_p10), 0  }
  0x9c   : > { %s3390_s11 = smov (!%p2394_p10), 0  }
  0x9f LB: >> { %v720_v52 = vld [vmem:[%s2783_s5] sm:$0xff]  ;;  %v722_v53 = vld [vmem:[%s2783_s5 + $0x8] sm:$0xff]  ;;  %v724_v54 = vld [vmem:[%s2783_s5 + $0x38] sm:$0xff]  ;;  %s960_s17 = sadd.s32 1, %s2787_s25  ;;  %s714_s11 = sadd.s32 1, %s2791_s11   ;;  %s2791_s11 = sphi %s3390_s11, %s714_s11   ;;  %s2787_s25 = sphi %s3388_s25, %s5071_s25   ;;  %s2783_s5 = sphi %s5068_s5, %s5070_s5   ;;  %s2779_s28 = sphi %s5067_s28, %s5069_s28  }
  0xa0   : >> { %721 = vst [vmem:[%s2779_s28] sm:$0xff] %v720_v52  ;;  %723 = vst [vmem:[%s2779_s28 + $0x8] sm:$0xff] %v722_v53  ;;  %v726_v55 = vld [vmem:[%s2783_s5 + $0x40] sm:$0xff]  ;;  %v728_v56 = vld [vmem:[%s2783_s5 + $0x70] sm:$0xff]  ;;  %p961_p11 = scmp.ge.s32.totalorder %s960_s17, %s3379_s20  ;;  %p713_p12 = scmp.ge.s32.totalorder %s714_s11, %s3379_s20 }
  0xa1   : >> { %725 = vst [vmem:[%s2779_s28 + $0x20] sm:$0xff] %v724_v54  ;;  %v730_v57 = vld [vmem:[%s2783_s5 + $0x78] sm:$0xff]  ;;  %727 = vst [vmem:[%s2779_s28 + $0x28] sm:$0xff] %v726_v55  ;;  %v732_v58 = vld [vmem:[%s2783_s5 + $0xa8] sm:$0xff] }
  0xa2   : >> { %729 = vst [vmem:[%s2779_s28 + $0x40] sm:$0xff] %v728_v56  ;;  %731 = vst [vmem:[%s2779_s28 + $0x48] sm:$0xff] %v730_v57  ;;  %v734_v59 = vld [vmem:[%s2783_s5 + $0xb0] sm:$0xff]  ;;  %v736_v60 = vld [vmem:[%s2783_s5 + $0xe0] sm:$0xff]  ;;  %s5088_s17 = smov (%p961_p11, %s960_s17), 0 }
  0xa3   : >> { %733 = vst [vmem:[%s2779_s28 + $0x60] sm:$0xff] %v732_v58  ;;  %735 = vst [vmem:[%s2779_s28 + $0x68] sm:$0xff] %v734_v59  ;;  %v738_v61 = vld [vmem:[%s2783_s5 + $0xe8] sm:$0xff]  ;;  %v740_v62 = vld [vmem:[%s2783_s5 + $0x118] sm:$0xff]  ;;  %s2395_s19 = sshll.u32 %s5088_s17, 4  ;;  %s5071_s25 = smov %s5088_s17 }
  0xa4   : >> { %737 = vst [vmem:[%s2779_s28 + $0x80] sm:$0xff] %v736_v60  ;;  %v742_v63 = vld [vmem:[%s2783_s5 + $0x120] sm:$0xff]  ;;  %739 = vst [vmem:[%s2779_s28 + $0x88] sm:$0xff] %v738_v61  ;;  %v744_v0 = vld [vmem:[%s2783_s5 + $0x150] sm:$0xff]  ;;  %s3446_s9 = scalar_lea.vmem %s2890_s4, %s2395_s19   ;;  %s3449_s24 = scalar_lea.vmem %s2894_s7, %s2395_s19 [#allocation2]  }
  0xa5   : >> { %741 = vst [vmem:[%s2779_s28 + $0xa0] sm:$0xff] %v740_v62  ;;  %743 = vst [vmem:[%s2779_s28 + $0xa8] sm:$0xff] %v742_v63  ;;  %v746_v1 = vld [vmem:[%s2783_s5 + $0x158] sm:$0xff]  ;;  %v748_v2 = vld [vmem:[%s2783_s5 + $0x188] sm:$0xff] }
  0xa6   : >> { %745 = vst [vmem:[%s2779_s28 + $0xc0] sm:$0xff] %v744_v0  ;;  %747 = vst [vmem:[%s2779_s28 + $0xc8] sm:$0xff] %v746_v1  ;;  %v750_v3 = vld [vmem:[%s2783_s5 + $0x190] sm:$0xff]  ;;  %v752_v4 = vld [vmem:[%s2783_s5 + $0x1c0] sm:$0xff] }
  0xa7   : >> { %749 = vst [vmem:[%s2779_s28 + $0xe0] sm:$0xff] %v748_v2  ;;  %v754_v5 = vld [vmem:[%s2783_s5 + $0x1c8] sm:$0xff]  ;;  %751 = vst [vmem:[%s2779_s28 + $0xe8] sm:$0xff] %v750_v3  ;;  %v756_v6 = vld [vmem:[%s2783_s5 + $0x1f8] sm:$0xff] }
  0xa8   : >> { %753 = vst [vmem:[%s2779_s28 + $0x100] sm:$0xff] %v752_v4  ;;  %755 = vst [vmem:[%s2779_s28 + $0x108] sm:$0xff] %v754_v5  ;;  %v758_v7 = vld [vmem:[%s2783_s5 + $0x200] sm:$0xff]  ;;  %v760_v8 = vld [vmem:[%s2783_s5 + $0x230] sm:$0xff] }
  0xa9   : >> { %757 = vst [vmem:[%s2779_s28 + $0x120] sm:$0xff] %v756_v6  ;;  %759 = vst [vmem:[%s2779_s28 + $0x128] sm:$0xff] %v758_v7  ;;  %v762_v9 = vld [vmem:[%s2783_s5 + $0x238] sm:$0xff]  ;;  %v764_v10 = vld [vmem:[%s2783_s5 + $0x268] sm:$0xff] }
  0xaa   : >> { %761 = vst [vmem:[%s2779_s28 + $0x140] sm:$0xff] %v760_v8  ;;  %v766_v11 = vld [vmem:[%s2783_s5 + $0x270] sm:$0xff]  ;;  %763 = vst [vmem:[%s2779_s28 + $0x148] sm:$0xff] %v762_v9  ;;  %v768_v12 = vld [vmem:[%s2783_s5 + $0x2a0] sm:$0xff] }
  0xab   : >> { %765 = vst [vmem:[%s2779_s28 + $0x160] sm:$0xff] %v764_v10  ;;  %767 = vst [vmem:[%s2779_s28 + $0x168] sm:$0xff] %v766_v11  ;;  %v770_v13 = vld [vmem:[%s2783_s5 + $0x2a8] sm:$0xff]  ;;  %v772_v14 = vld [vmem:[%s2783_s5 + $0x2d8] sm:$0xff] }
  0xac   : >> { %769 = vst [vmem:[%s2779_s28 + $0x180] sm:$0xff] %v768_v12  ;;  %771 = vst [vmem:[%s2779_s28 + $0x188] sm:$0xff] %v770_v13  ;;  %v774_v15 = vld [vmem:[%s2783_s5 + $0x2e0] sm:$0xff]  ;;  %v776_v16 = vld [vmem:[%s2783_s5 + $0x310] sm:$0xff] }
  0xad   : >> { %773 = vst [vmem:[%s2779_s28 + $0x1a0] sm:$0xff] %v772_v14  ;;  %v778_v17 = vld [vmem:[%s2783_s5 + $0x318] sm:$0xff]  ;;  %775 = vst [vmem:[%s2779_s28 + $0x1a8] sm:$0xff] %v774_v15  ;;  %v780_v18 = vld [vmem:[%s2783_s5 + $0x348] sm:$0xff] }
  0xae   : >> { %777 = vst [vmem:[%s2779_s28 + $0x1c0] sm:$0xff] %v776_v16  ;;  %779 = vst [vmem:[%s2779_s28 + $0x1c8] sm:$0xff] %v778_v17  ;;  %v782_v19 = vld [vmem:[%s2783_s5 + $0x350] sm:$0xff]  ;;  %v784_v20 = vld [vmem:[%s2783_s5 + $0x380] sm:$0xff] }
  0xaf   : >> { %781 = vst [vmem:[%s2779_s28 + $0x1e0] sm:$0xff] %v780_v18  ;;  %783 = vst [vmem:[%s2779_s28 + $0x1e8] sm:$0xff] %v782_v19  ;;  %v786_v21 = vld [vmem:[%s2783_s5 + $0x388] sm:$0xff]  ;;  %v788_v22 = vld [vmem:[%s2783_s5 + $0x3b8] sm:$0xff] }
  0xb0   : >> { %785 = vst [vmem:[%s2779_s28 + $0x200] sm:$0xff] %v784_v20  ;;  %v790_v23 = vld [vmem:[%s2783_s5 + $0x3c0] sm:$0xff]  ;;  %787 = vst [vmem:[%s2779_s28 + $0x208] sm:$0xff] %v786_v21  ;;  %v792_v24 = vld [vmem:[%s2783_s5 + $0x3f0] sm:$0xff] }
  0xb1   : >> { %789 = vst [vmem:[%s2779_s28 + $0x220] sm:$0xff] %v788_v22  ;;  %791 = vst [vmem:[%s2779_s28 + $0x228] sm:$0xff] %v790_v23  ;;  %v794_v25 = vld [vmem:[%s2783_s5 + $0x3f8] sm:$0xff]  ;;  %v796_v26 = vld [vmem:[%s2783_s5 + $0x428] sm:$0xff] }
  0xb2   : >> { %793 = vst [vmem:[%s2779_s28 + $0x240] sm:$0xff] %v792_v24  ;;  %795 = vst [vmem:[%s2779_s28 + $0x248] sm:$0xff] %v794_v25  ;;  %v798_v27 = vld [vmem:[%s2783_s5 + $0x430] sm:$0xff]  ;;  %v800_v28 = vld [vmem:[%s2783_s5 + $0x460] sm:$0xff] }
  0xb3   : >> { %797 = vst [vmem:[%s2779_s28 + $0x260] sm:$0xff] %v796_v26  ;;  %v802_v29 = vld [vmem:[%s2783_s5 + $0x468] sm:$0xff]  ;;  %799 = vst [vmem:[%s2779_s28 + $0x268] sm:$0xff] %v798_v27  ;;  %v804_v30 = vld [vmem:[%s2783_s5 + $0x498] sm:$0xff] }
  0xb4   : >> { %801 = vst [vmem:[%s2779_s28 + $0x280] sm:$0xff] %v800_v28  ;;  %803 = vst [vmem:[%s2779_s28 + $0x288] sm:$0xff] %v802_v29  ;;  %v806_v31 = vld [vmem:[%s2783_s5 + $0x4a0] sm:$0xff]  ;;  %v808_v32 = vld [vmem:[%s2783_s5 + $0x4d0] sm:$0xff] }
  0xb5   : >> { %805 = vst [vmem:[%s2779_s28 + $0x2a0] sm:$0xff] %v804_v30  ;;  %807 = vst [vmem:[%s2779_s28 + $0x2a8] sm:$0xff] %v806_v31  ;;  %v810_v33 = vld [vmem:[%s2783_s5 + $0x4d8] sm:$0xff]  ;;  %v812_v34 = vld [vmem:[%s2783_s5 + $0x508] sm:$0xff] }
  0xb6   : >> { %809 = vst [vmem:[%s2779_s28 + $0x2c0] sm:$0xff] %v808_v32  ;;  %v814_v35 = vld [vmem:[%s2783_s5 + $0x510] sm:$0xff]  ;;  %811 = vst [vmem:[%s2779_s28 + $0x2c8] sm:$0xff] %v810_v33  ;;  %v816_v36 = vld [vmem:[%s2783_s5 + $0x540] sm:$0xff] }
  0xb7   : >> { %813 = vst [vmem:[%s2779_s28 + $0x2e0] sm:$0xff] %v812_v34  ;;  %815 = vst [vmem:[%s2779_s28 + $0x2e8] sm:$0xff] %v814_v35  ;;  %v818_v37 = vld [vmem:[%s2783_s5 + $0x548] sm:$0xff]  ;;  %v820_v38 = vld [vmem:[%s2783_s5 + $0x578] sm:$0xff] }
  0xb8   : >> { %817 = vst [vmem:[%s2779_s28 + $0x300] sm:$0xff] %v816_v36  ;;  %819 = vst [vmem:[%s2779_s28 + $0x308] sm:$0xff] %v818_v37  ;;  %v822_v39 = vld [vmem:[%s2783_s5 + $0x580] sm:$0xff]  ;;  %v824_v40 = vld [vmem:[%s2783_s5 + $0x5b0] sm:$0xff] }
  0xb9   : >> { %821 = vst [vmem:[%s2779_s28 + $0x320] sm:$0xff] %v820_v38  ;;  %v826_v41 = vld [vmem:[%s2783_s5 + $0x5b8] sm:$0xff]  ;;  %823 = vst [vmem:[%s2779_s28 + $0x328] sm:$0xff] %v822_v39  ;;  %v828_v42 = vld [vmem:[%s2783_s5 + $0x5e8] sm:$0xff] }
  0xba   : >> { %825 = vst [vmem:[%s2779_s28 + $0x340] sm:$0xff] %v824_v40  ;;  %827 = vst [vmem:[%s2779_s28 + $0x348] sm:$0xff] %v826_v41  ;;  %v830_v43 = vld [vmem:[%s2783_s5 + $0x5f0] sm:$0xff]  ;;  %v832_v44 = vld [vmem:[%s2783_s5 + $0x620] sm:$0xff] }
  0xbb   : >> { %829 = vst [vmem:[%s2779_s28 + $0x360] sm:$0xff] %v828_v42  ;;  %831 = vst [vmem:[%s2779_s28 + $0x368] sm:$0xff] %v830_v43  ;;  %v834_v45 = vld [vmem:[%s2783_s5 + $0x628] sm:$0xff]  ;;  %v836_v46 = vld [vmem:[%s2783_s5 + $0x658] sm:$0xff] }
  0xbc   : >> { %833 = vst [vmem:[%s2779_s28 + $0x380] sm:$0xff] %v832_v44  ;;  %v838_v47 = vld [vmem:[%s2783_s5 + $0x660] sm:$0xff]  ;;  %835 = vst [vmem:[%s2779_s28 + $0x388] sm:$0xff] %v834_v45  ;;  %v840_v48 = vld [vmem:[%s2783_s5 + $0x690] sm:$0xff] }
  0xbd   : >> { %837 = vst [vmem:[%s2779_s28 + $0x3a0] sm:$0xff] %v836_v46  ;;  %839 = vst [vmem:[%s2779_s28 + $0x3a8] sm:$0xff] %v838_v47  ;;  %v842_v49 = vld [vmem:[%s2783_s5 + $0x698] sm:$0xff]  ;;  %v844_v50 = vld [vmem:[%s2783_s5 + $0x6c8] sm:$0xff] }
  0xbe   : >> { %841 = vst [vmem:[%s2779_s28 + $0x3c0] sm:$0xff] %v840_v48  ;;  %843 = vst [vmem:[%s2779_s28 + $0x3c8] sm:$0xff] %v842_v49  ;;  %v846_v51 = vld [vmem:[%s2783_s5 + $0x6d0] sm:$0xff]  ;;  %v848_v52 = vld [vmem:[%s2783_s5 + $0x700] sm:$0xff] }
  0xbf   : >> { %845 = vst [vmem:[%s2779_s28 + $0x3e0] sm:$0xff] %v844_v50  ;;  %v850_v53 = vld [vmem:[%s2783_s5 + $0x708] sm:$0xff]  ;;  %847 = vst [vmem:[%s2779_s28 + $0x3e8] sm:$0xff] %v846_v51  ;;  %v852_v54 = vld [vmem:[%s2783_s5 + $0x738] sm:$0xff] }
  0xc0   : >> { %849 = vst [vmem:[%s2779_s28 + $0x400] sm:$0xff] %v848_v52  ;;  %851 = vst [vmem:[%s2779_s28 + $0x408] sm:$0xff] %v850_v53  ;;  %v854_v55 = vld [vmem:[%s2783_s5 + $0x740] sm:$0xff]  ;;  %v856_v56 = vld [vmem:[%s2783_s5 + $0x770] sm:$0xff] }
  0xc1   : >> { %853 = vst [vmem:[%s2779_s28 + $0x420] sm:$0xff] %v852_v54  ;;  %855 = vst [vmem:[%s2779_s28 + $0x428] sm:$0xff] %v854_v55  ;;  %v858_v57 = vld [vmem:[%s2783_s5 + $0x778] sm:$0xff]  ;;  %v860_v58 = vld [vmem:[%s2783_s5 + $0x7a8] sm:$0xff] }
  0xc2   : >> { %857 = vst [vmem:[%s2779_s28 + $0x440] sm:$0xff] %v856_v56  ;;  %v862_v59 = vld [vmem:[%s2783_s5 + $0x7b0] sm:$0xff]  ;;  %859 = vst [vmem:[%s2779_s28 + $0x448] sm:$0xff] %v858_v57  ;;  %v864_v60 = vld [vmem:[%s2783_s5 + $0x7e0] sm:$0xff] }
  0xc3   : >> { %861 = vst [vmem:[%s2779_s28 + $0x460] sm:$0xff] %v860_v58  ;;  %863 = vst [vmem:[%s2779_s28 + $0x468] sm:$0xff] %v862_v59  ;;  %v866_v61 = vld [vmem:[%s2783_s5 + $0x7e8] sm:$0xff]  ;;  %v868_v62 = vld [vmem:[%s2783_s5 + $0x818] sm:$0xff] }
  0xc4   : >> { %865 = vst [vmem:[%s2779_s28 + $0x480] sm:$0xff] %v864_v60  ;;  %867 = vst [vmem:[%s2779_s28 + $0x488] sm:$0xff] %v866_v61  ;;  %v870_v63 = vld [vmem:[%s2783_s5 + $0x820] sm:$0xff]  ;;  %v872_v0 = vld [vmem:[%s2783_s5 + $0x850] sm:$0xff] }
  0xc5   : >> { %869 = vst [vmem:[%s2779_s28 + $0x4a0] sm:$0xff] %v868_v62  ;;  %v874_v1 = vld [vmem:[%s2783_s5 + $0x858] sm:$0xff]  ;;  %871 = vst [vmem:[%s2779_s28 + $0x4a8] sm:$0xff] %v870_v63  ;;  %v876_v2 = vld [vmem:[%s2783_s5 + $0x888] sm:$0xff] }
  0xc6   : >> { %873 = vst [vmem:[%s2779_s28 + $0x4c0] sm:$0xff] %v872_v0  ;;  %875 = vst [vmem:[%s2779_s28 + $0x4c8] sm:$0xff] %v874_v1  ;;  %v878_v3 = vld [vmem:[%s2783_s5 + $0x890] sm:$0xff]  ;;  %v880_v4 = vld [vmem:[%s2783_s5 + $0x8c0] sm:$0xff] }
  0xc7   : >> { %877 = vst [vmem:[%s2779_s28 + $0x4e0] sm:$0xff] %v876_v2  ;;  %879 = vst [vmem:[%s2779_s28 + $0x4e8] sm:$0xff] %v878_v3  ;;  %v882_v5 = vld [vmem:[%s2783_s5 + $0x8c8] sm:$0xff]  ;;  %v884_v6 = vld [vmem:[%s2783_s5 + $0x8f8] sm:$0xff] }
  0xc8   : >> { %881 = vst [vmem:[%s2779_s28 + $0x500] sm:$0xff] %v880_v4  ;;  %v886_v7 = vld [vmem:[%s2783_s5 + $0x900] sm:$0xff]  ;;  %883 = vst [vmem:[%s2779_s28 + $0x508] sm:$0xff] %v882_v5  ;;  %v888_v8 = vld [vmem:[%s2783_s5 + $0x930] sm:$0xff] }
  0xc9   : >> { %885 = vst [vmem:[%s2779_s28 + $0x520] sm:$0xff] %v884_v6  ;;  %887 = vst [vmem:[%s2779_s28 + $0x528] sm:$0xff] %v886_v7  ;;  %v890_v9 = vld [vmem:[%s2783_s5 + $0x938] sm:$0xff]  ;;  %v892_v10 = vld [vmem:[%s2783_s5 + $0x968] sm:$0xff] }
  0xca   : >> { %889 = vst [vmem:[%s2779_s28 + $0x540] sm:$0xff] %v888_v8  ;;  %891 = vst [vmem:[%s2779_s28 + $0x548] sm:$0xff] %v890_v9  ;;  %v894_v11 = vld [vmem:[%s2783_s5 + $0x970] sm:$0xff]  ;;  %v896_v12 = vld [vmem:[%s2783_s5 + $0x9a0] sm:$0xff] }
  0xcb   : >> { %893 = vst [vmem:[%s2779_s28 + $0x560] sm:$0xff] %v892_v10  ;;  %v898_v13 = vld [vmem:[%s2783_s5 + $0x9a8] sm:$0xff]  ;;  %895 = vst [vmem:[%s2779_s28 + $0x568] sm:$0xff] %v894_v11  ;;  %v900_v14 = vld [vmem:[%s2783_s5 + $0x9d8] sm:$0xff] }
  0xcc   : >> { %897 = vst [vmem:[%s2779_s28 + $0x580] sm:$0xff] %v896_v12  ;;  %899 = vst [vmem:[%s2779_s28 + $0x588] sm:$0xff] %v898_v13  ;;  %v902_v15 = vld [vmem:[%s2783_s5 + $0x9e0] sm:$0xff]  ;;  %v904_v16 = vld [vmem:[%s2783_s5 + $0xa10] sm:$0xff] }
  0xcd   : >> { %901 = vst [vmem:[%s2779_s28 + $0x5a0] sm:$0xff] %v900_v14  ;;  %903 = vst [vmem:[%s2779_s28 + $0x5a8] sm:$0xff] %v902_v15  ;;  %v906_v17 = vld [vmem:[%s2783_s5 + $0xa18] sm:$0xff]  ;;  %v908_v18 = vld [vmem:[%s2783_s5 + $0xa48] sm:$0xff] }
  0xce   : >> { %905 = vst [vmem:[%s2779_s28 + $0x5c0] sm:$0xff] %v904_v16  ;;  %v910_v19 = vld [vmem:[%s2783_s5 + $0xa50] sm:$0xff]  ;;  %907 = vst [vmem:[%s2779_s28 + $0x5c8] sm:$0xff] %v906_v17  ;;  %v912_v20 = vld [vmem:[%s2783_s5 + $0xa80] sm:$0xff] }
  0xcf   : >> { %909 = vst [vmem:[%s2779_s28 + $0x5e0] sm:$0xff] %v908_v18  ;;  %911 = vst [vmem:[%s2779_s28 + $0x5e8] sm:$0xff] %v910_v19  ;;  %v914_v21 = vld [vmem:[%s2783_s5 + $0xa88] sm:$0xff]  ;;  %v916_v22 = vld [vmem:[%s2783_s5 + $0xab8] sm:$0xff] }
  0xd0   : >> { %913 = vst [vmem:[%s2779_s28 + $0x600] sm:$0xff] %v912_v20  ;;  %915 = vst [vmem:[%s2779_s28 + $0x608] sm:$0xff] %v914_v21  ;;  %v918_v23 = vld [vmem:[%s2783_s5 + $0xac0] sm:$0xff]  ;;  %v920_v24 = vld [vmem:[%s2783_s5 + $0xaf0] sm:$0xff] }
  0xd1   : >> { %917 = vst [vmem:[%s2779_s28 + $0x620] sm:$0xff] %v916_v22  ;;  %v922_v25 = vld [vmem:[%s2783_s5 + $0xaf8] sm:$0xff]  ;;  %919 = vst [vmem:[%s2779_s28 + $0x628] sm:$0xff] %v918_v23  ;;  %v924_v26 = vld [vmem:[%s2783_s5 + $0xb28] sm:$0xff] }
  0xd2   : >> { %921 = vst [vmem:[%s2779_s28 + $0x640] sm:$0xff] %v920_v24  ;;  %923 = vst [vmem:[%s2779_s28 + $0x648] sm:$0xff] %v922_v25  ;;  %v926_v27 = vld [vmem:[%s2783_s5 + $0xb30] sm:$0xff]  ;;  %v928_v28 = vld [vmem:[%s2783_s5 + $0xb60] sm:$0xff] }
  0xd3   : >> { %925 = vst [vmem:[%s2779_s28 + $0x660] sm:$0xff] %v924_v26  ;;  %927 = vst [vmem:[%s2779_s28 + $0x668] sm:$0xff] %v926_v27  ;;  %v930_v29 = vld [vmem:[%s2783_s5 + $0xb68] sm:$0xff]  ;;  %v932_v30 = vld [vmem:[%s2783_s5 + $0xb98] sm:$0xff] }
  0xd4   : >> { %929 = vst [vmem:[%s2779_s28 + $0x680] sm:$0xff] %v928_v28  ;;  %v934_v31 = vld [vmem:[%s2783_s5 + $0xba0] sm:$0xff]  ;;  %931 = vst [vmem:[%s2779_s28 + $0x688] sm:$0xff] %v930_v29  ;;  %v936_v32 = vld [vmem:[%s2783_s5 + $0xbd0] sm:$0xff] }
  0xd5   : >> { %933 = vst [vmem:[%s2779_s28 + $0x6a0] sm:$0xff] %v932_v30  ;;  %935 = vst [vmem:[%s2779_s28 + $0x6a8] sm:$0xff] %v934_v31  ;;  %v938_v33 = vld [vmem:[%s2783_s5 + $0xbd8] sm:$0xff]  ;;  %v940_v34 = vld [vmem:[%s2783_s5 + $0xc08] sm:$0xff] }
  0xd6   : >> { %937 = vst [vmem:[%s2779_s28 + $0x6c0] sm:$0xff] %v936_v32  ;;  %939 = vst [vmem:[%s2779_s28 + $0x6c8] sm:$0xff] %v938_v33  ;;  %v942_v35 = vld [vmem:[%s2783_s5 + $0xc10] sm:$0xff]  ;;  %v944_v36 = vld [vmem:[%s2783_s5 + $0xc40] sm:$0xff] }
  0xd7   : >> { %941 = vst [vmem:[%s2779_s28 + $0x6e0] sm:$0xff] %v940_v34  ;;  %v946_v37 = vld [vmem:[%s2783_s5 + $0xc48] sm:$0xff]  ;;  %943 = vst [vmem:[%s2779_s28 + $0x6e8] sm:$0xff] %v942_v35  ;;  %v948_v38 = vld [vmem:[%s2783_s5 + $0xc78] sm:$0xff]  ;;  %716 = sbr.rel (!%p713_p12) target bundleno = 159 (0x9f), region = 178 }
  0xd8   : >> { %945 = vst [vmem:[%s2779_s28 + $0x700] sm:$0xff] %v944_v36  ;;  %947 = vst [vmem:[%s2779_s28 + $0x708] sm:$0xff] %v946_v37  ;;  %v950_v39 = vld [vmem:[%s2783_s5 + $0xc80] sm:$0xff]  ;;  %v952_v40 = vld [vmem:[%s2783_s5 + $0xcb0] sm:$0xff] }
  0xd9   : >> { %949 = vst [vmem:[%s2779_s28 + $0x720] sm:$0xff] %v948_v38  ;;  %951 = vst [vmem:[%s2779_s28 + $0x728] sm:$0xff] %v950_v39  ;;  %v954_v41 = vld [vmem:[%s2783_s5 + $0xcb8] sm:$0xff]  ;;  %v956_v42 = vld [vmem:[%s2783_s5 + $0xce8] sm:$0xff] }
  0xda   : >> { %953 = vst [vmem:[%s2779_s28 + $0x740] sm:$0xff] %v952_v40  ;;  %v958_v43 = vld [vmem:[%s2783_s5 + $0xcf0] sm:$0xff]  ;;  %955 = vst [vmem:[%s2779_s28 + $0x748] sm:$0xff] %v954_v41  ;;  %s5070_s5 = smov %s3446_s9 }
  0xdb   : >> { %957 = vst [vmem:[%s2779_s28 + $0x760] sm:$0xff] %v956_v42  ;;  %959 = vst [vmem:[%s2779_s28 + $0x768] sm:$0xff] %v958_v43  ;;  %s5069_s28 = smov %s3449_s24 }
  0xdc PF: > { %s3667_s26 = sand.u32 1, %s707_s29   ;;  %s2439_s27 = sshll.u32 %s3379_s20, 8 }
  0xdd   : > { %s971_s19 = sshra.s32 %s2439_s27, 4  ;;  %p2400_p13 = scmp.le.s32.totalorder %s3667_s26, 0 }
  0xde   : > { %s3671_s1 = scalar_lea.vmem %s2890_s4, %s971_s19   ;;  %s3674_s24 = scalar_lea.vmem %s2894_s7, %s971_s19 [#allocation2]  }
  0xdf   : > { %2346 = sbr.rel (%p2400_p13) target bundleno = 259 (0x103), region = 183  ;;  %s5072_s28 = smov (!%p2400_p13), %s3674_s24 }
  0xe0   : > { %s5073_s5 = smov (!%p2400_p13), %s3671_s1  ;;  %s3683_s25 = smov (!%p2400_p13), 0  }
  0xe1   : > { %s3685_s11 = smov (!%p2400_p13), 0  }
  0xe4 LB: >> { %v987_v44 = vld [vmem:[%s2799_s5] sm:$0xff]  ;;  %v989_v45 = vld [vmem:[%s2799_s5 + $0x38] sm:$0xff]  ;;  %v991_v46 = vld [vmem:[%s2799_s5 + $0x70] sm:$0xff]  ;;  %s1107_s29 = sadd.s32 1, %s2803_s25  ;;  %s981_s11 = sadd.s32 1, %s2807_s11   ;;  %s2807_s11 = sphi %s3685_s11, %s981_s11   ;;  %s2803_s25 = sphi %s3683_s25, %s5076_s25   ;;  %s2799_s5 = sphi %s5073_s5, %s5075_s5   ;;  %s2795_s28 = sphi %s5072_s28, %s5074_s28  }
  0xe5   : >> { %988 = vst [vmem:[%s2795_s28] sm:$0xff] %v987_v44  ;;  %990 = vst [vmem:[%s2795_s28 + $0x20] sm:$0xff] %v989_v45  ;;  %v993_v47 = vld [vmem:[%s2799_s5 + $0xa8] sm:$0xff]  ;;  %v995_v48 = vld [vmem:[%s2799_s5 + $0xe0] sm:$0xff]  ;;  %p1108_p0 = scmp.ge.s32.totalorder %s1107_s29, %s3667_s26  ;;  %p980_p1 = scmp.ge.s32.totalorder %s981_s11, %s3667_s26 }
  0xe6   : >> { %992 = vst [vmem:[%s2795_s28 + $0x40] sm:$0xff] %v991_v46  ;;  %v997_v49 = vld [vmem:[%s2799_s5 + $0x118] sm:$0xff]  ;;  %994 = vst [vmem:[%s2795_s28 + $0x60] sm:$0xff] %v993_v47  ;;  %v999_v50 = vld [vmem:[%s2799_s5 + $0x150] sm:$0xff] }
  0xe7   : >> { %996 = vst [vmem:[%s2795_s28 + $0x80] sm:$0xff] %v995_v48  ;;  %998 = vst [vmem:[%s2795_s28 + $0xa0] sm:$0xff] %v997_v49  ;;  %v1001_v51 = vld [vmem:[%s2799_s5 + $0x188] sm:$0xff]  ;;  %v1003_v52 = vld [vmem:[%s2799_s5 + $0x1c0] sm:$0xff]  ;;  %s5090_s29 = smov (%p1108_p0, %s1107_s29), 0 }
  0xe8   : >> { %1000 = vst [vmem:[%s2795_s28 + $0xc0] sm:$0xff] %v999_v50  ;;  %1002 = vst [vmem:[%s2795_s28 + $0xe0] sm:$0xff] %v1001_v51  ;;  %v1005_v53 = vld [vmem:[%s2799_s5 + $0x1f8] sm:$0xff]  ;;  %v1007_v54 = vld [vmem:[%s2799_s5 + $0x230] sm:$0xff]  ;;  %s2401_s20 = sshll.u32 %s5090_s29, 3  ;;  %s5076_s25 = smov %s5090_s29 }
  0xe9   : >> { %1004 = vst [vmem:[%s2795_s28 + $0x100] sm:$0xff] %v1003_v52  ;;  %v1009_v55 = vld [vmem:[%s2799_s5 + $0x268] sm:$0xff]  ;;  %1006 = vst [vmem:[%s2795_s28 + $0x120] sm:$0xff] %v1005_v53  ;;  %v1011_v56 = vld [vmem:[%s2799_s5 + $0x2a0] sm:$0xff]  ;;  %s3741_s17 = scalar_lea.vmem %s3671_s1, %s2401_s20   ;;  %s3744_s9 = scalar_lea.vmem %s3674_s24, %s2401_s20 [#allocation2]  }
  0xea   : >> { %1008 = vst [vmem:[%s2795_s28 + $0x140] sm:$0xff] %v1007_v54  ;;  %1010 = vst [vmem:[%s2795_s28 + $0x160] sm:$0xff] %v1009_v55  ;;  %v1013_v57 = vld [vmem:[%s2799_s5 + $0x2d8] sm:$0xff]  ;;  %v1015_v58 = vld [vmem:[%s2799_s5 + $0x310] sm:$0xff] }
  0xeb   : >> { %1012 = vst [vmem:[%s2795_s28 + $0x180] sm:$0xff] %v1011_v56  ;;  %1014 = vst [vmem:[%s2795_s28 + $0x1a0] sm:$0xff] %v1013_v57  ;;  %v1017_v59 = vld [vmem:[%s2799_s5 + $0x348] sm:$0xff]  ;;  %v1019_v60 = vld [vmem:[%s2799_s5 + $0x380] sm:$0xff] }
  0xec   : >> { %1016 = vst [vmem:[%s2795_s28 + $0x1c0] sm:$0xff] %v1015_v58  ;;  %v1021_v61 = vld [vmem:[%s2799_s5 + $0x3b8] sm:$0xff]  ;;  %1018 = vst [vmem:[%s2795_s28 + $0x1e0] sm:$0xff] %v1017_v59  ;;  %v1023_v62 = vld [vmem:[%s2799_s5 + $0x3f0] sm:$0xff] }
  0xed   : >> { %1020 = vst [vmem:[%s2795_s28 + $0x200] sm:$0xff] %v1019_v60  ;;  %1022 = vst [vmem:[%s2795_s28 + $0x220] sm:$0xff] %v1021_v61  ;;  %v1025_v63 = vld [vmem:[%s2799_s5 + $0x428] sm:$0xff]  ;;  %v1027_v0 = vld [vmem:[%s2799_s5 + $0x460] sm:$0xff] }
  0xee   : >> { %1024 = vst [vmem:[%s2795_s28 + $0x240] sm:$0xff] %v1023_v62  ;;  %1026 = vst [vmem:[%s2795_s28 + $0x260] sm:$0xff] %v1025_v63  ;;  %v1029_v1 = vld [vmem:[%s2799_s5 + $0x498] sm:$0xff]  ;;  %v1031_v2 = vld [vmem:[%s2799_s5 + $0x4d0] sm:$0xff] }
  0xef   : >> { %1028 = vst [vmem:[%s2795_s28 + $0x280] sm:$0xff] %v1027_v0  ;;  %v1033_v3 = vld [vmem:[%s2799_s5 + $0x508] sm:$0xff]  ;;  %1030 = vst [vmem:[%s2795_s28 + $0x2a0] sm:$0xff] %v1029_v1  ;;  %v1035_v4 = vld [vmem:[%s2799_s5 + $0x540] sm:$0xff] }
  0xf0   : >> { %1032 = vst [vmem:[%s2795_s28 + $0x2c0] sm:$0xff] %v1031_v2  ;;  %1034 = vst [vmem:[%s2795_s28 + $0x2e0] sm:$0xff] %v1033_v3  ;;  %v1037_v5 = vld [vmem:[%s2799_s5 + $0x578] sm:$0xff]  ;;  %v1039_v6 = vld [vmem:[%s2799_s5 + $0x5b0] sm:$0xff] }
  0xf1   : >> { %1036 = vst [vmem:[%s2795_s28 + $0x300] sm:$0xff] %v1035_v4  ;;  %1038 = vst [vmem:[%s2795_s28 + $0x320] sm:$0xff] %v1037_v5  ;;  %v1041_v7 = vld [vmem:[%s2799_s5 + $0x5e8] sm:$0xff]  ;;  %v1043_v8 = vld [vmem:[%s2799_s5 + $0x620] sm:$0xff] }
  0xf2   : >> { %1040 = vst [vmem:[%s2795_s28 + $0x340] sm:$0xff] %v1039_v6  ;;  %v1045_v9 = vld [vmem:[%s2799_s5 + $0x658] sm:$0xff]  ;;  %1042 = vst [vmem:[%s2795_s28 + $0x360] sm:$0xff] %v1041_v7  ;;  %v1047_v10 = vld [vmem:[%s2799_s5 + $0x690] sm:$0xff] }
  0xf3   : >> { %1044 = vst [vmem:[%s2795_s28 + $0x380] sm:$0xff] %v1043_v8  ;;  %1046 = vst [vmem:[%s2795_s28 + $0x3a0] sm:$0xff] %v1045_v9  ;;  %v1049_v11 = vld [vmem:[%s2799_s5 + $0x6c8] sm:$0xff]  ;;  %v1051_v12 = vld [vmem:[%s2799_s5 + $0x700] sm:$0xff] }
  0xf4   : >> { %1048 = vst [vmem:[%s2795_s28 + $0x3c0] sm:$0xff] %v1047_v10  ;;  %1050 = vst [vmem:[%s2795_s28 + $0x3e0] sm:$0xff] %v1049_v11  ;;  %v1053_v13 = vld [vmem:[%s2799_s5 + $0x738] sm:$0xff]  ;;  %v1055_v14 = vld [vmem:[%s2799_s5 + $0x770] sm:$0xff] }
  0xf5   : >> { %1052 = vst [vmem:[%s2795_s28 + $0x400] sm:$0xff] %v1051_v12  ;;  %v1057_v15 = vld [vmem:[%s2799_s5 + $0x7a8] sm:$0xff]  ;;  %1054 = vst [vmem:[%s2795_s28 + $0x420] sm:$0xff] %v1053_v13  ;;  %v1059_v16 = vld [vmem:[%s2799_s5 + $0x7e0] sm:$0xff] }
  0xf6   : >> { %1056 = vst [vmem:[%s2795_s28 + $0x440] sm:$0xff] %v1055_v14  ;;  %1058 = vst [vmem:[%s2795_s28 + $0x460] sm:$0xff] %v1057_v15  ;;  %v1061_v17 = vld [vmem:[%s2799_s5 + $0x818] sm:$0xff]  ;;  %v1063_v18 = vld [vmem:[%s2799_s5 + $0x850] sm:$0xff] }
  0xf7   : >> { %1060 = vst [vmem:[%s2795_s28 + $0x480] sm:$0xff] %v1059_v16  ;;  %1062 = vst [vmem:[%s2795_s28 + $0x4a0] sm:$0xff] %v1061_v17  ;;  %v1065_v19 = vld [vmem:[%s2799_s5 + $0x888] sm:$0xff]  ;;  %v1067_v20 = vld [vmem:[%s2799_s5 + $0x8c0] sm:$0xff] }
  0xf8   : >> { %1064 = vst [vmem:[%s2795_s28 + $0x4c0] sm:$0xff] %v1063_v18  ;;  %v1069_v21 = vld [vmem:[%s2799_s5 + $0x8f8] sm:$0xff]  ;;  %1066 = vst [vmem:[%s2795_s28 + $0x4e0] sm:$0xff] %v1065_v19  ;;  %v1071_v22 = vld [vmem:[%s2799_s5 + $0x930] sm:$0xff] }
  0xf9   : >> { %1068 = vst [vmem:[%s2795_s28 + $0x500] sm:$0xff] %v1067_v20  ;;  %1070 = vst [vmem:[%s2795_s28 + $0x520] sm:$0xff] %v1069_v21  ;;  %v1073_v23 = vld [vmem:[%s2799_s5 + $0x968] sm:$0xff]  ;;  %v1075_v24 = vld [vmem:[%s2799_s5 + $0x9a0] sm:$0xff] }
  0xfa   : >> { %1072 = vst [vmem:[%s2795_s28 + $0x540] sm:$0xff] %v1071_v22  ;;  %1074 = vst [vmem:[%s2795_s28 + $0x560] sm:$0xff] %v1073_v23  ;;  %v1077_v25 = vld [vmem:[%s2799_s5 + $0x9d8] sm:$0xff]  ;;  %v1079_v26 = vld [vmem:[%s2799_s5 + $0xa10] sm:$0xff] }
  0xfb   : >> { %1076 = vst [vmem:[%s2795_s28 + $0x580] sm:$0xff] %v1075_v24  ;;  %v1081_v27 = vld [vmem:[%s2799_s5 + $0xa48] sm:$0xff]  ;;  %1078 = vst [vmem:[%s2795_s28 + $0x5a0] sm:$0xff] %v1077_v25  ;;  %v1083_v28 = vld [vmem:[%s2799_s5 + $0xa80] sm:$0xff] }
  0xfc   : >> { %1080 = vst [vmem:[%s2795_s28 + $0x5c0] sm:$0xff] %v1079_v26  ;;  %1082 = vst [vmem:[%s2795_s28 + $0x5e0] sm:$0xff] %v1081_v27  ;;  %v1085_v29 = vld [vmem:[%s2799_s5 + $0xab8] sm:$0xff]  ;;  %v1087_v30 = vld [vmem:[%s2799_s5 + $0xaf0] sm:$0xff] }
  0xfd   : >> { %1084 = vst [vmem:[%s2795_s28 + $0x600] sm:$0xff] %v1083_v28  ;;  %1086 = vst [vmem:[%s2795_s28 + $0x620] sm:$0xff] %v1085_v29  ;;  %v1089_v31 = vld [vmem:[%s2799_s5 + $0xb28] sm:$0xff]  ;;  %v1091_v32 = vld [vmem:[%s2799_s5 + $0xb60] sm:$0xff] }
  0xfe   : >> { %1088 = vst [vmem:[%s2795_s28 + $0x640] sm:$0xff] %v1087_v30  ;;  %v1093_v33 = vld [vmem:[%s2799_s5 + $0xb98] sm:$0xff]  ;;  %1090 = vst [vmem:[%s2795_s28 + $0x660] sm:$0xff] %v1089_v31  ;;  %v1095_v34 = vld [vmem:[%s2799_s5 + $0xbd0] sm:$0xff]  ;;  %983 = sbr.rel (!%p980_p1) target bundleno = 228 (0xe4), region = 189 }
  0xff   : >> { %1092 = vst [vmem:[%s2795_s28 + $0x680] sm:$0xff] %v1091_v32  ;;  %1094 = vst [vmem:[%s2795_s28 + $0x6a0] sm:$0xff] %v1093_v33  ;;  %v1097_v35 = vld [vmem:[%s2799_s5 + $0xc08] sm:$0xff]  ;;  %v1099_v36 = vld [vmem:[%s2799_s5 + $0xc40] sm:$0xff] }
 0x100   : >> { %1096 = vst [vmem:[%s2795_s28 + $0x6c0] sm:$0xff] %v1095_v34  ;;  %1098 = vst [vmem:[%s2795_s28 + $0x6e0] sm:$0xff] %v1097_v35  ;;  %v1101_v37 = vld [vmem:[%s2799_s5 + $0xc78] sm:$0xff]  ;;  %v1103_v38 = vld [vmem:[%s2799_s5 + $0xcb0] sm:$0xff] }
 0x101   : >> { %1100 = vst [vmem:[%s2795_s28 + $0x700] sm:$0xff] %v1099_v36  ;;  %v1105_v39 = vld [vmem:[%s2799_s5 + $0xce8] sm:$0xff]  ;;  %1102 = vst [vmem:[%s2795_s28 + $0x720] sm:$0xff] %v1101_v37  ;;  %s5075_s5 = smov %s3741_s17 }
 0x102   : >> { %1104 = vst [vmem:[%s2795_s28 + $0x740] sm:$0xff] %v1103_v38  ;;  %1106 = vst [vmem:[%s2795_s28 + $0x760] sm:$0xff] %v1105_v39  ;;  %s5074_s28 = smov %s3744_s9 }
 0x103 PF: > { %s2809_s27 = smov 1  }
 0x104   : > { %s1114_s19 = sshll.u32 %s2809_s27, %s2898_s8 }
 0x105   : > { %s3841_s11 = sadd.s32 4294967295, %s1114_s19 }
 0x106   : > { %v1124_v40 = vld [vmem:[%s3372_s30] sm:%s3841_s11]  ;;  %v1126_v41 = vld [vmem:[%s3372_s30 + $0x38] sm:%s3841_s11] }
 0x107   : > { %1125 = vst [vmem:[%s3375_s10] sm:%s3841_s11] %v1124_v40  ;;  %1127 = vst [vmem:[%s3375_s10 + $0x20] sm:%s3841_s11] %v1126_v41 }
 0x108   : > { %v1128_v42 = vld [vmem:[%s3372_s30 + $0x70] sm:%s3841_s11]  ;;  %v1130_v43 = vld [vmem:[%s3372_s30 + $0xa8] sm:%s3841_s11] }
 0x109   : > { %1129 = vst [vmem:[%s3375_s10 + $0x40] sm:%s3841_s11] %v1128_v42  ;;  %1131 = vst [vmem:[%s3375_s10 + $0x60] sm:%s3841_s11] %v1130_v43 }
 0x10a   : > { %v1132_v44 = vld [vmem:[%s3372_s30 + $0xe0] sm:%s3841_s11]  ;;  %v1134_v45 = vld [vmem:[%s3372_s30 + $0x118] sm:%s3841_s11] }
 0x10b   : > { %1133 = vst [vmem:[%s3375_s10 + $0x80] sm:%s3841_s11] %v1132_v44  ;;  %1135 = vst [vmem:[%s3375_s10 + $0xa0] sm:%s3841_s11] %v1134_v45 }
 0x10c   : > { %v1136_v46 = vld [vmem:[%s3372_s30 + $0x150] sm:%s3841_s11]  ;;  %v1138_v47 = vld [vmem:[%s3372_s30 + $0x188] sm:%s3841_s11] }
 0x10d   : > { %1137 = vst [vmem:[%s3375_s10 + $0xc0] sm:%s3841_s11] %v1136_v46  ;;  %1139 = vst [vmem:[%s3375_s10 + $0xe0] sm:%s3841_s11] %v1138_v47 }
 0x10e   : > { %v1140_v48 = vld [vmem:[%s3372_s30 + $0x1c0] sm:%s3841_s11]  ;;  %v1142_v49 = vld [vmem:[%s3372_s30 + $0x1f8] sm:%s3841_s11] }
 0x10f   : > { %1141 = vst [vmem:[%s3375_s10 + $0x100] sm:%s3841_s11] %v1140_v48  ;;  %1143 = vst [vmem:[%s3375_s10 + $0x120] sm:%s3841_s11] %v1142_v49 }
 0x110   : > { %v1144_v50 = vld [vmem:[%s3372_s30 + $0x230] sm:%s3841_s11]  ;;  %v1146_v51 = vld [vmem:[%s3372_s30 + $0x268] sm:%s3841_s11] }
 0x111   : > { %1145 = vst [vmem:[%s3375_s10 + $0x140] sm:%s3841_s11] %v1144_v50  ;;  %1147 = vst [vmem:[%s3375_s10 + $0x160] sm:%s3841_s11] %v1146_v51 }
 0x112   : > { %v1148_v52 = vld [vmem:[%s3372_s30 + $0x2a0] sm:%s3841_s11]  ;;  %v1150_v53 = vld [vmem:[%s3372_s30 + $0x2d8] sm:%s3841_s11] }
 0x113   : > { %1149 = vst [vmem:[%s3375_s10 + $0x180] sm:%s3841_s11] %v1148_v52  ;;  %1151 = vst [vmem:[%s3375_s10 + $0x1a0] sm:%s3841_s11] %v1150_v53 }
 0x114   : > { %v1152_v54 = vld [vmem:[%s3372_s30 + $0x310] sm:%s3841_s11]  ;;  %v1154_v55 = vld [vmem:[%s3372_s30 + $0x348] sm:%s3841_s11] }
 0x115   : > { %1153 = vst [vmem:[%s3375_s10 + $0x1c0] sm:%s3841_s11] %v1152_v54  ;;  %1155 = vst [vmem:[%s3375_s10 + $0x1e0] sm:%s3841_s11] %v1154_v55 }
 0x116   : > { %v1156_v56 = vld [vmem:[%s3372_s30 + $0x380] sm:%s3841_s11]  ;;  %v1158_v57 = vld [vmem:[%s3372_s30 + $0x3b8] sm:%s3841_s11] }
 0x117   : > { %1157 = vst [vmem:[%s3375_s10 + $0x200] sm:%s3841_s11] %v1156_v56  ;;  %1159 = vst [vmem:[%s3375_s10 + $0x220] sm:%s3841_s11] %v1158_v57 }
 0x118   : > { %v1160_v58 = vld [vmem:[%s3372_s30 + $0x3f0] sm:%s3841_s11]  ;;  %v1162_v59 = vld [vmem:[%s3372_s30 + $0x428] sm:%s3841_s11] }
 0x119   : > { %1161 = vst [vmem:[%s3375_s10 + $0x240] sm:%s3841_s11] %v1160_v58  ;;  %1163 = vst [vmem:[%s3375_s10 + $0x260] sm:%s3841_s11] %v1162_v59 }
 0x11a   : > { %v1164_v60 = vld [vmem:[%s3372_s30 + $0x460] sm:%s3841_s11]  ;;  %v1166_v61 = vld [vmem:[%s3372_s30 + $0x498] sm:%s3841_s11] }
 0x11b   : > { %1165 = vst [vmem:[%s3375_s10 + $0x280] sm:%s3841_s11] %v1164_v60  ;;  %1167 = vst [vmem:[%s3375_s10 + $0x2a0] sm:%s3841_s11] %v1166_v61 }
 0x11c   : > { %v1168_v62 = vld [vmem:[%s3372_s30 + $0x4d0] sm:%s3841_s11]  ;;  %v1170_v63 = vld [vmem:[%s3372_s30 + $0x508] sm:%s3841_s11] }
 0x11d   : > { %1169 = vst [vmem:[%s3375_s10 + $0x2c0] sm:%s3841_s11] %v1168_v62  ;;  %1171 = vst [vmem:[%s3375_s10 + $0x2e0] sm:%s3841_s11] %v1170_v63 }
 0x11e   : > { %v1172_v0 = vld [vmem:[%s3372_s30 + $0x540] sm:%s3841_s11]  ;;  %v1174_v1 = vld [vmem:[%s3372_s30 + $0x578] sm:%s3841_s11] }
 0x11f   : > { %1173 = vst [vmem:[%s3375_s10 + $0x300] sm:%s3841_s11] %v1172_v0  ;;  %1175 = vst [vmem:[%s3375_s10 + $0x320] sm:%s3841_s11] %v1174_v1 }
 0x120   : > { %v1176_v2 = vld [vmem:[%s3372_s30 + $0x5b0] sm:%s3841_s11]  ;;  %v1178_v3 = vld [vmem:[%s3372_s30 + $0x5e8] sm:%s3841_s11] }
 0x121   : > { %1177 = vst [vmem:[%s3375_s10 + $0x340] sm:%s3841_s11] %v1176_v2  ;;  %1179 = vst [vmem:[%s3375_s10 + $0x360] sm:%s3841_s11] %v1178_v3 }
 0x122   : > { %v1180_v4 = vld [vmem:[%s3372_s30 + $0x620] sm:%s3841_s11]  ;;  %v1182_v5 = vld [vmem:[%s3372_s30 + $0x658] sm:%s3841_s11] }
 0x123   : > { %1181 = vst [vmem:[%s3375_s10 + $0x380] sm:%s3841_s11] %v1180_v4  ;;  %1183 = vst [vmem:[%s3375_s10 + $0x3a0] sm:%s3841_s11] %v1182_v5 }
 0x124   : > { %v1184_v6 = vld [vmem:[%s3372_s30 + $0x690] sm:%s3841_s11]  ;;  %v1186_v7 = vld [vmem:[%s3372_s30 + $0x6c8] sm:%s3841_s11] }
 0x125   : > { %1185 = vst [vmem:[%s3375_s10 + $0x3c0] sm:%s3841_s11] %v1184_v6  ;;  %1187 = vst [vmem:[%s3375_s10 + $0x3e0] sm:%s3841_s11] %v1186_v7 }
 0x126   : > { %v1188_v8 = vld [vmem:[%s3372_s30 + $0x700] sm:%s3841_s11]  ;;  %v1190_v9 = vld [vmem:[%s3372_s30 + $0x738] sm:%s3841_s11] }
 0x127   : > { %1189 = vst [vmem:[%s3375_s10 + $0x400] sm:%s3841_s11] %v1188_v8  ;;  %1191 = vst [vmem:[%s3375_s10 + $0x420] sm:%s3841_s11] %v1190_v9 }
 0x128   : > { %v1192_v10 = vld [vmem:[%s3372_s30 + $0x770] sm:%s3841_s11]  ;;  %v1194_v11 = vld [vmem:[%s3372_s30 + $0x7a8] sm:%s3841_s11] }
 0x129   : > { %1193 = vst [vmem:[%s3375_s10 + $0x440] sm:%s3841_s11] %v1192_v10  ;;  %1195 = vst [vmem:[%s3375_s10 + $0x460] sm:%s3841_s11] %v1194_v11 }
 0x12a   : > { %v1196_v12 = vld [vmem:[%s3372_s30 + $0x7e0] sm:%s3841_s11]  ;;  %v1198_v13 = vld [vmem:[%s3372_s30 + $0x818] sm:%s3841_s11] }
 0x12b   : > { %1197 = vst [vmem:[%s3375_s10 + $0x480] sm:%s3841_s11] %v1196_v12  ;;  %1199 = vst [vmem:[%s3375_s10 + $0x4a0] sm:%s3841_s11] %v1198_v13 }
 0x12c   : > { %v1200_v14 = vld [vmem:[%s3372_s30 + $0x850] sm:%s3841_s11]  ;;  %v1202_v15 = vld [vmem:[%s3372_s30 + $0x888] sm:%s3841_s11] }
 0x12d   : > { %1201 = vst [vmem:[%s3375_s10 + $0x4c0] sm:%s3841_s11] %v1200_v14  ;;  %1203 = vst [vmem:[%s3375_s10 + $0x4e0] sm:%s3841_s11] %v1202_v15 }
 0x12e   : > { %v1204_v16 = vld [vmem:[%s3372_s30 + $0x8c0] sm:%s3841_s11]  ;;  %v1206_v17 = vld [vmem:[%s3372_s30 + $0x8f8] sm:%s3841_s11] }
 0x12f   : > { %1205 = vst [vmem:[%s3375_s10 + $0x500] sm:%s3841_s11] %v1204_v16  ;;  %1207 = vst [vmem:[%s3375_s10 + $0x520] sm:%s3841_s11] %v1206_v17 }
 0x130   : > { %v1208_v18 = vld [vmem:[%s3372_s30 + $0x930] sm:%s3841_s11]  ;;  %v1210_v19 = vld [vmem:[%s3372_s30 + $0x968] sm:%s3841_s11] }
 0x131   : > { %1209 = vst [vmem:[%s3375_s10 + $0x540] sm:%s3841_s11] %v1208_v18  ;;  %1211 = vst [vmem:[%s3375_s10 + $0x560] sm:%s3841_s11] %v1210_v19 }
 0x132   : > { %v1212_v20 = vld [vmem:[%s3372_s30 + $0x9a0] sm:%s3841_s11]  ;;  %v1214_v21 = vld [vmem:[%s3372_s30 + $0x9d8] sm:%s3841_s11] }
 0x133   : > { %1213 = vst [vmem:[%s3375_s10 + $0x580] sm:%s3841_s11] %v1212_v20  ;;  %1215 = vst [vmem:[%s3375_s10 + $0x5a0] sm:%s3841_s11] %v1214_v21 }
 0x134   : > { %v1216_v22 = vld [vmem:[%s3372_s30 + $0xa10] sm:%s3841_s11]  ;;  %v1218_v23 = vld [vmem:[%s3372_s30 + $0xa48] sm:%s3841_s11] }
 0x135   : > { %1217 = vst [vmem:[%s3375_s10 + $0x5c0] sm:%s3841_s11] %v1216_v22  ;;  %1219 = vst [vmem:[%s3375_s10 + $0x5e0] sm:%s3841_s11] %v1218_v23 }
 0x136   : > { %v1220_v24 = vld [vmem:[%s3372_s30 + $0xa80] sm:%s3841_s11]  ;;  %v1222_v25 = vld [vmem:[%s3372_s30 + $0xab8] sm:%s3841_s11] }
 0x137   : > { %1221 = vst [vmem:[%s3375_s10 + $0x600] sm:%s3841_s11] %v1220_v24  ;;  %1223 = vst [vmem:[%s3375_s10 + $0x620] sm:%s3841_s11] %v1222_v25 }
 0x138   : > { %v1224_v26 = vld [vmem:[%s3372_s30 + $0xaf0] sm:%s3841_s11]  ;;  %v1226_v27 = vld [vmem:[%s3372_s30 + $0xb28] sm:%s3841_s11] }
 0x139   : > { %1225 = vst [vmem:[%s3375_s10 + $0x640] sm:%s3841_s11] %v1224_v26  ;;  %1227 = vst [vmem:[%s3375_s10 + $0x660] sm:%s3841_s11] %v1226_v27 }
 0x13a   : > { %v1228_v28 = vld [vmem:[%s3372_s30 + $0xb60] sm:%s3841_s11]  ;;  %v1230_v29 = vld [vmem:[%s3372_s30 + $0xb98] sm:%s3841_s11] }
 0x13b   : > { %1229 = vst [vmem:[%s3375_s10 + $0x680] sm:%s3841_s11] %v1228_v28  ;;  %1231 = vst [vmem:[%s3375_s10 + $0x6a0] sm:%s3841_s11] %v1230_v29 }
 0x13c   : > { %v1232_v30 = vld [vmem:[%s3372_s30 + $0xbd0] sm:%s3841_s11]  ;;  %v1234_v31 = vld [vmem:[%s3372_s30 + $0xc08] sm:%s3841_s11] }
 0x13d   : > { %1233 = vst [vmem:[%s3375_s10 + $0x6c0] sm:%s3841_s11] %v1232_v30  ;;  %1235 = vst [vmem:[%s3375_s10 + $0x6e0] sm:%s3841_s11] %v1234_v31 }
 0x13e   : > { %v1236_v32 = vld [vmem:[%s3372_s30 + $0xc40] sm:%s3841_s11]  ;;  %v1238_v33 = vld [vmem:[%s3372_s30 + $0xc78] sm:%s3841_s11] }
 0x13f   : > { %1237 = vst [vmem:[%s3375_s10 + $0x700] sm:%s3841_s11] %v1236_v32  ;;  %1239 = vst [vmem:[%s3375_s10 + $0x720] sm:%s3841_s11] %v1238_v33 }
 0x140   : > { %v1240_v34 = vld [vmem:[%s3372_s30 + $0xcb0] sm:%s3841_s11]  ;;  %v1242_v35 = vld [vmem:[%s3372_s30 + $0xce8] sm:%s3841_s11] }
 0x141   : > { %1241 = vst [vmem:[%s3375_s10 + $0x740] sm:%s3841_s11] %v1240_v34  ;;  %1243 = vst [vmem:[%s3375_s10 + $0x760] sm:%s3841_s11] %v1242_v35 }
 0x142 PF: > { %p2404_p2 = scmp.ge.u32.totalorder %s2892_s6, 8 }
 0x143   : > { %s2810_s1 = smov (!%p2404_p2), 1  }
 0x144   : > { %156 = sbr.rel (%p2404_p2) target bundleno = 389 (0x185), region = 40  ;;  %s157_s8 = sshll.u32 (!%p2404_p2), %s2810_s1, %s2892_s6 }
 0x145   : > { %s4085_s30 = sadd.s32 (!%p2404_p2), 4294967295, %s157_s8 }
 0x149   : > { %v167_v36 = vld [vmem:[%s2890_s4] sm:%s4085_s30]  ;;  %v169_v37 = vld [vmem:[%s2890_s4 + $0x38] sm:%s4085_s30] }
 0x14a   : > { %168 = vst [vmem:[%s2894_s7] sm:%s4085_s30] %v167_v36  ;;  %170 = vst [vmem:[%s2894_s7 + $0x20] sm:%s4085_s30] %v169_v37 }
 0x14b   : > { %v171_v38 = vld [vmem:[%s2890_s4 + $0x70] sm:%s4085_s30]  ;;  %v173_v39 = vld [vmem:[%s2890_s4 + $0xa8] sm:%s4085_s30] }
 0x14c   : > { %172 = vst [vmem:[%s2894_s7 + $0x40] sm:%s4085_s30] %v171_v38  ;;  %174 = vst [vmem:[%s2894_s7 + $0x60] sm:%s4085_s30] %v173_v39 }
 0x14d   : > { %v175_v40 = vld [vmem:[%s2890_s4 + $0xe0] sm:%s4085_s30]  ;;  %v177_v41 = vld [vmem:[%s2890_s4 + $0x118] sm:%s4085_s30] }
 0x14e   : > { %176 = vst [vmem:[%s2894_s7 + $0x80] sm:%s4085_s30] %v175_v40  ;;  %178 = vst [vmem:[%s2894_s7 + $0xa0] sm:%s4085_s30] %v177_v41 }
 0x14f   : > { %v179_v42 = vld [vmem:[%s2890_s4 + $0x150] sm:%s4085_s30]  ;;  %v181_v43 = vld [vmem:[%s2890_s4 + $0x188] sm:%s4085_s30] }
 0x150   : > { %180 = vst [vmem:[%s2894_s7 + $0xc0] sm:%s4085_s30] %v179_v42  ;;  %182 = vst [vmem:[%s2894_s7 + $0xe0] sm:%s4085_s30] %v181_v43 }
 0x151   : > { %v183_v44 = vld [vmem:[%s2890_s4 + $0x1c0] sm:%s4085_s30]  ;;  %v185_v45 = vld [vmem:[%s2890_s4 + $0x1f8] sm:%s4085_s30] }
 0x152   : > { %184 = vst [vmem:[%s2894_s7 + $0x100] sm:%s4085_s30] %v183_v44  ;;  %186 = vst [vmem:[%s2894_s7 + $0x120] sm:%s4085_s30] %v185_v45 }
 0x153   : > { %v187_v46 = vld [vmem:[%s2890_s4 + $0x230] sm:%s4085_s30]  ;;  %v189_v47 = vld [vmem:[%s2890_s4 + $0x268] sm:%s4085_s30] }
 0x154   : > { %188 = vst [vmem:[%s2894_s7 + $0x140] sm:%s4085_s30] %v187_v46  ;;  %190 = vst [vmem:[%s2894_s7 + $0x160] sm:%s4085_s30] %v189_v47 }
 0x155   : > { %v191_v48 = vld [vmem:[%s2890_s4 + $0x2a0] sm:%s4085_s30]  ;;  %v193_v49 = vld [vmem:[%s2890_s4 + $0x2d8] sm:%s4085_s30] }
 0x156   : > { %192 = vst [vmem:[%s2894_s7 + $0x180] sm:%s4085_s30] %v191_v48  ;;  %194 = vst [vmem:[%s2894_s7 + $0x1a0] sm:%s4085_s30] %v193_v49 }
 0x157   : > { %v195_v50 = vld [vmem:[%s2890_s4 + $0x310] sm:%s4085_s30]  ;;  %v197_v51 = vld [vmem:[%s2890_s4 + $0x348] sm:%s4085_s30] }
 0x158   : > { %196 = vst [vmem:[%s2894_s7 + $0x1c0] sm:%s4085_s30] %v195_v50  ;;  %198 = vst [vmem:[%s2894_s7 + $0x1e0] sm:%s4085_s30] %v197_v51 }
 0x159   : > { %v199_v52 = vld [vmem:[%s2890_s4 + $0x380] sm:%s4085_s30]  ;;  %v201_v53 = vld [vmem:[%s2890_s4 + $0x3b8] sm:%s4085_s30] }
 0x15a   : > { %200 = vst [vmem:[%s2894_s7 + $0x200] sm:%s4085_s30] %v199_v52  ;;  %202 = vst [vmem:[%s2894_s7 + $0x220] sm:%s4085_s30] %v201_v53 }
 0x15b   : > { %v203_v54 = vld [vmem:[%s2890_s4 + $0x3f0] sm:%s4085_s30]  ;;  %v205_v55 = vld [vmem:[%s2890_s4 + $0x428] sm:%s4085_s30] }
 0x15c   : > { %204 = vst [vmem:[%s2894_s7 + $0x240] sm:%s4085_s30] %v203_v54  ;;  %206 = vst [vmem:[%s2894_s7 + $0x260] sm:%s4085_s30] %v205_v55 }
 0x15d   : > { %v207_v56 = vld [vmem:[%s2890_s4 + $0x460] sm:%s4085_s30]  ;;  %v209_v57 = vld [vmem:[%s2890_s4 + $0x498] sm:%s4085_s30] }
 0x15e   : > { %208 = vst [vmem:[%s2894_s7 + $0x280] sm:%s4085_s30] %v207_v56  ;;  %210 = vst [vmem:[%s2894_s7 + $0x2a0] sm:%s4085_s30] %v209_v57 }
 0x15f   : > { %v211_v58 = vld [vmem:[%s2890_s4 + $0x4d0] sm:%s4085_s30]  ;;  %v213_v59 = vld [vmem:[%s2890_s4 + $0x508] sm:%s4085_s30] }
 0x160   : > { %212 = vst [vmem:[%s2894_s7 + $0x2c0] sm:%s4085_s30] %v211_v58  ;;  %214 = vst [vmem:[%s2894_s7 + $0x2e0] sm:%s4085_s30] %v213_v59 }
 0x161   : > { %v215_v60 = vld [vmem:[%s2890_s4 + $0x540] sm:%s4085_s30]  ;;  %v217_v61 = vld [vmem:[%s2890_s4 + $0x578] sm:%s4085_s30] }
 0x162   : > { %216 = vst [vmem:[%s2894_s7 + $0x300] sm:%s4085_s30] %v215_v60  ;;  %218 = vst [vmem:[%s2894_s7 + $0x320] sm:%s4085_s30] %v217_v61 }
 0x163   : > { %v219_v62 = vld [vmem:[%s2890_s4 + $0x5b0] sm:%s4085_s30]  ;;  %v221_v63 = vld [vmem:[%s2890_s4 + $0x5e8] sm:%s4085_s30] }
 0x164   : > { %220 = vst [vmem:[%s2894_s7 + $0x340] sm:%s4085_s30] %v219_v62  ;;  %222 = vst [vmem:[%s2894_s7 + $0x360] sm:%s4085_s30] %v221_v63 }
 0x165   : > { %v223_v0 = vld [vmem:[%s2890_s4 + $0x620] sm:%s4085_s30]  ;;  %v225_v1 = vld [vmem:[%s2890_s4 + $0x658] sm:%s4085_s30] }
 0x166   : > { %224 = vst [vmem:[%s2894_s7 + $0x380] sm:%s4085_s30] %v223_v0  ;;  %226 = vst [vmem:[%s2894_s7 + $0x3a0] sm:%s4085_s30] %v225_v1 }
 0x167   : > { %v227_v2 = vld [vmem:[%s2890_s4 + $0x690] sm:%s4085_s30]  ;;  %v229_v3 = vld [vmem:[%s2890_s4 + $0x6c8] sm:%s4085_s30] }
 0x168   : > { %228 = vst [vmem:[%s2894_s7 + $0x3c0] sm:%s4085_s30] %v227_v2  ;;  %230 = vst [vmem:[%s2894_s7 + $0x3e0] sm:%s4085_s30] %v229_v3 }
 0x169   : > { %v231_v4 = vld [vmem:[%s2890_s4 + $0x700] sm:%s4085_s30]  ;;  %v233_v5 = vld [vmem:[%s2890_s4 + $0x738] sm:%s4085_s30] }
 0x16a   : > { %232 = vst [vmem:[%s2894_s7 + $0x400] sm:%s4085_s30] %v231_v4  ;;  %234 = vst [vmem:[%s2894_s7 + $0x420] sm:%s4085_s30] %v233_v5 }
 0x16b   : > { %v235_v6 = vld [vmem:[%s2890_s4 + $0x770] sm:%s4085_s30]  ;;  %v237_v7 = vld [vmem:[%s2890_s4 + $0x7a8] sm:%s4085_s30] }
 0x16c   : > { %236 = vst [vmem:[%s2894_s7 + $0x440] sm:%s4085_s30] %v235_v6  ;;  %238 = vst [vmem:[%s2894_s7 + $0x460] sm:%s4085_s30] %v237_v7 }
 0x16d   : > { %v239_v8 = vld [vmem:[%s2890_s4 + $0x7e0] sm:%s4085_s30]  ;;  %v241_v9 = vld [vmem:[%s2890_s4 + $0x818] sm:%s4085_s30] }
 0x16e   : > { %240 = vst [vmem:[%s2894_s7 + $0x480] sm:%s4085_s30] %v239_v8  ;;  %242 = vst [vmem:[%s2894_s7 + $0x4a0] sm:%s4085_s30] %v241_v9 }
 0x16f   : > { %v243_v10 = vld [vmem:[%s2890_s4 + $0x850] sm:%s4085_s30]  ;;  %v245_v11 = vld [vmem:[%s2890_s4 + $0x888] sm:%s4085_s30] }
 0x170   : > { %244 = vst [vmem:[%s2894_s7 + $0x4c0] sm:%s4085_s30] %v243_v10  ;;  %246 = vst [vmem:[%s2894_s7 + $0x4e0] sm:%s4085_s30] %v245_v11 }
 0x171   : > { %v247_v12 = vld [vmem:[%s2890_s4 + $0x8c0] sm:%s4085_s30]  ;;  %v249_v13 = vld [vmem:[%s2890_s4 + $0x8f8] sm:%s4085_s30] }
 0x172   : > { %248 = vst [vmem:[%s2894_s7 + $0x500] sm:%s4085_s30] %v247_v12  ;;  %250 = vst [vmem:[%s2894_s7 + $0x520] sm:%s4085_s30] %v249_v13 }
 0x173   : > { %v251_v14 = vld [vmem:[%s2890_s4 + $0x930] sm:%s4085_s30]  ;;  %v253_v15 = vld [vmem:[%s2890_s4 + $0x968] sm:%s4085_s30] }
 0x174   : > { %252 = vst [vmem:[%s2894_s7 + $0x540] sm:%s4085_s30] %v251_v14  ;;  %254 = vst [vmem:[%s2894_s7 + $0x560] sm:%s4085_s30] %v253_v15 }
 0x175   : > { %v255_v16 = vld [vmem:[%s2890_s4 + $0x9a0] sm:%s4085_s30]  ;;  %v257_v17 = vld [vmem:[%s2890_s4 + $0x9d8] sm:%s4085_s30] }
 0x176   : > { %256 = vst [vmem:[%s2894_s7 + $0x580] sm:%s4085_s30] %v255_v16  ;;  %258 = vst [vmem:[%s2894_s7 + $0x5a0] sm:%s4085_s30] %v257_v17 }
 0x177   : > { %v259_v18 = vld [vmem:[%s2890_s4 + $0xa10] sm:%s4085_s30]  ;;  %v261_v19 = vld [vmem:[%s2890_s4 + $0xa48] sm:%s4085_s30] }
 0x178   : > { %260 = vst [vmem:[%s2894_s7 + $0x5c0] sm:%s4085_s30] %v259_v18  ;;  %262 = vst [vmem:[%s2894_s7 + $0x5e0] sm:%s4085_s30] %v261_v19 }
 0x179   : > { %v263_v20 = vld [vmem:[%s2890_s4 + $0xa80] sm:%s4085_s30]  ;;  %v265_v21 = vld [vmem:[%s2890_s4 + $0xab8] sm:%s4085_s30] }
 0x17a   : > { %264 = vst [vmem:[%s2894_s7 + $0x600] sm:%s4085_s30] %v263_v20  ;;  %266 = vst [vmem:[%s2894_s7 + $0x620] sm:%s4085_s30] %v265_v21 }
 0x17b   : > { %v267_v22 = vld [vmem:[%s2890_s4 + $0xaf0] sm:%s4085_s30]  ;;  %v269_v23 = vld [vmem:[%s2890_s4 + $0xb28] sm:%s4085_s30] }
 0x17c   : > { %268 = vst [vmem:[%s2894_s7 + $0x640] sm:%s4085_s30] %v267_v22  ;;  %270 = vst [vmem:[%s2894_s7 + $0x660] sm:%s4085_s30] %v269_v23 }
 0x17d   : > { %v271_v24 = vld [vmem:[%s2890_s4 + $0xb60] sm:%s4085_s30]  ;;  %v273_v25 = vld [vmem:[%s2890_s4 + $0xb98] sm:%s4085_s30] }
 0x17e   : > { %272 = vst [vmem:[%s2894_s7 + $0x680] sm:%s4085_s30] %v271_v24  ;;  %274 = vst [vmem:[%s2894_s7 + $0x6a0] sm:%s4085_s30] %v273_v25 }
 0x17f   : > { %v275_v26 = vld [vmem:[%s2890_s4 + $0xbd0] sm:%s4085_s30]  ;;  %v277_v27 = vld [vmem:[%s2890_s4 + $0xc08] sm:%s4085_s30] }
 0x180   : > { %276 = vst [vmem:[%s2894_s7 + $0x6c0] sm:%s4085_s30] %v275_v26  ;;  %278 = vst [vmem:[%s2894_s7 + $0x6e0] sm:%s4085_s30] %v277_v27 }
 0x181   : > { %v279_v28 = vld [vmem:[%s2890_s4 + $0xc40] sm:%s4085_s30]  ;;  %v281_v29 = vld [vmem:[%s2890_s4 + $0xc78] sm:%s4085_s30] }
 0x182   : > { %280 = vst [vmem:[%s2894_s7 + $0x700] sm:%s4085_s30] %v279_v28  ;;  %282 = vst [vmem:[%s2894_s7 + $0x720] sm:%s4085_s30] %v281_v29 }
 0x183   : > { %v283_v30 = vld [vmem:[%s2890_s4 + $0xcb0] sm:%s4085_s30]  ;;  %v285_v31 = vld [vmem:[%s2890_s4 + $0xce8] sm:%s4085_s30] }
 0x184   : > { %284 = vst [vmem:[%s2894_s7 + $0x740] sm:%s4085_s30] %v283_v30  ;;  %286 = vst [vmem:[%s2894_s7 + $0x760] sm:%s4085_s30] %v285_v31 }
 0x185 PF: > { %p2406_p3 = scmp.ge.s32.totalorder %s2743_s15, 1  ;;  %p1246_p4 = scmp.lt.s32.totalorder %s2743_s15, 3 }
 0x187   : > { %p1247_p5 = pnand %p2406_p3, %p1246_p4 }
 0x188   : > { %s4330_s6 = sand.u32 (!%p1247_p5), 1, %s2735_s13  }
 0x189   : > { %1250 = sbr.rel (%p1247_p5) target bundleno = 804 (0x324), region = 94  ;;  %s2206_s30 = scalar_lea.sflag (!%p1247_p5), [#allocation4], %s4330_s6 }
 0x18a   : > { %s2443_s10 = smul.u32 (!%p1247_p5), 1920, %s4330_s6 }
 0x18c   : > { %s4333_s26 = scalar_lea.vmem (!%p1247_p5), [#allocation2], %s2443_s10 }
 0x18e   : > { %v1455_v32 = vld [vmem:[%s4333_s26 + $0x1e8] sm:$0xff]  ;;  %v1454_v34 = vld [vmem:[%s4333_s26 + $0x1e0] sm:$0xff]  ;;  %vm1634_vm0 = vcmask 785408   ;;  %s2428_s10 = sshll.u32 (%p2873_p6), %s2855_s16, 2 }
 0x18f   : > { %v1583_v33 = vld [vmem:[%s4333_s26 + $0x5e8] sm:$0xff]  ;;  %1665 = vmatprep.subr.mxu0 %v1455_v32  ;;  %v1582_v35 = vld [vmem:[%s4333_s26 + $0x5e0] sm:$0xff]  ;;  %s2214_s4 = ssub.s32 (%p2873_p6), 7, %s2428_s10 }
 0x190   : > { %1790 = vmatprep.subr.mxu1 %v1583_v33  ;;  %v1451_v36 = vld [vmem:[%s4333_s26 + $0x1c8] sm:$0xff]  ;;  %1666 = vmatpush1.msra.mxu0 %v1454_v34  ;;  %v1450_v38 = vld [vmem:[%s4333_s26 + $0x1c0] sm:$0xff]  ;;  %p2215_p7 = scmp.lt.s32.totalorder (%p2873_p6), %s2214_s4, 4 }
 0x191   : > { %v1579_v37 = vld [vmem:[%s4333_s26 + $0x5c8] sm:$0xff]  ;;  %1791 = vmatpush1.msra.mxu1 %v1582_v35  ;;  %v1578_v39 = vld [vmem:[%s4333_s26 + $0x5c0] sm:$0xff]  ;;  %1667 = vmatprep.subr.mxu0 %v1451_v36 }
 0x192   : > { %v1447_v40 = vld [vmem:[%s4333_s26 + $0x1a8] sm:$0xff]  ;;  %1792 = vmatprep.subr.mxu1 %v1579_v37  ;;  %v1446_v42 = vld [vmem:[%s4333_s26 + $0x1a0] sm:$0xff]  ;;  %1668 = vmatpush1.msra.mxu0 %v1450_v38 }
 0x193   : > { %v1575_v41 = vld [vmem:[%s4333_s26 + $0x5a8] sm:$0xff]  ;;  %v1574_v43 = vld [vmem:[%s4333_s26 + $0x5a0] sm:$0xff]  ;;  %1793 = vmatpush1.msra.mxu1 %v1578_v39  ;;  %1669 = vmatprep.subr.mxu0 %v1447_v40 }
 0x194   : > { %v1443_v44 = vld [vmem:[%s4333_s26 + $0x188] sm:$0xff]  ;;  %1794 = vmatprep.subr.mxu1 %v1575_v41  ;;  %v1442_v46 = vld [vmem:[%s4333_s26 + $0x180] sm:$0xff]  ;;  %1670 = vmatpush1.msra.mxu0 %v1446_v42 }
 0x195   : > { %v1571_v45 = vld [vmem:[%s4333_s26 + $0x588] sm:$0xff]  ;;  %v1570_v47 = vld [vmem:[%s4333_s26 + $0x580] sm:$0xff]  ;;  %1795 = vmatpush1.msra.mxu1 %v1574_v43  ;;  %1671 = vmatprep.subr.mxu0 %v1443_v44 }
 0x196   : > { %v1439_v48 = vld [vmem:[%s4333_s26 + $0x168] sm:$0xff]  ;;  %v1286_v50 = vld [vmem:[%s5049_s0] sm:$0xf]  ;;  %1796 = vmatprep.subr.mxu1 %v1571_v45  ;;  %1672 = vmatpush1.msra.mxu0 %v1442_v46 }
 0x197   : > { %v1567_v49 = vld [vmem:[%s4333_s26 + $0x568] sm:$0xff]  ;;  %v1438_v51 = vld [vmem:[%s4333_s26 + $0x160] sm:$0xff]  ;;  %1797 = vmatpush1.msra.mxu1 %v1570_v47  ;;  %1673 = vmatprep.subr.mxu0 %v1439_v48  ;;  %v2407_v57 = vmul.f32 -1.442695, %v1286_v50 }
 0x198   : > { %v1566_v52 = vld [vmem:[%s4333_s26 + $0x560] sm:$0xff]  ;;  %v1435_v53 = vld [vmem:[%s4333_s26 + $0x148] sm:$0xff]  ;;  %1798 = vmatprep.subr.mxu1 %v1567_v49  ;;  %1674 = vmatpush1.msra.mxu0 %v1438_v51 }
 0x199   : > { %v1563_v54 = vld [vmem:[%s4333_s26 + $0x548] sm:$0xff]  ;;  %v1434_v55 = vld [vmem:[%s4333_s26 + $0x140] sm:$0xff]  ;;  %1799 = vmatpush1.msra.mxu1 %v1566_v52  ;;  %1675 = vmatprep.subr.mxu0 %v1435_v53  ;;  %2615 = vpow2.f32 %v2407_v57  ;;  %v1334_v52 = vlaneseq }
 0x19a   : > { %v1562_v56 = vld [vmem:[%s4333_s26 + $0x540] sm:$0xff]  ;;  %v1431_v58 = vld [vmem:[%s4333_s26 + $0x128] sm:$0xff]  ;;  %1800 = vmatprep.subr.mxu1 %v1563_v54  ;;  %1676 = vmatpush1.msra.mxu0 %v1434_v55 }
 0x19b   : > { %v1559_v59 = vld [vmem:[%s4333_s26 + $0x528] sm:$0xff]  ;;  %v1430_v60 = vld [vmem:[%s4333_s26 + $0x120] sm:$0xff]  ;;  %1801 = vmatpush1.msra.mxu1 %v1562_v56  ;;  %1677 = vmatprep.subr.mxu0 %v1431_v58 }
 0x19c   : > { %v1558_v61 = vld [vmem:[%s4333_s26 + $0x520] sm:$0xff]  ;;  %v1427_v62 = vld [vmem:[%s4333_s26 + $0x108] sm:$0xff]  ;;  %1802 = vmatprep.subr.mxu1 %v1559_v59  ;;  %1678 = vmatpush1.msra.mxu0 %v1430_v60 }
 0x19d   : > { %v1555_v63 = vld [vmem:[%s4333_s26 + $0x508] sm:$0xff]  ;;  %v1426_v0 = vld [vmem:[%s4333_s26 + $0x100] sm:$0xff]  ;;  %1803 = vmatpush1.msra.mxu1 %v1558_v61  ;;  %1679 = vmatprep.subr.mxu0 %v1427_v62  ;;  %v4426_v61 = vshrl.u32 %v1334_v52, 7 }
 0x19e   : > { %v1554_v1 = vld [vmem:[%s4333_s26 + $0x500] sm:$0xff]  ;;  %v1423_v2 = vld [vmem:[%s4333_s26 + $0xe8] sm:$0xff]  ;;  %1804 = vmatprep.subr.mxu1 %v1555_v63  ;;  %1680 = vmatpush1.msra.mxu0 %v1426_v0 }
 0x19f   : > { %v1551_v3 = vld [vmem:[%s4333_s26 + $0x4e8] sm:$0xff]  ;;  %v1422_v4 = vld [vmem:[%s4333_s26 + $0xe0] sm:$0xff]  ;;  %1805 = vmatpush1.msra.mxu1 %v1554_v1  ;;  %1681 = vmatprep.subr.mxu0 %v1423_v2 }
 0x1a0   : > { %v1550_v5 = vld [vmem:[%s4333_s26 + $0x4e0] sm:$0xff]  ;;  %v1419_v6 = vld [vmem:[%s4333_s26 + $0xc8] sm:$0xff]  ;;  %1806 = vmatprep.subr.mxu1 %v1551_v3  ;;  %1682 = vmatpush1.msra.mxu0 %v1422_v4 }
 0x1a1   : > { %v1547_v7 = vld [vmem:[%s4333_s26 + $0x4c8] sm:$0xff]  ;;  %v1418_v8 = vld [vmem:[%s4333_s26 + $0xc0] sm:$0xff]  ;;  %1807 = vmatpush1.msra.mxu1 %v1550_v5  ;;  %1683 = vmatprep.subr.mxu0 %v1419_v6  ;;  %v1348_v6 = vsub.s32 3, %v4426_v61 }
 0x1a2   : > { %v1546_v9 = vld [vmem:[%s4333_s26 + $0x4c0] sm:$0xff]  ;;  %v1415_v10 = vld [vmem:[%s4333_s26 + $0xa8] sm:$0xff]  ;;  %1808 = vmatprep.subr.mxu1 %v1547_v7  ;;  %1684 = vmatpush1.msra.mxu0 %v1418_v8 }
 0x1a3   : > { %v1543_v11 = vld [vmem:[%s4333_s26 + $0x4a8] sm:$0xff]  ;;  %v1414_v12 = vld [vmem:[%s4333_s26 + $0xa0] sm:$0xff]  ;;  %1809 = vmatpush1.msra.mxu1 %v1546_v9  ;;  %1685 = vmatprep.subr.mxu0 %v1415_v10  ;;  %v1344_v10 = vsub.s32 2, %v4426_v61 }
 0x1a4   : > { %v1542_v13 = vld [vmem:[%s4333_s26 + $0x4a0] sm:$0xff]  ;;  %v1411_v14 = vld [vmem:[%s4333_s26 + $0x88] sm:$0xff]  ;;  %1810 = vmatprep.subr.mxu1 %v1543_v11  ;;  %1686 = vmatpush1.msra.mxu0 %v1414_v12 }
 0x1a5   : > { %v1539_v15 = vld [vmem:[%s4333_s26 + $0x488] sm:$0xff]  ;;  %v1410_v16 = vld [vmem:[%s4333_s26 + $0x80] sm:$0xff]  ;;  %1811 = vmatpush1.msra.mxu1 %v1542_v13  ;;  %1687 = vmatprep.subr.mxu0 %v1411_v14 }
 0x1a6   : > { %v1538_v17 = vld [vmem:[%s4333_s26 + $0x480] sm:$0xff]  ;;  %v1407_v18 = vld [vmem:[%s4333_s26 + $0x68] sm:$0xff]  ;;  %1812 = vmatprep.subr.mxu1 %v1539_v15  ;;  %1688 = vmatpush1.msra.mxu0 %v1410_v16  ;;  %v2616_v26 = vpop.eup %2615 }
 0x1a7   : > { %v1535_v19 = vld [vmem:[%s4333_s26 + $0x468] sm:$0xff]  ;;  %v1406_v20 = vld [vmem:[%s4333_s26 + $0x60] sm:$0xff]  ;;  %1813 = vmatpush1.msra.mxu1 %v1538_v17  ;;  %1689 = vmatprep.subr.mxu0 %v1407_v18  ;;  %v1290_v35 = vadd.f32 1.0, %v2616_v26 }
 0x1a8   : > { %v1534_v21 = vld [vmem:[%s4333_s26 + $0x460] sm:$0xff]  ;;  %v1403_v22 = vld [vmem:[%s4333_s26 + $0x48] sm:$0xff]  ;;  %1814 = vmatprep.subr.mxu1 %v1535_v19  ;;  %1690 = vmatpush1.msra.mxu0 %v1406_v20  ;;  %v1296_v20 = vld [vmem:[%s5051_s2 + $0x18] sm:$0xff] }
 0x1a9   : > { %v1531_v23 = vld [vmem:[%s4333_s26 + $0x448] sm:$0xff]  ;;  %v1402_v24 = vld [vmem:[%s4333_s26 + $0x40] sm:$0xff]  ;;  %1815 = vmatpush1.msra.mxu1 %v1534_v21  ;;  %1691 = vmatprep.subr.mxu0 %v1403_v22  ;;  %2617 = vrcp.f32 %v1290_v35 }
 0x1aa   : > { %v1530_v25 = vld [vmem:[%s4333_s26 + $0x440] sm:$0xff]  ;;  %v1399_v27 = vld [vmem:[%s4333_s26 + $0x28] sm:$0xff]  ;;  %1816 = vmatprep.subr.mxu1 %v1531_v23  ;;  %1692 = vmatpush1.msra.mxu0 %v1402_v24  ;;  %v1295_v24 = vld [vmem:[%s5051_s2 + $0x10] sm:$0xff] }
 0x1ab   : > { %v1527_v28 = vld [vmem:[%s4333_s26 + $0x428] sm:$0xff]  ;;  %v1398_v29 = vld [vmem:[%s4333_s26 + $0x20] sm:$0xff]  ;;  %1817 = vmatpush1.msra.mxu1 %v1530_v25  ;;  %1693 = vmatprep.subr.mxu0 %v1399_v27 }
 0x1ac   : > { %v1526_v30 = vld [vmem:[%s4333_s26 + $0x420] sm:$0xff]  ;;  %v1395_v31 = vld [vmem:[%s4333_s26 + $0x8] sm:$0xff]  ;;  %1818 = vmatprep.subr.mxu1 %v1527_v28  ;;  %1694 = vmatpush1.msra.mxu0 %v1398_v29 }
 0x1ad   : > { %v1523_v32 = vld [vmem:[%s4333_s26 + $0x408] sm:$0xff]  ;;  %v1394_v33 = vld [vmem:[%s4333_s26] sm:$0xff]  ;;  %1819 = vmatpush1.msra.mxu1 %v1526_v30  ;;  %1695 = vmatprep.subr.mxu0 %v1395_v31  ;;  %v1340_v30 = vsub.s32 1, %v4426_v61 }
 0x1ae   : > { %v1522_v34 = vld [vmem:[%s4333_s26 + $0x400] sm:$0xff]  ;;  %v1519_v36 = vld [vmem:[%s4333_s26 + $0x3e8] sm:$0xff]  ;;  %1820 = vmatprep.subr.mxu1 %v1523_v32  ;;  %1696 = vmatpush1.msra.mxu0 %v1394_v33  ;;  %v1336_v33 = vsub.s32 0, %v4426_v61  ;;  %v1436_v61 = vld [vmem:[%s4333_s26 + $0x150] sm:$0xff] }
 0x1af   : > { %v1631_v37 = vld [vmem:[%s4333_s26 + $0x768] sm:$0xff]  ;;  %v1518_v38 = vld [vmem:[%s4333_s26 + $0x3e0] sm:$0xff]  ;;  %1821 = vmatpush1.msra.mxu1 %v1522_v34  ;;  %1697 = vmatprep.subr.mxu0 %v1519_v36  ;;  %v1457_v34 = vld [vmem:[%s4333_s26 + $0x1f8] sm:$0xff] }
 0x1b0   : > { %v1630_v39 = vld [vmem:[%s4333_s26 + $0x760] sm:$0xff]  ;;  %v1515_v40 = vld [vmem:[%s4333_s26 + $0x3c8] sm:$0xff]  ;;  %1830 = vmatprep.subr.mxu1 %v1631_v37  ;;  %1698 = vmatpush2.msra.mxu0 %v1518_v38  ;;  %v1456_v36 = vld [vmem:[%s4333_s26 + $0x1f0] sm:$0xff] }
 0x1b1   : > { %v1627_v41 = vld [vmem:[%s4333_s26 + $0x748] sm:$0xff]  ;;  %v1514_v42 = vld [vmem:[%s4333_s26 + $0x3c0] sm:$0xff]  ;;  %1831 = vmatpush2.msra.mxu1 %v1630_v39  ;;  %1699 = vmatprep.subr.mxu0 %v1515_v40  ;;  %v1453_v38 = vld [vmem:[%s4333_s26 + $0x1d8] sm:$0xff] }
 0x1b2   : > { %v1626_v43 = vld [vmem:[%s4333_s26 + $0x740] sm:$0xff]  ;;  %v1511_v44 = vld [vmem:[%s4333_s26 + $0x3a8] sm:$0xff]  ;;  %1832 = vmatprep.subr.mxu1 %v1627_v41  ;;  %1700 = vmatpush2.msra.mxu0 %v1514_v42  ;;  %v1452_v41 = vld [vmem:[%s4333_s26 + $0x1d0] sm:$0xff] }
 0x1b3   : > { %v1623_v45 = vld [vmem:[%s4333_s26 + $0x728] sm:$0xff]  ;;  %v1510_v46 = vld [vmem:[%s4333_s26 + $0x3a0] sm:$0xff]  ;;  %1833 = vmatpush2.msra.mxu1 %v1626_v43  ;;  %1701 = vmatprep.subr.mxu0 %v1511_v44 }
 0x1b4   : > { %v1622_v47 = vld [vmem:[%s4333_s26 + $0x720] sm:$0xff]  ;;  %v1507_v48 = vld [vmem:[%s4333_s26 + $0x388] sm:$0xff]  ;;  %1834 = vmatprep.subr.mxu1 %v1623_v45  ;;  %1702 = vmatpush2.msra.mxu0 %v1510_v46  ;;  %v1449_v45 = vld [vmem:[%s4333_s26 + $0x1b8] sm:$0xff] }
 0x1b5   : > { %v1619_v49 = vld [vmem:[%s4333_s26 + $0x708] sm:$0xff]  ;;  %v1506_v50 = vld [vmem:[%s4333_s26 + $0x380] sm:$0xff]  ;;  %1835 = vmatpush2.msra.mxu1 %v1622_v47  ;;  %1703 = vmatprep.subr.mxu0 %v1507_v48  ;;  %v1448_v48 = vld [vmem:[%s4333_s26 + $0x1b0] sm:$0xff] }
 0x1b6   : > { %v1618_v51 = vld [vmem:[%s4333_s26 + $0x700] sm:$0xff]  ;;  %v1503_v53 = vld [vmem:[%s4333_s26 + $0x368] sm:$0xff]  ;;  %1836 = vmatprep.subr.mxu1 %v1619_v49  ;;  %1704 = vmatpush2.msra.mxu0 %v1506_v50  ;;  %v4437_v7 = vpop.eup %2617  ;;  %v1445_v50 = vld [vmem:[%s4333_s26 + $0x198] sm:$0xff] }
 0x1b7   : > { %v1615_v54 = vld [vmem:[%s4333_s26 + $0x6e8] sm:$0xff]  ;;  %v1502_v55 = vld [vmem:[%s4333_s26 + $0x360] sm:$0xff]  ;;  %1837 = vmatpush2.msra.mxu1 %v1618_v51  ;;  %1705 = vmatprep.subr.mxu0 %v1503_v53  ;;  %v4449_v17 = vrot.slane %v4437_v7, %v1348_v6  ;;  %v4457_v21 = vrot.slane %v4437_v7, %v1344_v10  ;;  %v4485_v39 = vrot.slane %v4437_v7, %v1340_v30  ;;  %v1572_v6 = vld [vmem:[%s4333_s26 + $0x590] sm:$0xff] }
 0x1b8   : > { %v1614_v56 = vld [vmem:[%s4333_s26 + $0x6e0] sm:$0xff]  ;;  %v1499_v57 = vld [vmem:[%s4333_s26 + $0x348] sm:$0xff]  ;;  %1838 = vmatprep.subr.mxu1 %v1615_v54  ;;  %1706 = vmatpush2.msra.mxu0 %v1502_v55  ;;  %v4494_v43 = vrot.slane %v4437_v7, %v1336_v33  ;;  %v1444_v54 = vld [vmem:[%s4333_s26 + $0x190] sm:$0xff] }
 0x1b9   : > { %v1611_v58 = vld [vmem:[%s4333_s26 + $0x6c8] sm:$0xff]  ;;  %v1498_v59 = vld [vmem:[%s4333_s26 + $0x340] sm:$0xff]  ;;  %1839 = vmatpush2.msra.mxu1 %v1614_v56  ;;  %1707 = vmatprep.subr.mxu0 %v1499_v57  ;;  %v4469_v29 = vmul.f32 %v4449_v17, %v1296_v20  ;;  %v4474_v32 = vmul.f32 %v4457_v21, %v1295_v24  ;;  %v1441_v55 = vld [vmem:[%s4333_s26 + $0x178] sm:$0xff] }
 0x1ba   : > { %v1610_v60 = vld [vmem:[%s4333_s26 + $0x6c0] sm:$0xff]  ;;  %v1495_v62 = vld [vmem:[%s4333_s26 + $0x328] sm:$0xff]  ;;  %1840 = vmatprep.subr.mxu1 %v1611_v58  ;;  %1708 = vmatpush2.msra.mxu0 %v1498_v59  ;;  %v1585_v56 = vld [vmem:[%s4333_s26 + $0x5f8] sm:$0xff] }
 0x1bb   : > { %v1607_v63 = vld [vmem:[%s4333_s26 + $0x6a8] sm:$0xff]  ;;  %v1494_v0 = vld [vmem:[%s4333_s26 + $0x320] sm:$0xff]  ;;  %1841 = vmatpush2.msra.mxu1 %v1610_v60  ;;  %1709 = vmatprep.subr.mxu0 %v1495_v62  ;;  %v1440_v57 = vld [vmem:[%s4333_s26 + $0x170] sm:$0xff] }
 0x1bc   : > { %v1606_v1 = vld [vmem:[%s4333_s26 + $0x6a0] sm:$0xff]  ;;  %v1491_v2 = vld [vmem:[%s4333_s26 + $0x308] sm:$0xff]  ;;  %1842 = vmatprep.subr.mxu1 %v1607_v63  ;;  %1710 = vmatpush2.msra.mxu0 %v1494_v0  ;;  %v1584_v58 = vld [vmem:[%s4333_s26 + $0x5f0] sm:$0xff] }
 0x1bd   : > { %v1603_v3 = vld [vmem:[%s4333_s26 + $0x688] sm:$0xff]  ;;  %v1490_v4 = vld [vmem:[%s4333_s26 + $0x300] sm:$0xff]  ;;  %1843 = vmatpush2.msra.mxu1 %v1606_v1  ;;  %1711 = vmatprep.subr.mxu0 %v1491_v2  ;;  %v1437_v59 = vld [vmem:[%s4333_s26 + $0x158] sm:$0xff] }
 0x1be   : > { %v1602_v5 = vld [vmem:[%s4333_s26 + $0x680] sm:$0xff]  ;;  %v1487_v8 = vld [vmem:[%s4333_s26 + $0x2e8] sm:$0xff]  ;;  %1844 = vmatprep.subr.mxu1 %v1603_v3  ;;  %1712 = vmatpush2.msra.mxu0 %v1490_v4  ;;  %v1581_v60 = vld [vmem:[%s4333_s26 + $0x5d8] sm:$0xff] }
 0x1bf   : > { %v1599_v9 = vld [vmem:[%s4333_s26 + $0x668] sm:$0xff]  ;;  %v1486_v11 = vld [vmem:[%s4333_s26 + $0x2e0] sm:$0xff]  ;;  %1845 = vmatpush2.msra.mxu1 %v1602_v5  ;;  %1713 = vmatprep.subr.mxu0 %v1487_v8  ;;  %v1580_v62 = vld [vmem:[%s4333_s26 + $0x5d0] sm:$0xff] }
 0x1c0   : > { %v1598_v12 = vld [vmem:[%s4333_s26 + $0x660] sm:$0xff]  ;;  %v1483_v13 = vld [vmem:[%s4333_s26 + $0x2c8] sm:$0xff]  ;;  %1846 = vmatprep.subr.mxu1 %v1599_v9  ;;  %1714 = vmatpush2.msra.mxu0 %v1486_v11  ;;  %v1433_v63 = vld [vmem:[%s4333_s26 + $0x138] sm:$0xff] }
 0x1c1   : > { %v1595_v14 = vld [vmem:[%s4333_s26 + $0x648] sm:$0xff]  ;;  %v1482_v15 = vld [vmem:[%s4333_s26 + $0x2c0] sm:$0xff]  ;;  %1847 = vmatpush2.msra.mxu1 %v1598_v12  ;;  %1715 = vmatprep.subr.mxu0 %v1483_v13  ;;  %v1577_v0 = vld [vmem:[%s4333_s26 + $0x5b8] sm:$0xff] }
 0x1c2   : > { %v1594_v16 = vld [vmem:[%s4333_s26 + $0x640] sm:$0xff]  ;;  %v1479_v18 = vld [vmem:[%s4333_s26 + $0x2a8] sm:$0xff]  ;;  %1848 = vmatprep.subr.mxu1 %v1595_v14  ;;  %1716 = vmatpush2.msra.mxu0 %v1482_v15  ;;  %v1432_v1 = vld [vmem:[%s4333_s26 + $0x130] sm:$0xff] }
 0x1c3   : > { %v1591_v19 = vld [vmem:[%s4333_s26 + $0x628] sm:$0xff]  ;;  %v1478_v22 = vld [vmem:[%s4333_s26 + $0x2a0] sm:$0xff]  ;;  %1849 = vmatpush2.msra.mxu1 %v1594_v16  ;;  %1717 = vmatprep.subr.mxu0 %v1479_v18  ;;  %v1576_v2 = vld [vmem:[%s4333_s26 + $0x5b0] sm:$0xff] }
 0x1c4   : > { %v1590_v23 = vld [vmem:[%s4333_s26 + $0x620] sm:$0xff]  ;;  %v1475_v25 = vld [vmem:[%s4333_s26 + $0x288] sm:$0xff]  ;;  %1850 = vmatprep.subr.mxu1 %v1591_v19  ;;  %1718 = vmatpush2.msra.mxu0 %v1478_v22  ;;  %v1429_v3 = vld [vmem:[%s4333_s26 + $0x118] sm:$0xff] }
 0x1c5   : > { %v1587_v26 = vld [vmem:[%s4333_s26 + $0x608] sm:$0xff]  ;;  %v1474_v27 = vld [vmem:[%s4333_s26 + $0x280] sm:$0xff]  ;;  %1851 = vmatpush2.msra.mxu1 %v1590_v23  ;;  %1719 = vmatprep.subr.mxu0 %v1475_v25  ;;  %v1573_v4 = vld [vmem:[%s4333_s26 + $0x598] sm:$0xff] }
 0x1c6   : > { %v1586_v28 = vld [vmem:[%s4333_s26 + $0x600] sm:$0xff]  ;;  %v1471_v31 = vld [vmem:[%s4333_s26 + $0x268] sm:$0xff]  ;;  %1852 = vmatprep.subr.mxu1 %v1587_v26  ;;  %1720 = vmatpush2.msra.mxu0 %v1474_v27  ;;  %v1428_v5 = vld [vmem:[%s4333_s26 + $0x110] sm:$0xff] }
 0x1c7   : > { %1853 = vmatpush2.msra.mxu1 %v1586_v28  ;;  %v1470_v35 = vld [vmem:[%s4333_s26 + $0x260] sm:$0xff]  ;;  %2408 = vmatprep.mubr.msk.f32.mxu1 %vm1634_vm0, %v4469_v29  ;;  %v1467_v37 = vld [vmem:[%s4333_s26 + $0x248] sm:$0xff]  ;;  %v1425_v7 = vld [vmem:[%s4333_s26 + $0xf8] sm:$0xff] }
 0x1c8   : > { %1721 = vmatprep.subr.mxu0 %v1471_v31  ;;  %1855 = vmatmul.mubr.f32.vlgmr.msra.gmra.mxu1 %v4474_v32  ;;  %v1466_v40 = vld [vmem:[%s4333_s26 + $0x240] sm:$0xff]  ;;  %v1294_v42 = vld [vmem:[%s5051_s2 + $0x8] sm:$0xff]  ;;  %v1569_v8 = vld [vmem:[%s4333_s26 + $0x578] sm:$0xff] }
 0x1c9   : > { %1915 = vmatprep.subr.mxu1 %v1457_v34  ;;  %1722 = vmatpush2.msra.mxu0 %v1470_v35  ;;  %v1463_v44 = vld [vmem:[%s4333_s26 + $0x228] sm:$0xff]  ;;  %v1293_v46 = vld [vmem:[%s5051_s2] sm:$0xff]  ;;  %v4506_v51 = vmul.f32 %v4485_v39, %v1294_v42  ;;  %v1424_v9 = vld [vmem:[%s4333_s26 + $0xf0] sm:$0xff] }
 0x1ca   : > { %1916 = vmatpush1.msra.mxu1 %v1456_v36  ;;  %1723 = vmatprep.subr.mxu0 %v1467_v37  ;;  %v1462_v47 = vld [vmem:[%s4333_s26 + $0x220] sm:$0xff]  ;;  %v1459_v49 = vld [vmem:[%s4333_s26 + $0x208] sm:$0xff]  ;;  %v4510_v53 = vmul.f32 %v4494_v43, %v1293_v46  ;;  %v1568_v10 = vld [vmem:[%s4333_s26 + $0x570] sm:$0xff] }
 0x1cb   : > { %1917 = vmatprep.subr.mxu1 %v1453_v38  ;;  %1724 = vmatpush2.msra.mxu0 %v1466_v40  ;;  %v1458_v52 = vld [vmem:[%s4333_s26 + $0x200] sm:$0xff]  ;;  %v1421_v11 = vld [vmem:[%s4333_s26 + $0xd8] sm:$0xff]  ;;  %v1420_v13 = vld [vmem:[%s4333_s26 + $0xd0] sm:$0xff] }
 0x1cc   : > { %1918 = vmatpush1.msra.mxu1 %v1452_v41  ;;  %1725 = vmatprep.subr.mxu0 %v1463_v44  ;;  %v1565_v12 = vld [vmem:[%s4333_s26 + $0x558] sm:$0xff]  ;;  %v1564_v14 = vld [vmem:[%s4333_s26 + $0x550] sm:$0xff]  ;;  %v1298_v18 = vld [vmem:[%s5051_s2 + $0x28] sm:$0xff] }
 0x1cd   : > { %1919 = vmatprep.subr.mxu1 %v1449_v45  ;;  %1726 = vmatpush2.msra.mxu0 %v1462_v47  ;;  %v1417_v15 = vld [vmem:[%s4333_s26 + $0xb8] sm:$0xff]  ;;  %v1416_v19 = vld [vmem:[%s4333_s26 + $0xb0] sm:$0xff]  ;;  %v1297_v25 = vld [vmem:[%s5051_s2 + $0x20] sm:$0xff]  ;;  %v4562_v33 = vmul.f32 %v4485_v39, %v1298_v18 }
 0x1ce   : > { %1920 = vmatpush1.msra.mxu1 %v1448_v48  ;;  %1727 = vmatprep.subr.mxu0 %v1459_v49  ;;  %v1561_v16 = vld [vmem:[%s4333_s26 + $0x538] sm:$0xff]  ;;  %v1560_v20 = vld [vmem:[%s4333_s26 + $0x530] sm:$0xff]  ;;  %v4570_v37 = vmul.f32 %v4494_v43, %v1297_v25  ;;  %v1302_v40 = vld [vmem:[%s5051_s2 + $0x48] sm:$0xff] }
 0x1cf   : > { %1921 = vmatprep.subr.mxu1 %v1445_v50  ;;  %1728 = vmatpush2.msra.mxu0 %v1458_v52  ;;  %v1300_v22 = vld [vmem:[%s5051_s2 + $0x38] sm:$0xff]  ;;  %v1412_v26 = vld [vmem:[%s4333_s26 + $0x90] sm:$0xff]  ;;  %v1301_v47 = vld [vmem:[%s5051_s2 + $0x40] sm:$0xff]  ;;  %v4599_v52 = vmul.f32 %v4485_v39, %v1302_v40 }
 0x1d0   : > { %1729 = vmatprep.mubr.f32.mxu0 %v4506_v51  ;;  %1922 = vmatpush1.msra.mxu1 %v1444_v54  ;;  %v1413_v23 = vld [vmem:[%s4333_s26 + $0x98] sm:$0xff]  ;;  %v1556_v27 = vld [vmem:[%s4333_s26 + $0x510] sm:$0xff]  ;;  %v4565_v34 = vmul.f32 %v4449_v17, %v1300_v22  ;;  %v1309_v18 = vld [vmem:[%s5051_s2 + $0x80] sm:$0xff] }
 0x1d1   : > { %1730 = vmatmul.mubr.f32.vlgmr.msra.gmra.mxu0 %v4510_v53  ;;  %1923 = vmatprep.subr.mxu1 %v1441_v55  ;;  %v1557_v24 = vld [vmem:[%s4333_s26 + $0x518] sm:$0xff]  ;;  %v1299_v28 = vld [vmem:[%s5051_s2 + $0x30] sm:$0xff] }
 0x1d2   : > { %2040 = vmatprep.subr.mxu0 %v1585_v56  ;;  %1924 = vmatpush1.msra.mxu1 %v1440_v57  ;;  %v1409_v30 = vld [vmem:[%s4333_s26 + $0x78] sm:$0xff]  ;;  %v1408_v35 = vld [vmem:[%s4333_s26 + $0x70] sm:$0xff]  ;;  %v4573_v38 = vmul.f32 %v4457_v21, %v1299_v28  ;;  %v4607_v57 = vmul.f32 %v4494_v43, %v1301_v47 }
 0x1d3   : > { %2041 = vmatpush1.msra.mxu0 %v1584_v58  ;;  %1925 = vmatprep.subr.mxu1 %v1437_v59  ;;  %v1553_v31 = vld [vmem:[%s4333_s26 + $0x4f8] sm:$0xff]  ;;  %v1552_v36 = vld [vmem:[%s4333_s26 + $0x4f0] sm:$0xff]  ;;  %v1306_v59 = vld [vmem:[%s5051_s2 + $0x68] sm:$0xff] }
 0x1d4   : > { %2042 = vmatprep.subr.mxu0 %v1581_v60  ;;  %1926 = vmatpush1.msra.mxu1 %v1436_v61  ;;  %v1304_v41 = vld [vmem:[%s5051_s2 + $0x58] sm:$0xff]  ;;  %v1404_v45 = vld [vmem:[%s4333_s26 + $0x50] sm:$0xff] }
 0x1d5   : > { %2043 = vmatpush1.msra.mxu0 %v1580_v62  ;;  %1927 = vmatprep.subr.mxu1 %v1433_v63  ;;  %v1405_v42 = vld [vmem:[%s4333_s26 + $0x58] sm:$0xff]  ;;  %v1548_v46 = vld [vmem:[%s4333_s26 + $0x4d0] sm:$0xff]  ;;  %v4602_v54 = vmul.f32 %v4449_v17, %v1304_v41 }
 0x1d6   : > { %2044 = vmatprep.subr.mxu0 %v1577_v0  ;;  %1928 = vmatpush1.msra.mxu1 %v1432_v1  ;;  %v1549_v44 = vld [vmem:[%s4333_s26 + $0x4d8] sm:$0xff]  ;;  %v1303_v48 = vld [vmem:[%s5051_s2 + $0x50] sm:$0xff]  ;;  %v1305_v1 = vld [vmem:[%s5051_s2 + $0x60] sm:$0xff] }
 0x1d7   : > { %2045 = vmatpush1.msra.mxu0 %v1576_v2  ;;  %1929 = vmatprep.subr.mxu1 %v1429_v3  ;;  %v1401_v49 = vld [vmem:[%s4333_s26 + $0x38] sm:$0xff]  ;;  %v1400_v55 = vld [vmem:[%s4333_s26 + $0x30] sm:$0xff]  ;;  %v4610_v58 = vmul.f32 %v4457_v21, %v1303_v48 }
 0x1d8   : > { %2046 = vmatprep.subr.mxu0 %v1573_v4  ;;  %1930 = vmatpush1.msra.mxu1 %v1428_v5  ;;  %v1545_v50 = vld [vmem:[%s4333_s26 + $0x4b8] sm:$0xff]  ;;  %v1544_v56 = vld [vmem:[%s4333_s26 + $0x4b0] sm:$0xff]  ;;  %v4636_v5 = vmul.f32 %v4485_v39, %v1306_v59  ;;  %v1318_v59 = vld [vmem:[%s5051_s2 + $0xc8] sm:$0xff] }
 0x1d9   : > { %2047 = vmatpush1.msra.mxu0 %v1572_v6  ;;  %1931 = vmatprep.subr.mxu1 %v1425_v7  ;;  %v1308_v60 = vld [vmem:[%s5051_s2 + $0x78] sm:$0xff]  ;;  %v1396_v63 = vld [vmem:[%s4333_s26 + $0x10] sm:$0xff] }
 0x1da   : > { %2048 = vmatprep.subr.mxu0 %v1569_v8  ;;  %1932 = vmatpush1.msra.mxu1 %v1424_v9  ;;  %v1397_v61 = vld [vmem:[%s4333_s26 + $0x18] sm:$0xff]  ;;  %v1540_v0 = vld [vmem:[%s4333_s26 + $0x490] sm:$0xff]  ;;  %v4639_v6 = vmul.f32 %v4449_v17, %v1308_v60  ;;  %v4644_v9 = vmul.f32 %v4494_v43, %v1305_v1  ;;  %v1317_v1 = vld [vmem:[%s5051_s2 + $0xc0] sm:$0xff] }
 0x1db   : > { %2049 = vmatpush1.msra.mxu0 %v1568_v10  ;;  %1933 = vmatprep.subr.mxu1 %v1421_v11  ;;  %v1541_v62 = vld [vmem:[%s4333_s26 + $0x498] sm:$0xff]  ;;  %v1307_v2 = vld [vmem:[%s5051_s2 + $0x70] sm:$0xff]  ;;  %v1310_v11 = vld [vmem:[%s5051_s2 + $0x88] sm:$0xff] }
 0x1dc   : > { %2050 = vmatprep.subr.mxu0 %v1565_v12  ;;  %1934 = vmatpush1.msra.mxu1 %v1420_v13  ;;  %v1521_v3 = vld [vmem:[%s4333_s26 + $0x3f8] sm:$0xff]  ;;  %v1520_v7 = vld [vmem:[%s4333_s26 + $0x3f0] sm:$0xff]  ;;  %v4647_v10 = vmul.f32 %v4457_v21, %v1307_v2 }
 0x1dd   : > { %2051 = vmatpush1.msra.mxu0 %v1564_v14  ;;  %1935 = vmatprep.subr.mxu1 %v1417_v15  ;;  %v1537_v4 = vld [vmem:[%s4333_s26 + $0x478] sm:$0xff]  ;;  %v1536_v8 = vld [vmem:[%s4333_s26 + $0x470] sm:$0xff] }
 0x1de   : > { %2052 = vmatprep.subr.mxu0 %v1561_v16  ;;  %1936 = vmatpush1.msra.mxu1 %v1416_v19  ;;  %v1312_v12 = vld [vmem:[%s5051_s2 + $0x98] sm:$0xff]  ;;  %v1516_v15 = vld [vmem:[%s4333_s26 + $0x3d0] sm:$0xff] }
 0x1df   : > { %2053 = vmatpush1.msra.mxu0 %v1560_v20  ;;  %1937 = vmatprep.subr.mxu1 %v1413_v23  ;;  %v1517_v13 = vld [vmem:[%s4333_s26 + $0x3d8] sm:$0xff]  ;;  %v1532_v16 = vld [vmem:[%s4333_s26 + $0x450] sm:$0xff]  ;;  %v4673_v23 = vmul.f32 %v4485_v39, %v1310_v11 }
 0x1e0   : > { %2054 = vmatprep.subr.mxu0 %v1557_v24  ;;  %1938 = vmatpush1.msra.mxu1 %v1412_v26  ;;  %v1533_v14 = vld [vmem:[%s4333_s26 + $0x458] sm:$0xff]  ;;  %v1311_v19 = vld [vmem:[%s5051_s2 + $0x90] sm:$0xff]  ;;  %v4676_v24 = vmul.f32 %v4449_v17, %v1312_v12 }
 0x1e1   : > { %2055 = vmatpush1.msra.mxu0 %v1556_v27  ;;  %1939 = vmatprep.subr.mxu1 %v1409_v30  ;;  %v1513_v20 = vld [vmem:[%s4333_s26 + $0x3b8] sm:$0xff]  ;;  %v1512_v25 = vld [vmem:[%s4333_s26 + $0x3b0] sm:$0xff]  ;;  %v4681_v27 = vmul.f32 %v4494_v43, %v1309_v18  ;;  %v4684_v28 = vmul.f32 %v4457_v21, %v1311_v19  ;;  %v1314_v30 = vld [vmem:[%s5051_s2 + $0xa8] sm:$0xff] }
 0x1e2   : > { %2056 = vmatprep.subr.mxu0 %v1553_v31  ;;  %1735 = vmatprep.mubr.f32.mxu0 %v4562_v33  ;;  %v1529_v22 = vld [vmem:[%s4333_s26 + $0x438] sm:$0xff]  ;;  %v1528_v26 = vld [vmem:[%s4333_s26 + $0x430] sm:$0xff]  ;;  %v4710_v47 = vmul.f32 %v4485_v39, %v1314_v30 }
 0x1e3   : > { %2409 = vmatprep.mubr.msk.f32.mxu1 %vm1634_vm0, %v4565_v34  ;;  %1940 = vmatpush1.msra.mxu1 %v1408_v35  ;;  %v1316_v31 = vld [vmem:[%s5051_s2 + $0xb8] sm:$0xff]  ;;  %v1508_v40 = vld [vmem:[%s4333_s26 + $0x390] sm:$0xff] }
 0x1e4   : > { %2057 = vmatpush1.msra.mxu0 %v1552_v36  ;;  %1861 = vmatmul.mubr.f32.gmra.mxu1 %v4573_v38  ;;  %v1509_v35 = vld [vmem:[%s4333_s26 + $0x398] sm:$0xff]  ;;  %v1524_v41 = vld [vmem:[%s4333_s26 + $0x410] sm:$0xff]  ;;  %v4713_v48 = vmul.f32 %v4449_v17, %v1316_v31 }
 0x1e5   : > { %1736 = vmatmul.mubr.f32.gmra.mxu0 %v4570_v37  ;;  %1941 = vmatprep.subr.mxu1 %v1405_v42  ;;  %v1525_v36 = vld [vmem:[%s4333_s26 + $0x418] sm:$0xff]  ;;  %v1313_v42 = vld [vmem:[%s5051_s2 + $0xa0] sm:$0xff]  ;;  %v1319_v2 = vld [vmem:[%s5051_s2 + $0xd0] sm:$0xff] }
 0x1e6   : > { %2058 = vmatprep.subr.mxu0 %v1549_v44  ;;  %1942 = vmatpush1.msra.mxu1 %v1404_v45  ;;  %v1315_v44 = vld [vmem:[%s5051_s2 + $0xb0] sm:$0xff]  ;;  %v1505_v45 = vld [vmem:[%s4333_s26 + $0x378] sm:$0xff] }
 0x1e7   : > { %2059 = vmatpush1.msra.mxu0 %v1548_v46  ;;  %1943 = vmatprep.subr.mxu1 %v1401_v49  ;;  %v1633_v46 = vld [vmem:[%s4333_s26 + $0x778] sm:$0xff]  ;;  %v1504_v49 = vld [vmem:[%s4333_s26 + $0x370] sm:$0xff] }
 0x1e8   : > { %2060 = vmatprep.subr.mxu0 %v1545_v50  ;;  %1741 = vmatprep.mubr.f32.mxu0 %v4599_v52  ;;  %v1632_v50 = vld [vmem:[%s4333_s26 + $0x770] sm:$0xff]  ;;  %v1320_v60 = vld [vmem:[%s5051_s2 + $0xd8] sm:$0xff] }
 0x1e9   : > { %2410 = vmatprep.mubr.msk.f32.mxu1 %vm1634_vm0, %v4602_v54  ;;  %1944 = vmatpush1.msra.mxu1 %v1400_v55  ;;  %v4718_v55 = vmul.f32 %v4494_v43, %v1313_v42  ;;  %v1496_v11 = vld [vmem:[%s4333_s26 + $0x330] sm:$0xff]  ;;  %v1493_v18 = vld [vmem:[%s4333_s26 + $0x318] sm:$0xff] }
 0x1ea   : > { %2061 = vmatpush1.msra.mxu0 %v1544_v56  ;;  %1867 = vmatmul.mubr.f32.gmra.mxu1 %v4610_v58  ;;  %v4721_v56 = vmul.f32 %v4457_v21, %v1315_v44  ;;  %v1624_v12 = vld [vmem:[%s4333_s26 + $0x730] sm:$0xff]  ;;  %v1621_v19 = vld [vmem:[%s4333_s26 + $0x718] sm:$0xff] }
 0x1eb   : > { %1742 = vmatmul.mubr.f32.gmra.mxu0 %v4607_v57  ;;  %1945 = vmatprep.subr.mxu1 %v1397_v61  ;;  %v1501_v61 = vld [vmem:[%s4333_s26 + $0x358] sm:$0xff] }
 0x1ec   : > { %2062 = vmatprep.subr.mxu0 %v1541_v62  ;;  %1946 = vmatpush1.msra.mxu1 %v1396_v63  ;;  %v1629_v62 = vld [vmem:[%s4333_s26 + $0x758] sm:$0xff]  ;;  %v1500_v63 = vld [vmem:[%s4333_s26 + $0x350] sm:$0xff] }
 0x1ed   : > { %2063 = vmatpush1.msra.mxu0 %v1540_v0  ;;  %1947 = vmatprep.subr.mxu1 %v1521_v3  ;;  %v1628_v0 = vld [vmem:[%s4333_s26 + $0x750] sm:$0xff]  ;;  %v1497_v3 = vld [vmem:[%s4333_s26 + $0x338] sm:$0xff] }
 0x1ee   : > { %2064 = vmatprep.subr.mxu0 %v1537_v4  ;;  %1747 = vmatprep.mubr.f32.mxu0 %v4636_v5  ;;  %v1625_v4 = vld [vmem:[%s4333_s26 + $0x738] sm:$0xff] }
 0x1ef   : > { %2411 = vmatprep.mubr.msk.f32.mxu1 %vm1634_vm0, %v4639_v6  ;;  %1948 = vmatpush2.msra.mxu1 %v1520_v7  ;;  %v4747_v7 = vmul.f32 %v4485_v39, %v1318_v59  ;;  %v1489_v30 = vld [vmem:[%s4333_s26 + $0x2f8] sm:$0xff]  ;;  %v1484_v59 = vld [vmem:[%s4333_s26 + $0x2d0] sm:$0xff] }
 0x1f0   : > { %2065 = vmatpush1.msra.mxu0 %v1536_v8  ;;  %1873 = vmatmul.mubr.f32.gmra.mxu1 %v4647_v10  ;;  %v4750_v8 = vmul.f32 %v4449_v17, %v1320_v60  ;;  %v1617_v31 = vld [vmem:[%s4333_s26 + $0x6f8] sm:$0xff]  ;;  %v1612_v60 = vld [vmem:[%s4333_s26 + $0x6d0] sm:$0xff] }
 0x1f1   : > { %1748 = vmatmul.mubr.f32.gmra.mxu0 %v4644_v9  ;;  %1949 = vmatprep.subr.mxu1 %v1517_v13  ;;  %v4755_v13 = vmul.f32 %v4494_v43, %v1317_v1 }
 0x1f2   : > { %2066 = vmatprep.subr.mxu0 %v1533_v14  ;;  %1950 = vmatpush2.msra.mxu1 %v1516_v15  ;;  %v4758_v14 = vmul.f32 %v4457_v21, %v1319_v2  ;;  %v1322_v15 = vld [vmem:[%s5051_s2 + $0xe8] sm:$0xff] }
 0x1f3   : > { %2067 = vmatpush1.msra.mxu0 %v1532_v16  ;;  %1951 = vmatprep.subr.mxu1 %v1513_v20  ;;  %v1324_v16 = vld [vmem:[%s5051_s2 + $0xf8] sm:$0xff]  ;;  %v1492_v20 = vld [vmem:[%s4333_s26 + $0x310] sm:$0xff] }
 0x1f4   : > { %2068 = vmatprep.subr.mxu0 %v1529_v22  ;;  %1753 = vmatprep.mubr.f32.mxu0 %v4673_v23  ;;  %v1620_v22 = vld [vmem:[%s4333_s26 + $0x710] sm:$0xff] }
 0x1f5   : > { %2412 = vmatprep.mubr.msk.f32.mxu1 %vm1634_vm0, %v4676_v24  ;;  %1952 = vmatpush2.msra.mxu1 %v1512_v25  ;;  %v1321_v25 = vld [vmem:[%s5051_s2 + $0xe0] sm:$0xff] }
 0x1f6   : > { %2069 = vmatpush1.msra.mxu0 %v1528_v26  ;;  %1879 = vmatmul.mubr.f32.gmra.mxu1 %v4684_v28  ;;  %v1323_v26 = vld [vmem:[%s5051_s2 + $0xf0] sm:$0xff]  ;;  %v4792_v42 = vmul.f32 %v4494_v43, %v1321_v25  ;;  %v1329_v25 = vld [vmem:[%s5051_s2 + $0x120] sm:$0xff] }
 0x1f7   : > { %1754 = vmatmul.mubr.f32.gmra.mxu0 %v4681_v27  ;;  %1953 = vmatprep.subr.mxu1 %v1509_v35  ;;  %v4784_v35 = vmul.f32 %v4485_v39, %v1322_v15  ;;  %v4795_v44 = vmul.f32 %v4457_v21, %v1323_v26  ;;  %v1330_v15 = vld [vmem:[%s5051_s2 + $0x128] sm:$0xff]  ;;  %v1331_v26 = vld [vmem:[%s5051_s2 + $0x130] sm:$0xff] }
 0x1f8   : > { %2070 = vmatprep.subr.mxu0 %v1525_v36  ;;  %1954 = vmatpush2.msra.mxu1 %v1508_v40  ;;  %v4787_v36 = vmul.f32 %v4449_v17, %v1324_v16  ;;  %v1488_v40 = vld [vmem:[%s4333_s26 + $0x2f0] sm:$0xff]  ;;  %v1332_v16 = vld [vmem:[%s5051_s2 + $0x138] sm:$0xff] }
 0x1f9   : > { %2071 = vmatpush1.msra.mxu0 %v1524_v41  ;;  %1955 = vmatprep.subr.mxu1 %v1505_v45  ;;  %v1616_v41 = vld [vmem:[%s4333_s26 + $0x6f0] sm:$0xff]  ;;  %v1326_v45 = vld [vmem:[%s5051_s2 + $0x108] sm:$0xff] }
 0x1fa   : > { %2080 = vmatprep.subr.mxu0 %v1633_v46  ;;  %1759 = vmatprep.mubr.f32.mxu0 %v4710_v47  ;;  %v1328_v46 = vld [vmem:[%s5051_s2 + $0x118] sm:$0xff]  ;;  %v4821_v1 = vmul.f32 %v4485_v39, %v1326_v45  ;;  %v1472_v45 = vld [vmem:[%s4333_s26 + $0x270] sm:$0xff] }
 0x1fb   : > { %2413 = vmatprep.mubr.msk.f32.mxu1 %vm1634_vm0, %v4713_v48  ;;  %1956 = vmatpush2.msra.mxu1 %v1504_v49  ;;  %v1485_v49 = vld [vmem:[%s4333_s26 + $0x2d8] sm:$0xff]  ;;  %v4824_v2 = vmul.f32 %v4449_v17, %v1328_v46  ;;  %v1600_v46 = vld [vmem:[%s4333_s26 + $0x670] sm:$0xff] }
 0x1fc   : > { %2081 = vmatpush2.msra.mxu0 %v1632_v50  ;;  %1885 = vmatmul.mubr.f32.gmra.mxu1 %v4721_v56  ;;  %v1613_v50 = vld [vmem:[%s4333_s26 + $0x6d8] sm:$0xff] }
 0x1fd   : > { %1760 = vmatmul.mubr.f32.gmra.mxu0 %v4718_v55  ;;  %1957 = vmatprep.subr.mxu1 %v1501_v61  ;;  %v1325_v61 = vld [vmem:[%s5051_s2 + $0x100] sm:$0xff] }
 0x1fe   : > { %2082 = vmatprep.subr.mxu0 %v1629_v62  ;;  %1958 = vmatpush2.msra.mxu1 %v1500_v63  ;;  %v1327_v62 = vld [vmem:[%s5051_s2 + $0x110] sm:$0xff]  ;;  %v1481_v63 = vld [vmem:[%s4333_s26 + $0x2b8] sm:$0xff] }
 0x1ff   : > { %2083 = vmatpush2.msra.mxu0 %v1628_v0  ;;  %1959 = vmatprep.subr.mxu1 %v1497_v3  ;;  %v1609_v0 = vld [vmem:[%s4333_s26 + $0x6b8] sm:$0xff]  ;;  %v1480_v3 = vld [vmem:[%s4333_s26 + $0x2b0] sm:$0xff] }
 0x200   : > { %2084 = vmatprep.subr.mxu0 %v1625_v4  ;;  %1765 = vmatprep.mubr.f32.mxu0 %v4747_v7  ;;  %v1608_v4 = vld [vmem:[%s4333_s26 + $0x6b0] sm:$0xff] }
 0x201   : > { %2414 = vmatprep.mubr.msk.f32.mxu1 %vm1634_vm0, %v4750_v8  ;;  %1960 = vmatpush2.msra.mxu1 %v1496_v11  ;;  %v4829_v11 = vmul.f32 %v4494_v43, %v1325_v61  ;;  %v1464_v61 = vld [vmem:[%s4333_s26 + $0x230] sm:$0xff] }
 0x202   : > { %2085 = vmatpush2.msra.mxu0 %v1624_v12  ;;  %1891 = vmatmul.mubr.f32.gmra.mxu1 %v4758_v14  ;;  %v4832_v12 = vmul.f32 %v4457_v21, %v1327_v62  ;;  %v1592_v62 = vld [vmem:[%s4333_s26 + $0x630] sm:$0xff] }
 0x203   : > { %1766 = vmatmul.mubr.f32.gmra.mxu0 %v4755_v13  ;;  %1961 = vmatprep.subr.mxu1 %v1493_v18  ;;  %v1477_v18 = vld [vmem:[%s4333_s26 + $0x298] sm:$0xff] }
 0x204   : > { %2086 = vmatprep.subr.mxu0 %v1621_v19  ;;  %1962 = vmatpush2.msra.mxu1 %v1492_v20  ;;  %v1605_v19 = vld [vmem:[%s4333_s26 + $0x698] sm:$0xff]  ;;  %v1476_v20 = vld [vmem:[%s4333_s26 + $0x290] sm:$0xff] }
 0x205   : > { %2087 = vmatpush2.msra.mxu0 %v1620_v22  ;;  %1963 = vmatprep.subr.mxu1 %v1489_v30  ;;  %v1604_v22 = vld [vmem:[%s4333_s26 + $0x690] sm:$0xff]  ;;  %v1473_v30 = vld [vmem:[%s4333_s26 + $0x278] sm:$0xff] }
 0x206   : > { %2088 = vmatprep.subr.mxu0 %v1617_v31  ;;  %1771 = vmatprep.mubr.f32.mxu0 %v4784_v35  ;;  %v1601_v31 = vld [vmem:[%s4333_s26 + $0x678] sm:$0xff] }
 0x207   : > { %2415 = vmatprep.mubr.msk.f32.mxu1 %vm1634_vm0, %v4787_v36  ;;  %1964 = vmatpush2.msra.mxu1 %v1488_v40  ;;  %v4858_v40 = vmul.f32 %v4485_v39, %v1330_v15  ;;  %v1597_v39 = vld [vmem:[%s4333_s26 + $0x658] sm:$0xff] }
 0x208   : > { %2089 = vmatpush2.msra.mxu0 %v1616_v41  ;;  %1897 = vmatmul.mubr.f32.gmra.mxu1 %v4795_v44  ;;  %v4861_v41 = vmul.f32 %v4449_v17, %v1332_v16  ;;  %v1469_v17 = vld [vmem:[%s4333_s26 + $0x258] sm:$0xff] }
 0x209   : > { %1772 = vmatmul.mubr.f32.gmra.mxu0 %v4792_v42  ;;  %1965 = vmatprep.subr.mxu1 %v1485_v49  ;;  %v4866_v49 = vmul.f32 %v4494_v43, %v1329_v25  ;;  %v1468_v43 = vld [vmem:[%s4333_s26 + $0x250] sm:$0xff] }
 0x20a   : > { %2090 = vmatprep.subr.mxu0 %v1613_v50  ;;  %1966 = vmatpush2.msra.mxu1 %v1484_v59  ;;  %v4869_v50 = vmul.f32 %v4457_v21, %v1331_v26  ;;  %v1596_v59 = vld [vmem:[%s4333_s26 + $0x650] sm:$0xff]  ;;  %v1465_v21 = vld [vmem:[%s4333_s26 + $0x238] sm:$0xff] }
 0x20b   : > { %2091 = vmatpush2.msra.mxu0 %v1612_v60  ;;  %1967 = vmatprep.subr.mxu1 %v1481_v63  ;;  %v1593_v60 = vld [vmem:[%s4333_s26 + $0x638] sm:$0xff] }
 0x20c   : > { %2092 = vmatprep.subr.mxu0 %v1609_v0  ;;  %1777 = vmatprep.mubr.f32.mxu0 %v4821_v1  ;;  %v1461_v63 = vld [vmem:[%s4333_s26 + $0x218] sm:$0xff] }
 0x20d   : > { %2416 = vmatprep.mubr.msk.f32.mxu1 %vm1634_vm0, %v4824_v2  ;;  %1968 = vmatpush2.msra.mxu1 %v1480_v3  ;;  %v1589_v0 = vld [vmem:[%s4333_s26 + $0x618] sm:$0xff]  ;;  %v1460_v3 = vld [vmem:[%s4333_s26 + $0x210] sm:$0xff] }
 0x20e   : > { %2093 = vmatpush2.msra.mxu0 %v1608_v4  ;;  %1903 = vmatmul.mubr.f32.gmra.mxu1 %v4832_v12  ;;  %v1588_v4 = vld [vmem:[%s4333_s26 + $0x610] sm:$0xff]  ;;  %s2444_s26 = smul.u32 320, %s4330_s6 }
 0x20f   : > { %1778 = vmatmul.mubr.f32.gmra.mxu0 %v4829_v11  ;;  %1969 = vmatprep.subr.mxu1 %v1477_v18 }
 0x210   : > { %2094 = vmatprep.subr.mxu0 %v1605_v19  ;;  %1970 = vmatpush2.msra.mxu1 %v1476_v20  ;;  %s4939_s8 = scalar_lea.vmem [#allocation3], %s2444_s26 }
 0x211   : > { %2095 = vmatpush2.msra.mxu0 %v1604_v22  ;;  %1971 = vmatprep.subr.mxu1 %v1473_v30 }
 0x212   : > { %2096 = vmatprep.subr.mxu0 %v1601_v31  ;;  %1783 = vmatprep.mubr.f32.mxu0 %v4858_v40 }
 0x213   : > { %2417 = vmatprep.mubr.msk.f32.mxu1 %vm1634_vm0, %v4861_v41  ;;  %1972 = vmatpush2.msra.mxu1 %v1472_v45 }
 0x214   : > { %2097 = vmatpush2.msra.mxu0 %v1600_v46  ;;  %1909 = vmatmul.mubr.f32.gmra.mxu1 %v4869_v50 }
 0x215   : > { %1784 = vmatmul.mubr.f32.gmra.mxu0 %v4866_v49  ;;  %1973 = vmatprep.subr.mxu1 %v1469_v17 }
 0x216   : > { %2098 = vmatprep.subr.mxu0 %v1597_v39  ;;  %1974 = vmatpush2.msra.mxu1 %v1468_v43 }
 0x217   : > { %2099 = vmatpush2.msra.mxu0 %v1596_v59  ;;  %1975 = vmatprep.subr.mxu1 %v1465_v21 }
 0x218   : > { %2100 = vmatprep.subr.mxu0 %v1593_v60  ;;  %1976 = vmatpush2.msra.mxu1 %v1464_v61 }
 0x219   : > { %2101 = vmatpush2.msra.mxu0 %v1592_v62  ;;  %1977 = vmatprep.subr.mxu1 %v1461_v63 }
 0x21a   : > { %2102 = vmatprep.subr.mxu0 %v1589_v0  ;;  %1978 = vmatpush2.msra.mxu1 %v1460_v3 }
 0x21b   : > { %1979 = vmatprep.mubr.f32.mxu1 %v4506_v51  ;;  %2103 = vmatpush2.msra.mxu0 %v1588_v4 }
 0x21c   : > { %2418 = vmatprep.mubr.msk.f32.mxu0 %vm1634_vm0, %v4469_v29  ;;  %1980 = vmatmul.mubr.f32.vlgmr.msra.gmra.mxu1 %v4510_v53 }
 0x21d   : > { %2105 = vmatmul.mubr.f32.vlgmr.msra.gmra.mxu0 %v4474_v32  ;;  %1985 = vmatprep.mubr.f32.mxu1 %v4562_v33 }
 0x21e   : > { %2419 = vmatprep.mubr.msk.f32.mxu0 %vm1634_vm0, %v4565_v34 }
 0x220   : > { %1986 = vmatmul.mubr.f32.gmra.mxu1 %v4570_v37 }
 0x221   : > { %2111 = vmatmul.mubr.f32.gmra.mxu0 %v4573_v38  ;;  %1991 = vmatprep.mubr.f32.mxu1 %v4599_v52 }
 0x222   : > { %2420 = vmatprep.mubr.msk.f32.mxu0 %vm1634_vm0, %v4602_v54 }
 0x224   : > { %1992 = vmatmul.mubr.f32.gmra.mxu1 %v4607_v57 }
 0x225   : > { %2117 = vmatmul.mubr.f32.gmra.mxu0 %v4610_v58  ;;  %1997 = vmatprep.mubr.f32.mxu1 %v4636_v5 }
 0x226   : > { %2421 = vmatprep.mubr.msk.f32.mxu0 %vm1634_vm0, %v4639_v6 }
 0x228   : > { %1998 = vmatmul.mubr.f32.gmra.mxu1 %v4644_v9 }
 0x229   : > { %2123 = vmatmul.mubr.f32.gmra.mxu0 %v4647_v10  ;;  %2003 = vmatprep.mubr.f32.mxu1 %v4673_v23 }
 0x22a   : > { %2422 = vmatprep.mubr.msk.f32.mxu0 %vm1634_vm0, %v4676_v24 }
 0x22c   : > { %2004 = vmatmul.mubr.f32.gmra.mxu1 %v4681_v27 }
 0x22d   : > { %2129 = vmatmul.mubr.f32.gmra.mxu0 %v4684_v28  ;;  %2009 = vmatprep.mubr.f32.mxu1 %v4710_v47 }
 0x22e   : > { %2423 = vmatprep.mubr.msk.f32.mxu0 %vm1634_vm0, %v4713_v48 }
 0x230   : > { %2010 = vmatmul.mubr.f32.gmra.mxu1 %v4718_v55 }
 0x231   : > { %2135 = vmatmul.mubr.f32.gmra.mxu0 %v4721_v56  ;;  %2015 = vmatprep.mubr.f32.mxu1 %v4747_v7 }
 0x232   : > { %2424 = vmatprep.mubr.msk.f32.mxu0 %vm1634_vm0, %v4750_v8 }
 0x234   : > { %2016 = vmatmul.mubr.f32.gmra.mxu1 %v4755_v13 }
 0x235   : > { %2141 = vmatmul.mubr.f32.gmra.mxu0 %v4758_v14  ;;  %2021 = vmatprep.mubr.f32.mxu1 %v4784_v35 }
 0x236   : > { %2425 = vmatprep.mubr.msk.f32.mxu0 %vm1634_vm0, %v4787_v36 }
 0x238   : > { %2022 = vmatmul.mubr.f32.gmra.mxu1 %v4792_v42 }
 0x239   : > { %2147 = vmatmul.mubr.f32.gmra.mxu0 %v4795_v44  ;;  %2027 = vmatprep.mubr.f32.mxu1 %v4821_v1 }
 0x23a   : > { %2426 = vmatprep.mubr.msk.f32.mxu0 %vm1634_vm0, %v4824_v2 }
 0x23c   : > { %2028 = vmatmul.mubr.f32.gmra.mxu1 %v4829_v11 }
 0x23d   : > { %2153 = vmatmul.mubr.f32.gmra.mxu0 %v4832_v12  ;;  %2033 = vmatprep.mubr.f32.mxu1 %v4858_v40 }
 0x23e   : > { %2427 = vmatprep.mubr.msk.f32.mxu0 %vm1634_vm0, %v4861_v41 }
 0x240   : > { %2034 = vmatmul.mubr.f32.gmra.mxu1 %v4866_v49 }
 0x241   : > { %2159 = vmatmul.mubr.f32.gmra.mxu0 %v4869_v50 }
 0x288   : > { %v1856_v29 = vpop.f32.mrf.mxu1 }
 0x28a   : > { %v1858_v53 = vpop.f32.mrf.mxu1 }
 0x291   : > { %v1731_v32 = vpop.f32.mrf.mxu0 }
 0x292   : > { %v1857_v51 = vadd.f32 %v1856_v29, %v1731_v32 }
 0x293   : > { %v1733_v33 = vpop.f32.mrf.mxu0 }
 0x294   : > { %2165 = vst [vmem:[%s4939_s8] sm:$0xff] %v1857_v51  ;;  %v1859_v34 = vadd.f32 %v1858_v53, %v1733_v33 }
 0x296   : > { %2166 = vst [vmem:[%s4939_s8 + $0x8] sm:$0xff] %v1859_v34 }
 0x2a4   : > { %v1862_v38 = vpop.f32.mrf.mxu1 }
 0x2a5   : > { %v1737_v37 = vpop.f32.mrf.mxu0 }
 0x2a6   : > { %v1863_v52 = vadd.f32 %v1862_v38, %v1737_v37  ;;  %v1864_v57 = vpop.f32.mrf.mxu1 }
 0x2a7   : > { %v1739_v54 = vpop.f32.mrf.mxu0 }
 0x2a8   : > { %2169 = vst [vmem:[%s4939_s8 + $0x20] sm:$0xff] %v1863_v52  ;;  %v1865_v58 = vadd.f32 %v1864_v57, %v1739_v54 }
 0x2aa   : > { %2170 = vst [vmem:[%s4939_s8 + $0x28] sm:$0xff] %v1865_v58  ;;  %v1868_v6 = vpop.f32.mrf.mxu1 }
 0x2ab   : > { %v1743_v5 = vpop.f32.mrf.mxu0 }
 0x2ac   : > { %v1869_v9 = vadd.f32 %v1868_v6, %v1743_v5  ;;  %v1870_v23 = vpop.f32.mrf.mxu1 }
 0x2ad   : > { %v1745_v10 = vpop.f32.mrf.mxu0 }
 0x2ae   : > { %2173 = vst [vmem:[%s4939_s8 + $0x40] sm:$0xff] %v1869_v9  ;;  %v1871_v24 = vadd.f32 %v1870_v23, %v1745_v10 }
 0x2b0   : > { %2174 = vst [vmem:[%s4939_s8 + $0x48] sm:$0xff] %v1871_v24  ;;  %v1874_v28 = vpop.f32.mrf.mxu1 }
 0x2b1   : > { %v1749_v27 = vpop.f32.mrf.mxu0 }
 0x2b2   : > { %v1875_v47 = vadd.f32 %v1874_v28, %v1749_v27  ;;  %v1876_v55 = vpop.f32.mrf.mxu1 }
 0x2b3   : > { %v1751_v48 = vpop.f32.mrf.mxu0 }
 0x2b4   : > { %2177 = vst [vmem:[%s4939_s8 + $0x60] sm:$0xff] %v1875_v47  ;;  %v1877_v56 = vadd.f32 %v1876_v55, %v1751_v48 }
 0x2b6   : > { %2178 = vst [vmem:[%s4939_s8 + $0x68] sm:$0xff] %v1877_v56  ;;  %v1880_v8 = vpop.f32.mrf.mxu1 }
 0x2b7   : > { %v1755_v7 = vpop.f32.mrf.mxu0 }
 0x2b8   : > { %v1881_v13 = vadd.f32 %v1880_v8, %v1755_v7  ;;  %v1882_v35 = vpop.f32.mrf.mxu1 }
 0x2b9   : > { %v1757_v14 = vpop.f32.mrf.mxu0 }
 0x2ba   : > { %2181 = vst [vmem:[%s4939_s8 + $0x80] sm:$0xff] %v1881_v13  ;;  %v1883_v36 = vadd.f32 %v1882_v35, %v1757_v14 }
 0x2bc   : > { %2182 = vst [vmem:[%s4939_s8 + $0x88] sm:$0xff] %v1883_v36  ;;  %v1886_v44 = vpop.f32.mrf.mxu1 }
 0x2bd   : > { %v1761_v42 = vpop.f32.mrf.mxu0 }
 0x2be   : > { %v1887_v1 = vadd.f32 %v1886_v44, %v1761_v42  ;;  %v1888_v11 = vpop.f32.mrf.mxu1 }
 0x2bf   : > { %v1763_v2 = vpop.f32.mrf.mxu0 }
 0x2c0   : > { %2185 = vst [vmem:[%s4939_s8 + $0xa0] sm:$0xff] %v1887_v1  ;;  %v1889_v12 = vadd.f32 %v1888_v11, %v1763_v2 }
 0x2c2   : > { %2186 = vst [vmem:[%s4939_s8 + $0xa8] sm:$0xff] %v1889_v12  ;;  %v1892_v16 = vpop.f32.mrf.mxu1 }
 0x2c3   : > { %v1767_v15 = vpop.f32.mrf.mxu0 }
 0x2c4   : > { %v1893_v18 = vadd.f32 %v1892_v16, %v1767_v15  ;;  %v1894_v20 = vpop.f32.mrf.mxu1 }
 0x2c5   : > { %v1769_v19 = vpop.f32.mrf.mxu0 }
 0x2c6   : > { %2189 = vst [vmem:[%s4939_s8 + $0xc0] sm:$0xff] %v1893_v18  ;;  %v1895_v22 = vadd.f32 %v1894_v20, %v1769_v19 }
 0x2c8   : > { %2190 = vst [vmem:[%s4939_s8 + $0xc8] sm:$0xff] %v1895_v22  ;;  %v1898_v26 = vpop.f32.mrf.mxu1 }
 0x2c9   : > { %v1773_v25 = vpop.f32.mrf.mxu0 }
 0x2ca   : > { %v1899_v30 = vadd.f32 %v1898_v26, %v1773_v25  ;;  %v1900_v40 = vpop.f32.mrf.mxu1 }
 0x2cb   : > { %v1775_v31 = vpop.f32.mrf.mxu0 }
 0x2cc   : > { %2193 = vst [vmem:[%s4939_s8 + $0xe0] sm:$0xff] %v1899_v30  ;;  %v1901_v41 = vadd.f32 %v1900_v40, %v1775_v31 }
 0x2ce   : > { %2194 = vst [vmem:[%s4939_s8 + $0xe8] sm:$0xff] %v1901_v41  ;;  %v1904_v46 = vpop.f32.mrf.mxu1 }
 0x2cf   : > { %v1779_v45 = vpop.f32.mrf.mxu0 }
 0x2d0   : > { %v1905_v49 = vadd.f32 %v1904_v46, %v1779_v45  ;;  %v1906_v17 = vpop.f32.mrf.mxu1 }
 0x2d1   : > { %v1781_v50 = vpop.f32.mrf.mxu0 }
 0x2d2   : > { %2197 = vst [vmem:[%s4939_s8 + $0x100] sm:$0xff] %v1905_v49  ;;  %v1907_v39 = vadd.f32 %v1906_v17, %v1781_v50 }
 0x2d4   : > { %2198 = vst [vmem:[%s4939_s8 + $0x108] sm:$0xff] %v1907_v39  ;;  %v1910_v59 = vpop.f32.mrf.mxu1 }
 0x2d5   : > { %v1785_v43 = vpop.f32.mrf.mxu0 }
 0x2d6   : > { %v1911_v21 = vadd.f32 %v1910_v59, %v1785_v43  ;;  %v1912_v61 = vpop.f32.mrf.mxu1 }
 0x2d7   : > { %v1787_v60 = vpop.f32.mrf.mxu0 }
 0x2d8   : > { %2201 = vst [vmem:[%s4939_s8 + $0x120] sm:$0xff] %v1911_v21  ;;  %v1913_v62 = vadd.f32 %v1912_v61, %v1787_v60 }
 0x2da   : > { %2202 = vst [vmem:[%s4939_s8 + $0x128] sm:$0xff] %v1913_v62 }
 0x2dc   : > { %v1981_v63 = vpop.f32.mrf.mxu1 }
 0x2dd   : > { %v2106_v0 = vpop.f32.mrf.mxu0 }
 0x2de   : > { %v2107_v3 = vadd.f32 %v2106_v0, %v1981_v63  ;;  %v1983_v4 = vpop.f32.mrf.mxu1 }
 0x2df   : > { %v2108_v29 = vpop.f32.mrf.mxu0 }
 0x2e0   : > { %2167 = vst [vmem:[%s4939_s8 + $0x10] sm:$0xff] %v2107_v3  ;;  %v2109_v32 = vadd.f32 %v2108_v29, %v1983_v4  ;;  %v1987_v51 = vpop.f32.mrf.mxu1 }
 0x2e1   : > { %v2112_v53 = vpop.f32.mrf.mxu0 }
 0x2e2   : > { %2168 = vst [vmem:[%s4939_s8 + $0x18] sm:$0xff] %v2109_v32  ;;  %v2113_v33 = vadd.f32 %v2112_v53, %v1987_v51  ;;  %v1989_v34 = vpop.f32.mrf.mxu1 }
 0x2e3   : > { %v2114_v37 = vpop.f32.mrf.mxu0 }
 0x2e4   : > { %2171 = vst [vmem:[%s4939_s8 + $0x30] sm:$0xff] %v2113_v33  ;;  %v2115_v38 = vadd.f32 %v2114_v37, %v1989_v34  ;;  %v1993_v52 = vpop.f32.mrf.mxu1 }
 0x2e5   : > { %v2118_v54 = vpop.f32.mrf.mxu0 }
 0x2e6   : > { %2172 = vst [vmem:[%s4939_s8 + $0x38] sm:$0xff] %v2115_v38  ;;  %v2119_v57 = vadd.f32 %v2118_v54, %v1993_v52  ;;  %v1995_v58 = vpop.f32.mrf.mxu1 }
 0x2e7   : > { %v2120_v5 = vpop.f32.mrf.mxu0 }
 0x2e8   : > { %2175 = vst [vmem:[%s4939_s8 + $0x50] sm:$0xff] %v2119_v57  ;;  %v2121_v6 = vadd.f32 %v2120_v5, %v1995_v58  ;;  %v1999_v9 = vpop.f32.mrf.mxu1 }
 0x2e9   : > { %v2124_v10 = vpop.f32.mrf.mxu0 }
 0x2ea   : > { %2176 = vst [vmem:[%s4939_s8 + $0x58] sm:$0xff] %v2121_v6  ;;  %v2125_v23 = vadd.f32 %v2124_v10, %v1999_v9  ;;  %v2001_v24 = vpop.f32.mrf.mxu1 }
 0x2eb   : > { %v2126_v27 = vpop.f32.mrf.mxu0 }
 0x2ec   : > { %2179 = vst [vmem:[%s4939_s8 + $0x70] sm:$0xff] %v2125_v23  ;;  %v2127_v28 = vadd.f32 %v2126_v27, %v2001_v24  ;;  %v2005_v47 = vpop.f32.mrf.mxu1 }
 0x2ed   : > { %v2130_v48 = vpop.f32.mrf.mxu0 }
 0x2ee   : > { %2180 = vst [vmem:[%s4939_s8 + $0x78] sm:$0xff] %v2127_v28  ;;  %v2131_v55 = vadd.f32 %v2130_v48, %v2005_v47  ;;  %v2007_v56 = vpop.f32.mrf.mxu1 }
 0x2ef   : > { %v2132_v7 = vpop.f32.mrf.mxu0 }
 0x2f0   : > { %2183 = vst [vmem:[%s4939_s8 + $0x90] sm:$0xff] %v2131_v55  ;;  %v2133_v8 = vadd.f32 %v2132_v7, %v2007_v56  ;;  %v2011_v13 = vpop.f32.mrf.mxu1 }
 0x2f1   : > { %v2136_v14 = vpop.f32.mrf.mxu0 }
 0x2f2   : > { %2184 = vst [vmem:[%s4939_s8 + $0x98] sm:$0xff] %v2133_v8  ;;  %v2137_v35 = vadd.f32 %v2136_v14, %v2011_v13  ;;  %v2013_v36 = vpop.f32.mrf.mxu1 }
 0x2f3   : > { %v2138_v42 = vpop.f32.mrf.mxu0 }
 0x2f4   : > { %2187 = vst [vmem:[%s4939_s8 + $0xb0] sm:$0xff] %v2137_v35  ;;  %v2139_v44 = vadd.f32 %v2138_v42, %v2013_v36  ;;  %v2017_v1 = vpop.f32.mrf.mxu1 }
 0x2f5   : > { %v2142_v2 = vpop.f32.mrf.mxu0 }
 0x2f6   : > { %2188 = vst [vmem:[%s4939_s8 + $0xb8] sm:$0xff] %v2139_v44  ;;  %v2143_v11 = vadd.f32 %v2142_v2, %v2017_v1  ;;  %v2019_v12 = vpop.f32.mrf.mxu1 }
 0x2f7   : > { %v2144_v15 = vpop.f32.mrf.mxu0 }
 0x2f8   : > { %2191 = vst [vmem:[%s4939_s8 + $0xd0] sm:$0xff] %v2143_v11  ;;  %v2145_v16 = vadd.f32 %v2144_v15, %v2019_v12  ;;  %v2023_v18 = vpop.f32.mrf.mxu1 }
 0x2f9   : > { %v2148_v19 = vpop.f32.mrf.mxu0 }
 0x2fa   : > { %2192 = vst [vmem:[%s4939_s8 + $0xd8] sm:$0xff] %v2145_v16  ;;  %v2149_v20 = vadd.f32 %v2148_v19, %v2023_v18  ;;  %v2025_v22 = vpop.f32.mrf.mxu1 }
 0x2fb   : > { %v2150_v25 = vpop.f32.mrf.mxu0 }
 0x2fc   : > { %2195 = vst [vmem:[%s4939_s8 + $0xf0] sm:$0xff] %v2149_v20  ;;  %v2151_v26 = vadd.f32 %v2150_v25, %v2025_v22  ;;  %v2029_v30 = vpop.f32.mrf.mxu1 }
 0x2fd   : > { %v2154_v31 = vpop.f32.mrf.mxu0 }
 0x2fe   : > { %2196 = vst [vmem:[%s4939_s8 + $0xf8] sm:$0xff] %v2151_v26  ;;  %v2155_v40 = vadd.f32 %v2154_v31, %v2029_v30  ;;  %v2031_v41 = vpop.f32.mrf.mxu1 }
 0x2ff   : > { %v2156_v45 = vpop.f32.mrf.mxu0 }
 0x300   : > { %2199 = vst [vmem:[%s4939_s8 + $0x110] sm:$0xff] %v2155_v40  ;;  %v2157_v46 = vadd.f32 %v2156_v45, %v2031_v41  ;;  %v2035_v49 = vpop.f32.mrf.mxu1 }
 0x301   : > { %v2160_v50 = vpop.f32.mrf.mxu0 }
 0x302   : > { %2200 = vst [vmem:[%s4939_s8 + $0x118] sm:$0xff] %v2157_v46  ;;  %v2161_v17 = vadd.f32 %v2160_v50, %v2035_v49  ;;  %v2037_v39 = vpop.f32.mrf.mxu1  ;;  %2212 = sbr.rel (!%p2873_p6) target bundleno = 804 (0x324), region = 102 }
 0x303   : > { %v2162_v43 = vpop.f32.mrf.mxu0 }
 0x304   : > { %2203 = vst [vmem:[%s4939_s8 + $0x130] sm:$0xff] %v2161_v17  ;;  %v2163_v59 = vadd.f32 %v2162_v43, %v2037_v39 }
 0x306   : > { %2204 = vst [vmem:[%s4939_s8 + $0x138] sm:$0xff] %v2163_v59 }
 0x307   : > { %s5092_s4 = smov (!%p2215_p7, %s2214_s4), 4 }
 0x308   : > { %s4988_s7 = smul.u32 1280, %s5092_s4 }
 0x30a   : > { %s2219_s24 = ssub.s32 5120, %s4988_s7 }
 0x30b   : > { %2220 = vsyncadd %s2206_s30, %s2219_s24  ;;  %p2429_p6 = scmp.ne.s32.totalorder %s4988_s7, 0  ;;  %s2441_s22 = sshll.u32 %s2855_s16, 9 }
 0x30c   : > { %s4998_s25 = scalar_lea.hbm %s5052_s3, %s2441_s22  ;;  %s2431_s29 = sshll.u32 %s5092_s4, 3 }
 0x30d   : > { %s2226_s20 = sshll.u32 %s4939_s8, 4  ;;  %s2811_s9 = smov [#allocation3]   ;;  %s5002_s20 = int_to_ptr.vmem [resolvable:$true] %s2226_s20 }
 0x30e   : > { %s2619_s17 = scalar_lea.vmem %s5002_s20, %s4988_s7  ;;  %s2623_s27 = sshll.u32 %s2811_s9, 4  ;;  %s2624_s27 = int_to_ptr.vmem [resolvable:$false] %s2623_s27 }
 0x30f   : > { %p2620_p10 = scmp.ne.s32.totalorder %s5002_s20, %s2619_s17  ;;  %s2625_s16 = scalar_lea.vmem %s2624_s27, 10240 }
 0x310   : > { %p2626_p13 = scmp.lt.s32.totalorder %s5002_s20, %s2624_s27  ;;  %p2627_p0 = scmp.lt.s32.totalorder %s2625_s16, %s2619_s17 }
 0x311   : > { %p2621_p11 = pnand %p2620_p10, %p2429_p6 }
 0x312   : > { %p2628_p1 = por %p2627_p0, %p2626_p13 }
 0x313   : > { %p2622_p12 = pneg %p2621_p11 }
 0x315   : > { %p2629_p2 = pnand %p2628_p1, %p2622_p12 }
 0x317   : > { %2632 = shalt.err (!%p2629_p2)
}
 0x318   : > { %s2633_s19 = scalar_lea.hbm %s4998_s25, %s4988_s7  ;;  %s2637_s26 = scalar_lea.hbm %s5052_s3, 8960 }
 0x319   : > { %p2634_p3 = scmp.ne.s32.totalorder %s4998_s25, %s2633_s19  ;;  %p2638_p7 = scmp.lt.s32.totalorder %s4998_s25, %s5052_s3 }
 0x31a   : > { %p2639_p10 = scmp.lt.s32.totalorder %s2637_s26, %s2633_s19 }
 0x31b   : > { %p2635_p4 = pnand %p2634_p3, %p2429_p6 }
 0x31c   : > { %p2640_p11 = por %p2639_p10, %p2638_p7 }
 0x31d   : > { %p2636_p5 = pneg %p2635_p4 }
 0x31f   : > { %p2641_p12 = pnand %p2640_p11, %p2636_p5 }
 0x321   : > { %2644 = shalt.err (!%p2641_p12)
}
 0x322   : > { %s2812_s24 = smov 512   ;;  %s2813_s22 = smov 896  }
 0x323   : > { %2232 = dma.vmem_to_hbm [thread:$0]  (%p2429_p6), %s5002_s20, %s4988_s7, %s4998_s25, %s2206_s30, %s2812_s24, %s2813_s22, %s2431_s29  }
 0x324 PF: > { %s2241_s28 = sand.u32 1, %s2731_s12   ;;  %p2447_p13 = pnand %p2378_p9, %p2877_p8 }
 0x325   : > { %s2242_s5 = scalar_lea.sflag [#allocation4], %s2241_s28 }
 0x326   : > { %p2448_p0 = pneg %p2447_p13 }
 0x328   : > { %2726 = dma.done.wait (%p2448_p0), %s2242_s5, 5120  }
 0x329   : > { %2728 = vsyncadd (%p2448_p0), %s2242_s5, 4294962176  ;;  %p13_p1 = scmp.ge.s32.totalorder %s2859_s18, 4   ;;  %s5077_s12 = smov %s2735_s13 }
 0x32a   : > { %s5078_s13 = smov %s2739_s14  ;;  %s5079_s14 = smov %s2871_s21 }
 0x32b   : > { %s5080_s15 = smov %s2859_s18  ;;  %15 = sbr.rel (!%p13_p1) target bundleno = 5 (0x5), region = 200 }
 0x330   :  { %2247 = vsyncpa [#allocation4], 1 }
 0x331   :  { %2249 = vsyncpa [#allocation4 + $0x1], 1 }

</bundles_post_ra>
